<compile_context>
chip_gen: v7x
topology: tpu7x:2x2x1
jax: 0.10.0
libtpu: 0.0.40
codegen_flags: <defaults>
</compile_context>

<pallas_src>
import jax
import jax.numpy as jnp
from jax.experimental import pallas as pl
from jax.experimental.pallas import tpu as pltpu

NUM_CLASSES = 200     # stands in for len(CATEGORY_ID_LIST) (not defined in the file)
NUM_LEVEL1 = 23       # level-1 label space (hard-coded 23 in the module)
HIDDEN = 768          # bert_output_size (hard-coded 768 in the module)
LABEL_DIM = 128       # label embedding dim (hard-coded 128 in the module)

# --- packed weight layout: rhs768 [768, 1536] bf16, lane-aligned column blocks ----
_C_CT1, _C_CV1, _C_F1A, _C_F1B = 0, 128, 256, 384            # 23 columns used each
_C_CTA, _C_CVA, _C_CLSA, _C_CLSB = 512, 768, 1024, 1280      # 200 columns used each
RHS768_W = 1536
# fused label-emb slab: block-diagonal [96, 768] bf16 (3 blocks of K=32, N=256)
LE_W = 256
LE_K = 32
RHS_LE_K = 3 * LE_K   # 96
RHS_LE_W = 3 * LE_W   # 768
# --- output slab layout: one lane-dense [B, 1152] array, sliced in the wrapper ----
_O_PRED, _O_SUB1, _O_SUB2 = 0, 256, 512
_O_S1L1, _O_S2L1, _O_FINL1 = 768, 896, 1024
OUT_W = 1152

BATCH_BLK = 8         # sublane-aligned batch block (grid axis, "parallel")


def _softmax_rows(x):
    """Row softmax in f32; divide on the EUP via approx reciprocal."""
    m = jnp.max(x, axis=-1, keepdims=True)
    e = jnp.exp(x - m)
    return e * pl.reciprocal(jnp.sum(e, axis=-1, keepdims=True), approx=True)


def multimodal_head_kernel(
    # inputs
    text_ref, tmask_ref, frame_ref,
    rhs768_ref, rhs_le_ref, bias_l1_ref, bias_l2_ref,
    # output
    out_ref,
):
    f32 = jnp.float32
    bf16 = jnp.bfloat16
    BB = text_ref.shape[0]   # batch block; pad rows are zero (wrapper-side padding)

    # --- pooling (MeanPooling over title_mask; AdaptiveAvgPool1d over frames) ------
    mexp = tmask_ref[...][:, :, None]                             # [BB, Lt, 1] f32
    sum_emb = jnp.sum(text_ref[...].astype(f32) * mexp, axis=1)   # [BB, H]
    sum_mask = jnp.maximum(jnp.sum(mexp, axis=1), 1e-9)           # [BB, 1]
    text_l1 = sum_emb * pl.reciprocal(sum_mask, approx=True)      # text_level_1_input
    video_l1 = jnp.mean(frame_ref[...].astype(f32), axis=1)       # video_level_1_input

    # --- stage 1: ONE MXU pass over the N-packed weight slab ------------------------
    # LHS = [text_l1 | video_l1] stacked along sublanes (no VMEM scratch round-trip).
    # Token-type embeddings were folded into bias_l1[2] / bias_l2[2] in pack_params.
    # TODO(synk): BertCrossLayer cross-modal attention blocks are external pretrained
    # modules (definition not in this file); treated as identity here.
    lhs = jnp.concatenate([text_l1, video_l1], axis=0).astype(bf16)       # [2*BB, 768]
    r = jnp.dot(lhs, rhs768_ref[...], preferred_element_type=f32)         # [2*BB, 1536]
    r_t = r[0:BB]          # text_l1 @ slab
    r_v = r[BB:2 * BB]     # video_l1 @ slab

    sub1_l1 = r_t[:, _C_CT1:_C_CT1 + 128] + bias_l1_ref[0:1, :]   # class_text_level_1
    sub2_l1 = r_v[:, _C_CV1:_C_CV1 + 128] + bias_l1_ref[1:2, :]   # class_video_level_1
    fin_l1 = (r_t[:, _C_F1A:_C_F1A + 128] + r_v[:, _C_F1B:_C_F1B + 128]
              + bias_l1_ref[2:3, :])                               # final_class_level_1
    # (columns >= 23 are exactly zero: zero-padded weights + zero-padded biases)

    # --- stage 2: fused label-embedding pass -----------------------------------------
    # softmax(l1) @ label_emb @ W_b == softmax(l1) @ (label_emb @ W_b); the three
    # folded slabs are packed block-diagonally so e_t|e_v|e_f come from ONE dot.
    p_t = _softmax_rows(sub1_l1[:, 0:NUM_LEVEL1])
    p_v = _softmax_rows(sub2_l1[:, 0:NUM_LEVEL1])
    p_f = _softmax_rows(fin_l1[:, 0:NUM_LEVEL1])
    zpad = jnp.zeros((BB, LE_K - NUM_LEVEL1), f32)
    p_cat = jnp.concatenate([p_t, zpad, p_v, zpad, p_f, zpad], axis=-1)   # [BB, 96]
    e = jnp.dot(p_cat.astype(bf16), rhs_le_ref[...],
                preferred_element_type=f32)                               # [BB, 768]

    sub1 = r_t[:, _C_CTA:_C_CTA + 256] + e[:, 0:256] + bias_l2_ref[0:1, :]      # class_text
    sub2 = r_v[:, _C_CVA:_C_CVA + 256] + e[:, 256:512] + bias_l2_ref[1:2, :]    # class_video
    # classifier2 on cat([cls_text, cls_img, emb_f]); dropout1..5 are identity in eval
    # so prediction1..5 coincide.  TODO(synk): training-time dropout not modeled.
    pred = (r_t[:, _C_CLSA:_C_CLSA + 256] + r_v[:, _C_CLSB:_C_CLSB + 256]
            + e[:, 512:768] + bias_l2_ref[2:3, :])

    # --- single lane-dense, unmasked full-width store ---------------------------------
    out_ref[...] = jnp.concatenate(
        [pred, sub1, sub2, sub1_l1, sub2_l1, fin_l1], axis=-1)            # [BB, 1152]


def init_params(key):
    """Deterministic parameter init matching init_weights / torch init in __init__ (f32)."""
    ks = iter(jax.random.split(key, 32))

    def linear(fan_in, fan_out):
        w = 0.02 * jax.random.normal(next(ks), (fan_in, fan_out), jnp.float32)
        b = jnp.zeros((1, fan_out), jnp.float32)
        return w, b

    p = {}
    p["tte"] = 0.02 * jax.random.normal(next(ks), (2, HIDDEN), jnp.float32)  # Embedding(2,768)
    p["w_ct1"], p["b_ct1"] = linear(HIDDEN, NUM_LEVEL1)
    p["w_cv1"], p["b_cv1"] = linear(HIDDEN, NUM_LEVEL1)
    w, p["b_ct"] = linear(HIDDEN + LABEL_DIM, NUM_CLASSES)
    p["w_ct_a"], p["w_ct_b"] = w[:HIDDEN], w[HIDDEN:]
    w, p["b_cv"] = linear(HIDDEN + LABEL_DIM, NUM_CLASSES)
    p["w_cv_a"], p["w_cv_b"] = w[:HIDDEN], w[HIDDEN:]
    w, p["b_f1"] = linear(2 * HIDDEN, NUM_LEVEL1)
    p["w_f1_a"], p["w_f1_b"] = w[:HIDDEN], w[HIDDEN:]
    w, p["b_cls"] = linear(2 * HIDDEN + LABEL_DIM, NUM_CLASSES)
    p["w_cls_a"] = w[:HIDDEN]
    p["w_cls_b"] = w[HIDDEN:2 * HIDDEN]
    p["w_cls_c"] = w[2 * HIDDEN:]
    p["le_text"] = 0.01 * jax.random.normal(next(ks), (NUM_LEVEL1, LABEL_DIM), jnp.float32)
    p["le_vid"] = 0.01 * jax.random.normal(next(ks), (NUM_LEVEL1, LABEL_DIM), jnp.float32)
    p["le"] = 0.01 * jax.random.normal(next(ks), (NUM_LEVEL1, LABEL_DIM), jnp.float32)
    return p


def _pad_cols(x, width):
    return jnp.concatenate(
        [x, jnp.zeros(x.shape[:-1] + (width - x.shape[-1],), x.dtype)], axis=-1)


def pack_params(p):
    """One-time packing of f32 params into lane-aligned bf16 MXU slabs + packed biases.

    Algebraic folds (exact, under identity cross-attention):
      * tte0 @ w_f1_a + tte1 @ w_f1_b  -> bias_l1[2]
      * tte0 @ w_cls_a + tte1 @ w_cls_b -> bias_l2[2]
      * label_emb @ W_b folded into rhs_le (block-diagonal, one fused dot in-kernel).
    TODO(synk): int8 weight compression of rhs768 (v5e/v6e only) and cross-call
    prefetch of the slab are not implemented.
    """
    rhs768 = jnp.concatenate([
        _pad_cols(p["w_ct1"], 128), _pad_cols(p["w_cv1"], 128),
        _pad_cols(p["w_f1_a"], 128), _pad_cols(p["w_f1_b"], 128),
        _pad_cols(p["w_ct_a"], 256), _pad_cols(p["w_cv_a"], 256),
        _pad_cols(p["w_cls_a"], 256), _pad_cols(p["w_cls_b"], 256),
    ], axis=-1).astype(jnp.bfloat16)                                   # [768, 1536]

    tte0 = p["tte"][0:1, :]
    tte1 = p["tte"][1:2, :]
    bias_l1 = jnp.concatenate([
        _pad_cols(p["b_ct1"], 128),
        _pad_cols(p["b_cv1"], 128),
        _pad_cols(p["b_f1"] + tte0 @ p["w_f1_a"] + tte1 @ p["w_f1_b"], 128),
    ], axis=0)                                                         # [3, 128] f32
    bias_l2 = jnp.concatenate([
        _pad_cols(p["b_ct"], 256),
        _pad_cols(p["b_cv"], 256),
        _pad_cols(p["b_cls"] + tte0 @ p["w_cls_a"] + tte1 @ p["w_cls_b"], 256),
    ], axis=0)                                                         # [3, 256] f32

    # fused label-emb slab: block-diagonal [96, 768]
    rhs_le = jnp.zeros((RHS_LE_K, RHS_LE_W), jnp.float32)
    rhs_le = rhs_le.at[0:NUM_LEVEL1, 0:NUM_CLASSES].set(p["le_text"] @ p["w_ct_b"])
    rhs_le = rhs_le.at[LE_K:LE_K + NUM_LEVEL1, LE_W:LE_W + NUM_CLASSES].set(
        p["le_vid"] @ p["w_cv_b"])
    rhs_le = rhs_le.at[2 * LE_K:2 * LE_K + NUM_LEVEL1, 2 * LE_W:2 * LE_W + NUM_CLASSES].set(
        p["le"] @ p["w_cls_c"])
    rhs_le = rhs_le.astype(jnp.bfloat16)                               # [96, 768]

    return {"rhs768": rhs768, "rhs_le": rhs_le,
            "bias_l1": bias_l1, "bias_l2": bias_l2}


def multimodal_head(packed, text_embeds, title_mask, frame_feats):
    B, Lt, _ = text_embeds.shape
    Lf = frame_feats.shape[1]
    BB = BATCH_BLK
    b_pad = ((B + BB - 1) // BB) * BB

    def pad_batch(x):
        if x.shape[0] == b_pad:
            return x
        pad = jnp.zeros((b_pad - x.shape[0],) + x.shape[1:], x.dtype)
        return jnp.concatenate([x, pad], axis=0)

    # bf16 feature feed halves the HBM bytes of the pooling phase.
    text = pad_batch(text_embeds.astype(jnp.bfloat16))
    mask = pad_batch(title_mask.astype(jnp.float32))
    frame = pad_batch(frame_feats.astype(jnp.bfloat16))
    args = (text, mask, frame,
            packed["rhs768"], packed["rhs_le"], packed["bias_l1"], packed["bias_l2"])

    nb = b_pad // BB
    grid_spec = pltpu.PrefetchScalarGridSpec(
        num_scalar_prefetch=0,
        grid=(nb,),
        in_specs=[
            pl.BlockSpec((BB, Lt, HIDDEN), lambda i: (i, 0, 0)),
            pl.BlockSpec((BB, Lt), lambda i: (i, 0)),
            pl.BlockSpec((BB, Lf, HIDDEN), lambda i: (i, 0, 0)),
            pl.BlockSpec((HIDDEN, RHS768_W), lambda i: (0, 0)),
            pl.BlockSpec((RHS_LE_K, RHS_LE_W), lambda i: (0, 0)),
            pl.BlockSpec((3, 128), lambda i: (0, 0)),
            pl.BlockSpec((3, 256), lambda i: (0, 0)),
        ],
        out_specs=pl.BlockSpec((BB, OUT_W), lambda i: (i, 0)),
    )

    flops = int(2 * (2 * b_pad * HIDDEN * RHS768_W + b_pad * RHS_LE_K * RHS_LE_W)
                + 2 * b_pad * (Lt + Lf) * HIDDEN)
    bytes_accessed = int(sum(int(a.size) * a.dtype.itemsize for a in args)
                         + b_pad * OUT_W * 4)
    slab = pl.pallas_call(
        multimodal_head_kernel,
        out_shape=jax.ShapeDtypeStruct((b_pad, OUT_W), jnp.float32),
        grid_spec=grid_spec,
        compiler_params=pltpu.CompilerParams(
            dimension_semantics=("parallel",),
            vmem_limit_bytes=32 * 1024 * 1024),
        cost_estimate=pl.CostEstimate(flops=flops,
                                      transcendentals=int(3 * b_pad * NUM_LEVEL1),
                                      bytes_accessed=bytes_accessed),
    )(*args)

    slab = slab[:B]
    pred = slab[:, _O_PRED:_O_PRED + NUM_CLASSES]
    sub1 = slab[:, _O_SUB1:_O_SUB1 + NUM_CLASSES]
    sub2 = slab[:, _O_SUB2:_O_SUB2 + NUM_CLASSES]
    sub1_l1 = slab[:, _O_S1L1:_O_S1L1 + NUM_LEVEL1]
    sub2_l1 = slab[:, _O_S2L1:_O_S2L1 + NUM_LEVEL1]
    fin_l1 = slab[:, _O_FINL1:_O_FINL1 + NUM_LEVEL1]
    return pred, sub1, sub2, sub1_l1, sub2_l1, fin_l1


def _cross_entropy(logits, labels):
    logp = jax.nn.log_softmax(logits, axis=-1)
    return -jnp.mean(logp[jnp.arange(labels.shape[0]), labels])


def cal_loss(prediction, label, subtask1_pred, subtask2_pred,
             sub1_l1, sub2_l1, final_l1, label_aux):
    label = jnp.squeeze(label, axis=1)
    label_aux = jnp.squeeze(label_aux, axis=1)
    # prediction1..5 are identical (eval-mode dropout), so their mean CE == CE(prediction)
    loss_main = _cross_entropy(prediction, label)
    loss_sub1 = _cross_entropy(subtask1_pred, label)
    loss_sub2 = _cross_entropy(subtask2_pred, label)
    loss_main_l1 = _cross_entropy(final_l1, label_aux)
    loss_sub1_l1 = _cross_entropy(sub1_l1, label_aux)
    loss_sub2_l1 = _cross_entropy(sub2_l1, label_aux)
    loss = (loss_main + 0.25 * loss_sub1 + 0.25 * loss_sub2
            + 0.5 * (loss_main_l1 + 0.25 * loss_sub1_l1 + 0.25 * loss_sub2_l1))
    pred_label_id = jnp.argmax(prediction, axis=1)
    accuracy = jnp.sum((label == pred_label_id).astype(jnp.float32)) / label.shape[0]
    return loss, accuracy, pred_label_id, label, prediction


def multimodal_forward(packed_params, inputs, inference=False):
    # frame_mask only feeds the (external) cross-attention masks and is not DMA'd
    # into the kernel.
    pred, sub1, sub2, sub1_l1, sub2_l1, fin_l1 = multimodal_head(
        packed_params,
        inputs["text_embeds"],   # TODO(synk): BertModel is an external checkpoint; synthetic last_hidden_state
        inputs["title_mask"],
        inputs["frame_input"],   # TODO(synk): swin_tiny visual backbone is external; synthetic frame features
    )
    if inference:
        return jnp.argmax(pred, axis=1), pred
    return cal_loss(pred, inputs["label"], sub1, sub2,
                    sub1_l1, sub2_l1, fin_l1, inputs["label_aux"])


if __name__ == "__main__":
    key = jax.random.PRNGKey(0)
    k_params, k_data = jax.random.split(key)
    params = init_params(k_params)
    packed = pack_params(params)

    B, Lt, Lf = 2, 8, 8
    kd = jax.random.split(k_data, 6)
    inputs = {
        "text_embeds": 0.02 * jax.random.normal(kd[0], (B, Lt, HIDDEN), jnp.float32),
        "title_mask": jnp.array([[1] * Lt, [1] * (Lt - 2) + [0] * 2], jnp.float32),
        "frame_input": 0.02 * jax.random.normal(kd[1], (B, Lf, HIDDEN), jnp.float32),
        "frame_mask": jnp.ones((B, Lf), jnp.float32),
        "label": jax.random.randint(kd[2], (B, 1), 0, NUM_CLASSES),
        "label_aux": jax.random.randint(kd[3], (B, 1), 0, NUM_LEVEL1),
    }

    loss, acc, pred_id, label, prediction = multimodal_forward(packed, inputs, inference=False)
    pred_id_inf, pred_inf = multimodal_forward(packed, inputs, inference=True)
    jax.block_until_ready((loss, acc, pred_id, label, prediction, pred_id_inf, pred_inf))

    assert prediction.shape == (B, NUM_CLASSES)
    assert loss.shape == () and acc.shape == ()
    assert bool(jnp.all(jnp.isfinite(prediction))) and bool(jnp.isfinite(loss))
    print("KERNEL_OK")
</pallas_src>

<mosaic_0001>
module attributes {stable_mosaic.version = 11 : i64} {
  func.func @multimodal_head_kernel(%arg0: i32, %arg1: memref<8x8x768xbf16, #tpu.memory_space<vmem>>, %arg2: memref<8x8xf32, #tpu.memory_space<vmem>>, %arg3: memref<8x8x768xbf16, #tpu.memory_space<vmem>>, %arg4: memref<768x1536xbf16, #tpu.memory_space<vmem>>, %arg5: memref<96x768xbf16, #tpu.memory_space<vmem>>, %arg6: memref<3x128xf32, #tpu.memory_space<vmem>>, %arg7: memref<3x256xf32, #tpu.memory_space<vmem>>, %arg8: memref<8x1152xf32, #tpu.memory_space<vmem>>) attributes {dimension_semantics = [#tpu.dimension_semantics<parallel>], iteration_bounds = array<i64: 1>, scalar_prefetch = 0 : i64, scratch_operands = 0 : i64, tpu.core_type = #tpu.core_type<tc>, window_params = [{transform_indices = @transform_0, window_bounds = array<i64: 8, 8, 768>}, {transform_indices = @transform_1, window_bounds = array<i64: 8, 8>}, {transform_indices = @transform_2, window_bounds = array<i64: 8, 8, 768>}, {pipeline_mode = #tpu.pipeline_mode<synchronous>, transform_indices = @transform_3, window_bounds = array<i64: 768, 1536>}, {pipeline_mode = #tpu.pipeline_mode<synchronous>, transform_indices = @transform_4, window_bounds = array<i64: 96, 768>}, {pipeline_mode = #tpu.pipeline_mode<synchronous>, transform_indices = @transform_5, window_bounds = array<i64: 3, 128>}, {pipeline_mode = #tpu.pipeline_mode<synchronous>, transform_indices = @transform_6, window_bounds = array<i64: 3, 256>}, {transform_indices = @transform_7, window_bounds = array<i64: 8, 1152>}]} {
    %c0 = arith.constant 0 : index
    %c0_0 = arith.constant 0 : index
    %0 = vector.load %arg2[%c0, %c0_0] : memref<8x8xf32, #tpu.memory_space<vmem>>, vector<8x8xf32>
    %1 = vector.shape_cast %0 : vector<8x8xf32> to vector<8x8x1xf32>
    %c0_1 = arith.constant 0 : index
    %c0_2 = arith.constant 0 : index
    %c0_3 = arith.constant 0 : index
    %2 = vector.load %arg1[%c0_1, %c0_2, %c0_3] : memref<8x8x768xbf16, #tpu.memory_space<vmem>>, vector<8x8x768xbf16>
    %3 = arith.extf %2 : vector<8x8x768xbf16> to vector<8x8x768xf32>
    %4 = vector.broadcast %1 : vector<8x8x1xf32> to vector<8x8x768xf32>
    %5 = arith.mulf %3, %4 : vector<8x8x768xf32>
    %cst = arith.constant dense<0.000000e+00> : vector<8x768xf32>
    %6 = vector.multi_reduction <add>, %5, %cst [1] : vector<8x8x768xf32> to vector<8x768xf32>
    %cst_4 = arith.constant dense<0.000000e+00> : vector<8x1xf32>
    %7 = vector.multi_reduction <add>, %1, %cst_4 [1] : vector<8x8x1xf32> to vector<8x1xf32>
    %cst_5 = arith.constant 9.99999971E-10 : f32
    %8 = vector.broadcast %cst_5 : f32 to vector<8x1xf32>
    %9 = arith.maximumf %7, %8 : vector<8x1xf32>
    %10 = tpu.reciprocal %9 {approx = true} : vector<8x1xf32> -> vector<8x1xf32>
    %11 = vector.broadcast %10 : vector<8x1xf32> to vector<8x768xf32>
    %12 = arith.mulf %6, %11 : vector<8x768xf32>
    %c0_6 = arith.constant 0 : index
    %c0_7 = arith.constant 0 : index
    %c0_8 = arith.constant 0 : index
    %13 = vector.load %arg3[%c0_6, %c0_7, %c0_8] : memref<8x8x768xbf16, #tpu.memory_space<vmem>>, vector<8x8x768xbf16>
    %14 = arith.extf %13 : vector<8x8x768xbf16> to vector<8x8x768xf32>
    %cst_9 = arith.constant dense<0.000000e+00> : vector<8x768xf32>
    %15 = vector.multi_reduction <add>, %14, %cst_9 [1] : vector<8x8x768xf32> to vector<8x768xf32>
    %cst_10 = arith.constant 8.000000e+00 : f32
    %16 = vector.broadcast %cst_10 : f32 to vector<8x768xf32>
    %17 = arith.divf %15, %16 : vector<8x768xf32>
    %18 = tpu.concatenate %12, %17 in 0 : vector<8x768xf32>, vector<8x768xf32> -> vector<16x768xf32>
    %19 = arith.truncf %18 : vector<16x768xf32> to vector<16x768xbf16>
    %c0_11 = arith.constant 0 : index
    %c0_12 = arith.constant 0 : index
    %20 = vector.load %arg4[%c0_11, %c0_12] : memref<768x1536xbf16, #tpu.memory_space<vmem>>, vector<768x1536xbf16>
    %cst_13 = arith.constant dense<0.000000e+00> : vector<16x1536xf32>
    %21 = tpu.matmul %19, %20, %cst_13 {dimension_numbers = #tpu.dot_dimension_numbers<[1], [0], [0], [1], [0, 0, 1, 1], [], []>} : vector<16x768xbf16>, vector<768x1536xbf16>, vector<16x1536xf32> -> vector<16x1536xf32>
    %22 = vector.extract_strided_slice %21 {offsets = [0, 0], sizes = [8, 1536], strides = [1, 1]} : vector<16x1536xf32> to vector<8x1536xf32>
    %23 = vector.extract_strided_slice %21 {offsets = [8, 0], sizes = [8, 1536], strides = [1, 1]} : vector<16x1536xf32> to vector<8x1536xf32>
    %24 = vector.extract_strided_slice %22 {offsets = [0, 0], sizes = [8, 128], strides = [1, 1]} : vector<8x1536xf32> to vector<8x128xf32>
    %c0_14 = arith.constant 0 : index
    %c0_15 = arith.constant 0 : index
    %25 = vector.load %arg6[%c0_14, %c0_15] : memref<3x128xf32, #tpu.memory_space<vmem>>, vector<1x128xf32>
    %26 = vector.broadcast %25 : vector<1x128xf32> to vector<8x128xf32>
    %27 = arith.addf %24, %26 : vector<8x128xf32>
    %28 = vector.extract_strided_slice %23 {offsets = [0, 128], sizes = [8, 128], strides = [1, 1]} : vector<8x1536xf32> to vector<8x128xf32>
    %c1 = arith.constant 1 : index
    %c0_16 = arith.constant 0 : index
    %29 = vector.load %arg6[%c1, %c0_16] : memref<3x128xf32, #tpu.memory_space<vmem>>, vector<1x128xf32>
    %30 = vector.broadcast %29 : vector<1x128xf32> to vector<8x128xf32>
    %31 = arith.addf %28, %30 : vector<8x128xf32>
    %32 = vector.extract_strided_slice %22 {offsets = [0, 256], sizes = [8, 128], strides = [1, 1]} : vector<8x1536xf32> to vector<8x128xf32>
    %33 = vector.extract_strided_slice %23 {offsets = [0, 384], sizes = [8, 128], strides = [1, 1]} : vector<8x1536xf32> to vector<8x128xf32>
    %34 = arith.addf %32, %33 : vector<8x128xf32>
    %c2 = arith.constant 2 : index
    %c0_17 = arith.constant 0 : index
    %35 = vector.load %arg6[%c2, %c0_17] : memref<3x128xf32, #tpu.memory_space<vmem>>, vector<1x128xf32>
    %36 = vector.broadcast %35 : vector<1x128xf32> to vector<8x128xf32>
    %37 = arith.addf %34, %36 : vector<8x128xf32>
    %38 = vector.extract_strided_slice %27 {offsets = [0, 0], sizes = [8, 23], strides = [1, 1]} : vector<8x128xf32> to vector<8x23xf32>
    %cst_18 = arith.constant dense<0xFF800000> : vector<8xf32>
    %39 = vector.multi_reduction <maximumf>, %38, %cst_18 [1] : vector<8x23xf32> to vector<8xf32>
    %40 = vector.shape_cast %39 : vector<8xf32> to vector<8x1xf32>
    %41 = vector.broadcast %40 : vector<8x1xf32> to vector<8x23xf32>
    %42 = arith.subf %38, %41 : vector<8x23xf32>
    %43 = math.exp %42 : vector<8x23xf32>
    %cst_19 = arith.constant dense<0.000000e+00> : vector<8xf32>
    %44 = vector.multi_reduction <add>, %43, %cst_19 [1] : vector<8x23xf32> to vector<8xf32>
    %45 = vector.shape_cast %44 : vector<8xf32> to vector<8x1xf32>
    %46 = tpu.reciprocal %45 {approx = true} : vector<8x1xf32> -> vector<8x1xf32>
    %47 = vector.broadcast %46 : vector<8x1xf32> to vector<8x23xf32>
    %48 = arith.mulf %43, %47 : vector<8x23xf32>
    %49 = vector.extract_strided_slice %31 {offsets = [0, 0], sizes = [8, 23], strides = [1, 1]} : vector<8x128xf32> to vector<8x23xf32>
    %cst_20 = arith.constant dense<0xFF800000> : vector<8xf32>
    %50 = vector.multi_reduction <maximumf>, %49, %cst_20 [1] : vector<8x23xf32> to vector<8xf32>
    %51 = vector.shape_cast %50 : vector<8xf32> to vector<8x1xf32>
    %52 = vector.broadcast %51 : vector<8x1xf32> to vector<8x23xf32>
    %53 = arith.subf %49, %52 : vector<8x23xf32>
    %54 = math.exp %53 : vector<8x23xf32>
    %cst_21 = arith.constant dense<0.000000e+00> : vector<8xf32>
    %55 = vector.multi_reduction <add>, %54, %cst_21 [1] : vector<8x23xf32> to vector<8xf32>
    %56 = vector.shape_cast %55 : vector<8xf32> to vector<8x1xf32>
    %57 = tpu.reciprocal %56 {approx = true} : vector<8x1xf32> -> vector<8x1xf32>
    %58 = vector.broadcast %57 : vector<8x1xf32> to vector<8x23xf32>
    %59 = arith.mulf %54, %58 : vector<8x23xf32>
    %60 = vector.extract_strided_slice %37 {offsets = [0, 0], sizes = [8, 23], strides = [1, 1]} : vector<8x128xf32> to vector<8x23xf32>
    %cst_22 = arith.constant dense<0xFF800000> : vector<8xf32>
    %61 = vector.multi_reduction <maximumf>, %60, %cst_22 [1] : vector<8x23xf32> to vector<8xf32>
    %62 = vector.shape_cast %61 : vector<8xf32> to vector<8x1xf32>
    %63 = vector.broadcast %62 : vector<8x1xf32> to vector<8x23xf32>
    %64 = arith.subf %60, %63 : vector<8x23xf32>
    %65 = math.exp %64 : vector<8x23xf32>
    %cst_23 = arith.constant dense<0.000000e+00> : vector<8xf32>
    %66 = vector.multi_reduction <add>, %65, %cst_23 [1] : vector<8x23xf32> to vector<8xf32>
    %67 = vector.shape_cast %66 : vector<8xf32> to vector<8x1xf32>
    %68 = tpu.reciprocal %67 {approx = true} : vector<8x1xf32> -> vector<8x1xf32>
    %69 = vector.broadcast %68 : vector<8x1xf32> to vector<8x23xf32>
    %70 = arith.mulf %65, %69 : vector<8x23xf32>
    %cst_24 = arith.constant 0.000000e+00 : f32
    %71 = vector.broadcast %cst_24 : f32 to vector<8x9xf32>
    %72 = tpu.concatenate %48, %71, %59, %71, %70, %71 in 1 : vector<8x23xf32>, vector<8x9xf32>, vector<8x23xf32>, vector<8x9xf32>, vector<8x23xf32>, vector<8x9xf32> -> vector<8x96xf32>
    %73 = arith.truncf %72 : vector<8x96xf32> to vector<8x96xbf16>
    %c0_25 = arith.constant 0 : index
    %c0_26 = arith.constant 0 : index
    %74 = vector.load %arg5[%c0_25, %c0_26] : memref<96x768xbf16, #tpu.memory_space<vmem>>, vector<96x768xbf16>
    %cst_27 = arith.constant dense<0.000000e+00> : vector<8x768xf32>
    %75 = tpu.matmul %73, %74, %cst_27 {dimension_numbers = #tpu.dot_dimension_numbers<[1], [0], [0], [1], [0, 0, 1, 1], [], []>} : vector<8x96xbf16>, vector<96x768xbf16>, vector<8x768xf32> -> vector<8x768xf32>
    %76 = vector.extract_strided_slice %22 {offsets = [0, 512], sizes = [8, 256], strides = [1, 1]} : vector<8x1536xf32> to vector<8x256xf32>
    %77 = vector.extract_strided_slice %75 {offsets = [0, 0], sizes = [8, 256], strides = [1, 1]} : vector<8x768xf32> to vector<8x256xf32>
    %78 = arith.addf %76, %77 : vector<8x256xf32>
    %c0_28 = arith.constant 0 : index
    %c0_29 = arith.constant 0 : index
    %79 = vector.load %arg7[%c0_28, %c0_29] : memref<3x256xf32, #tpu.memory_space<vmem>>, vector<1x256xf32>
    %80 = vector.broadcast %79 : vector<1x256xf32> to vector<8x256xf32>
    %81 = arith.addf %78, %80 : vector<8x256xf32>
    %82 = vector.extract_strided_slice %23 {offsets = [0, 768], sizes = [8, 256], strides = [1, 1]} : vector<8x1536xf32> to vector<8x256xf32>
    %83 = vector.extract_strided_slice %75 {offsets = [0, 256], sizes = [8, 256], strides = [1, 1]} : vector<8x768xf32> to vector<8x256xf32>
    %84 = arith.addf %82, %83 : vector<8x256xf32>
    %c1_30 = arith.constant 1 : index
    %c0_31 = arith.constant 0 : index
    %85 = vector.load %arg7[%c1_30, %c0_31] : memref<3x256xf32, #tpu.memory_space<vmem>>, vector<1x256xf32>
    %86 = vector.broadcast %85 : vector<1x256xf32> to vector<8x256xf32>
    %87 = arith.addf %84, %86 : vector<8x256xf32>
    %88 = vector.extract_strided_slice %22 {offsets = [0, 1024], sizes = [8, 256], strides = [1, 1]} : vector<8x1536xf32> to vector<8x256xf32>
    %89 = vector.extract_strided_slice %23 {offsets = [0, 1280], sizes = [8, 256], strides = [1, 1]} : vector<8x1536xf32> to vector<8x256xf32>
    %90 = arith.addf %88, %89 : vector<8x256xf32>
    %91 = vector.extract_strided_slice %75 {offsets = [0, 512], sizes = [8, 256], strides = [1, 1]} : vector<8x768xf32> to vector<8x256xf32>
    %92 = arith.addf %90, %91 : vector<8x256xf32>
    %c2_32 = arith.constant 2 : index
    %c0_33 = arith.constant 0 : index
    %93 = vector.load %arg7[%c2_32, %c0_33] : memref<3x256xf32, #tpu.memory_space<vmem>>, vector<1x256xf32>
    %94 = vector.broadcast %93 : vector<1x256xf32> to vector<8x256xf32>
    %95 = arith.addf %92, %94 : vector<8x256xf32>
    %96 = tpu.concatenate %95, %81, %87, %27, %31, %37 in 1 : vector<8x256xf32>, vector<8x256xf32>, vector<8x256xf32>, vector<8x128xf32>, vector<8x128xf32>, vector<8x128xf32> -> vector<8x1152xf32>
    %c0_34 = arith.constant 0 : index
    %c0_35 = arith.constant 0 : index
    %97 = vector.load %arg8[%c0_34, %c0_35] : memref<8x1152xf32, #tpu.memory_space<vmem>>, vector<8x1152xf32>
    tpu.vector_store %arg8[%c0_34, %c0_35], %96 {strides = array<i32>} : memref<8x1152xf32, #tpu.memory_space<vmem>>, vector<8x1152xf32>,
    return
  }
  func.func @transform_0(%arg0: i32) -> (i32, i32, i32) {
    %c0_i32 = arith.constant 0 : i32
    %c0_i32_0 = arith.constant 0 : i32
    %c0_i32_1 = arith.constant 0 : i32
    return %arg0, %c0_i32, %c0_i32_0 : i32, i32, i32
  }
  func.func @transform_1(%arg0: i32) -> (i32, i32) {
    %c0_i32 = arith.constant 0 : i32
    %c0_i32_0 = arith.constant 0 : i32
    return %arg0, %c0_i32 : i32, i32
  }
  func.func @transform_2(%arg0: i32) -> (i32, i32, i32) {
    %c0_i32 = arith.constant 0 : i32
    %c0_i32_0 = arith.constant 0 : i32
    %c0_i32_1 = arith.constant 0 : i32
    return %arg0, %c0_i32, %c0_i32_0 : i32, i32, i32
  }
  func.func @transform_3(%arg0: i32) -> (i32, i32) {
    %c0_i32 = arith.constant 0 : i32
    %c0_i32_0 = arith.constant 0 : i32
    %c0_i32_1 = arith.constant 0 : i32
    return %c0_i32, %c0_i32_0 : i32, i32
  }
  func.func @transform_4(%arg0: i32) -> (i32, i32) {
    %c0_i32 = arith.constant 0 : i32
    %c0_i32_0 = arith.constant 0 : i32
    %c0_i32_1 = arith.constant 0 : i32
    return %c0_i32, %c0_i32_0 : i32, i32
  }
  func.func @transform_5(%arg0: i32) -> (i32, i32) {
    %c0_i32 = arith.constant 0 : i32
    %c0_i32_0 = arith.constant 0 : i32
    %c0_i32_1 = arith.constant 0 : i32
    return %c0_i32, %c0_i32_0 : i32, i32
  }
  func.func @transform_6(%arg0: i32) -> (i32, i32) {
    %c0_i32 = arith.constant 0 : i32
    %c0_i32_0 = arith.constant 0 : i32
    %c0_i32_1 = arith.constant 0 : i32
    return %c0_i32, %c0_i32_0 : i32, i32
  }
  func.func @transform_7(%arg0: i32) -> (i32, i32) {
    %c0_i32 = arith.constant 0 : i32
    %c0_i32_0 = arith.constant 0 : i32
    return %arg0, %c0_i32 : i32, i32
  }
}

</mosaic_0001>

<bundles_post_ra>
// kernel: tpu_custom_call.1
= control target key start
LH: loop header
LB: loop body
LE: loop exit
PB: predicated region body
PF: predicated region fallthrough
CT: control target
= control target key end

     0   :  { %12 = vsyncpa [#allocation3], 0  ;;  %s8778_s0 = inlined_call_operand.hbm [shape: bf16[8,8,768], index: 0, kind: input, shape index: {}]   ;;  %s8779_s1 = inlined_call_operand.hbm [shape: f32[8,8], index: 1, kind: input, shape index: {}]   ;;  %s8780_s2 = inlined_call_operand.hbm [shape: bf16[8,8,768], index: 2, kind: input, shape index: {}]   ;;  %s8781_s3 = inlined_call_operand.hbm [shape: bf16[768,1536], index: 3, kind: input, shape index: {}]   ;;  %s8782_s4 = inlined_call_operand.hbm [shape: bf16[96,768], index: 4, kind: input, shape index: {}]   ;;  %s8783_s5 = inlined_call_operand.hbm [shape: f32[3,128], index: 5, kind: input, shape index: {}]   ;;  %s8784_s6 = inlined_call_operand.hbm [shape: f32[3,256], index: 6, kind: input, shape index: {}]   ;;  %s8785_s7 = inlined_call_operand.hbm [shape: f32[8,1152], index: 7, kind: output, shape index: {}]  }
   0x1   :  { %13 = vsyncpa [#allocation6], 0 }
   0x2   :  { %14 = vsyncpa [#allocation9], 0 }
   0x3   :  { %15 = vsyncpa [#allocation12], 0 }
   0x4   :  { %16 = vsyncpa [#allocation4], 0  ;;  %s7806_s24 = smov [#allocation5]   ;;  %s7807_s26 = smov [#allocation8]  }
   0x5   :  { %s35_s25 = sshll.u32 %s7806_s24, 4  ;;  %s56_s27 = sshll.u32 %s7807_s26, 4  ;;  %s36_s25 = int_to_ptr.vmem [resolvable:$true] %s35_s25  ;;  %s7861_s27 = int_to_ptr.vmem [resolvable:$true] %s56_s27 }
   0x6   :  { %s7620_s30 = scalar_lea.hbm %s8779_s1, 128 }
   0x7   :  { %p7621_p0 = scmp.ne.s32.totalorder %s8779_s1, %s7620_s30  ;;  %p7624_p1 = scmp.lt.u32.totalorder %s7620_s30, %s8779_s1 }
   0x9   :  { %p7626_p2 = pnand %p7624_p1, %p7621_p0 }
   0xb   :  { %7629 = shalt.err (!%p7626_p2)
}
   0xc   :  { %s7630_s12 = scalar_lea.vmem %s36_s25, 128  ;;  %p7635_p4 = scmp.lt.s32.totalorder %s36_s25, %s36_s25 }
   0xd   :  { %p7631_p3 = scmp.ne.s32.totalorder %s36_s25, %s7630_s12  ;;  %p7636_p5 = scmp.lt.s32.totalorder %s7630_s12, %s7630_s12 }
   0xf   :  { %p7637_p6 = por %p7636_p5, %p7635_p4 }
  0x11   :  { %p7638_p7 = pnand %p7637_p6, %p7631_p3 }
  0x13   :  { %7641 = shalt.err (!%p7638_p7)
}
  0x14   :  { %38 = dma.hbm_to_vmem [thread:$0]  %s8779_s1, 128, %s36_s25, [#allocation6]  }
  0x15   :  { %s7642_s17 = scalar_lea.hbm %s8781_s3, 73728 }
  0x16   :  { %p7643_p8 = scmp.ne.s32.totalorder %s8781_s3, %s7642_s17  ;;  %p7646_p9 = scmp.lt.u32.totalorder %s7642_s17, %s8781_s3 }
  0x18   :  { %p7648_p10 = pnand %p7646_p9, %p7643_p8 }
  0x1a   :  { %7651 = shalt.err (!%p7648_p10)
}
  0x1b   :  { %s7652_s22 = scalar_lea.vmem %s7861_s27, 73728  ;;  %p7657_p12 = scmp.lt.s32.totalorder %s7861_s27, %s7861_s27 }
  0x1c   :  { %p7653_p11 = scmp.ne.s32.totalorder %s7861_s27, %s7652_s22  ;;  %p7658_p13 = scmp.lt.s32.totalorder %s7652_s22, %s7652_s22 }
  0x1e   :  { %p7659_p0 = por %p7658_p13, %p7657_p12 }
  0x20   :  { %p7660_p1 = pnand %p7659_p0, %p7653_p11 }
  0x22   :  { %7663 = shalt.err (!%p7660_p1)
}
  0x23   :  { %s7808_s1 = smov 768   ;;  %s7809_s23 = smov 48  }
  0x24   :  { %62 = dma.hbm_to_vmem [thread:$0]  %s8781_s3, 73728, %s7861_s27, [#allocation9], %s7808_s1, %s7808_s1, %s7809_s23  }
  0x25   :  { %s7810_s26 = smov [#allocation11]   ;;  %s7811_s29 = smov [#allocation2]  }
  0x26   :  { %s81_s28 = sshll.u32 %s7810_s26, 4  ;;  %s22_s30 = sshll.u32 %s7811_s29, 4  ;;  %s82_s28 = int_to_ptr.vmem [resolvable:$true] %s81_s28  ;;  %s7892_s30 = int_to_ptr.vmem [resolvable:$true] %s22_s30 }
  0x27   :  { %s7664_s10 = scalar_lea.hbm %s8783_s5, 64 }
  0x28   :  { %p7665_p2 = scmp.ne.s32.totalorder %s8783_s5, %s7664_s10  ;;  %p7668_p3 = scmp.lt.u32.totalorder %s7664_s10, %s8783_s5 }
  0x2a   :  { %p7670_p4 = pnand %p7668_p3, %p7665_p2 }
  0x2c   :  { %7673 = shalt.err (!%p7670_p4)
}
  0x2d   :  { %s7674_s3 = scalar_lea.vmem %s82_s28, 64  ;;  %p7679_p6 = scmp.lt.s32.totalorder %s82_s28, %s82_s28 }
  0x2e   :  { %p7675_p5 = scmp.ne.s32.totalorder %s82_s28, %s7674_s3  ;;  %p7680_p7 = scmp.lt.s32.totalorder %s7674_s3, %s7674_s3 }
  0x30   :  { %p7681_p8 = por %p7680_p7, %p7679_p6 }
  0x32   :  { %p7682_p9 = pnand %p7681_p8, %p7675_p5 }
  0x34   :  { %7685 = shalt.err (!%p7682_p9)
}
  0x35   :  { %84 = dma.hbm_to_vmem [thread:$0]  %s8783_s5, 64, %s82_s28, [#allocation12]  }
  0x36   :  { %s7686_s18 = scalar_lea.hbm %s8778_s0, 3072 }
  0x37   :  { %p7687_p10 = scmp.ne.s32.totalorder %s8778_s0, %s7686_s18  ;;  %p7690_p11 = scmp.lt.u32.totalorder %s7686_s18, %s8778_s0 }
  0x39   :  { %p7692_p12 = pnand %p7690_p11, %p7687_p10 }
  0x3b   :  { %7695 = shalt.err (!%p7692_p12)
}
  0x3c   :  { %s7696_s1 = scalar_lea.vmem %s7892_s30, 3072  ;;  %p7701_p0 = scmp.lt.s32.totalorder %s7892_s30, %s7892_s30 }
  0x3d   :  { %p7697_p13 = scmp.ne.s32.totalorder %s7892_s30, %s7696_s1  ;;  %p7702_p1 = scmp.lt.s32.totalorder %s7696_s1, %s7696_s1 }
  0x3f   :  { %p7703_p2 = por %p7702_p1, %p7701_p0 }
  0x41   :  { %p7704_p3 = pnand %p7703_p2, %p7697_p13 }
  0x43   :  { %7707 = shalt.err (!%p7704_p3)
}
  0x44   :  { %s7812_s5 = smov 384   ;;  %s7813_s23 = smov 24  }
  0x45   :  { %28 = dma.hbm_to_vmem [thread:$0]  %s8778_s0, 3072, %s7892_s30, [#allocation3], %s7812_s5, %s7812_s5, %s7813_s23  }
  0x46   :  { %s7814_s26 = smov [#allocation7]   ;;  %s7815_s29 = smov [#allocation10]  }
  0x47   :  { %s44_s28 = sshll.u32 %s7814_s26, 4  ;;  %s68_s8 = sshll.u32 %s7815_s29, 4  ;;  %s45_s28 = int_to_ptr.vmem [resolvable:$true] %s44_s28  ;;  %s7926_s8 = int_to_ptr.vmem [resolvable:$true] %s68_s8 }
  0x48   :  { %s7708_s11 = scalar_lea.hbm %s8780_s2, 3072 }
  0x49   :  { %p7709_p4 = scmp.ne.s32.totalorder %s8780_s2, %s7708_s11  ;;  %p7712_p5 = scmp.lt.u32.totalorder %s7708_s11, %s8780_s2 }
  0x4b   :  { %p7714_p6 = pnand %p7712_p5, %p7709_p4 }
  0x4d   :  { %7717 = shalt.err (!%p7714_p6)
}
  0x4e   :  { %s7718_s0 = scalar_lea.vmem %s45_s28, 3072  ;;  %p7723_p8 = scmp.lt.s32.totalorder %s45_s28, %s45_s28 }
  0x4f   :  { %p7719_p7 = scmp.ne.s32.totalorder %s45_s28, %s7718_s0  ;;  %p7724_p9 = scmp.lt.s32.totalorder %s7718_s0, %s7718_s0 }
  0x51   :  { %p7725_p10 = por %p7724_p9, %p7723_p8 }
  0x53   :  { %p7726_p11 = pnand %p7725_p10, %p7719_p7 }
  0x55   :  { %7729 = shalt.err (!%p7726_p11)
}
  0x56   :  { %50 = dma.hbm_to_vmem [thread:$0]  %s8780_s2, 3072, %s45_s28, [#allocation6], %s7812_s5, %s7812_s5, %s7813_s23  }
  0x57   :  { %s7730_s17 = scalar_lea.hbm %s8782_s4, 4608 }
  0x58   :  { %p7731_p12 = scmp.ne.s32.totalorder %s8782_s4, %s7730_s17  ;;  %p7734_p13 = scmp.lt.u32.totalorder %s7730_s17, %s8782_s4 }
  0x5a   :  { %p7736_p0 = pnand %p7734_p13, %p7731_p12 }
  0x5c   :  { %7739 = shalt.err (!%p7736_p0)
}
  0x5d   :  { %s7740_s22 = scalar_lea.vmem %s7926_s8, 4608  ;;  %p7745_p2 = scmp.lt.s32.totalorder %s7926_s8, %s7926_s8 }
  0x5e   :  { %p7741_p1 = scmp.ne.s32.totalorder %s7926_s8, %s7740_s22  ;;  %p7746_p3 = scmp.lt.s32.totalorder %s7740_s22, %s7740_s22 }
  0x60   :  { %p7747_p4 = por %p7746_p3, %p7745_p2 }
  0x62   :  { %p7748_p5 = pnand %p7747_p4, %p7741_p1 }
  0x64   :  { %7751 = shalt.err (!%p7748_p5)
}
  0x65   :  { %74 = dma.hbm_to_vmem [thread:$0]  %s8782_s4, 4608, %s7926_s8, [#allocation9], %s7812_s5, %s7812_s5, %s7813_s23  }
  0x66   :  { %s7816_s24 = smov [#allocation13]   ;;  %s7752_s29 = scalar_lea.hbm %s8784_s6, 128 }
  0x67   :  { %s91_s25 = sshll.u32 %s7816_s24, 4  ;;  %p7753_p6 = scmp.ne.s32.totalorder %s8784_s6, %s7752_s29  ;;  %s92_s25 = int_to_ptr.vmem [resolvable:$true] %s91_s25 }
  0x68   :  { %p7756_p7 = scmp.lt.u32.totalorder %s7752_s29, %s8784_s6 }
  0x6a   :  { %p7758_p8 = pnand %p7756_p7, %p7753_p6 }
  0x6c   :  { %7761 = shalt.err (!%p7758_p8)
}
  0x6d   :  { %s7762_s13 = scalar_lea.vmem %s92_s25, 128  ;;  %p7767_p10 = scmp.lt.s32.totalorder %s92_s25, %s92_s25 }
  0x6e   :  { %p7763_p9 = scmp.ne.s32.totalorder %s92_s25, %s7762_s13  ;;  %p7768_p11 = scmp.lt.s32.totalorder %s7762_s13, %s7762_s13 }
  0x70   :  { %p7769_p12 = por %p7768_p11, %p7767_p10 }
  0x72   :  { %p7770_p13 = pnand %p7769_p12, %p7763_p9 }
  0x74   :  { %7773 = shalt.err (!%p7770_p13)
}
  0x75   :  { %94 = dma.hbm_to_vmem [thread:$0]  %s8784_s6, 128, %s92_s25, [#allocation12]  }
  0x76   :  { %7796 = dma.done.wait [#allocation3], 3072  }
  0x77   :  { %7797 = vsyncadd [#allocation3], 4294964224 }
  0x78   :  { %7798 = dma.done.wait [#allocation6], 3200  }
  0x79   :  { %7799 = vsyncadd [#allocation6], 4294964096 }
  0x7a   :  { %7800 = dma.done.wait [#allocation9], 78336  }
  0x7b   :  { %7801 = vsyncadd [#allocation9], 4294888960 }
  0x7c   :  { %7802 = dma.done.wait [#allocation12], 192  }
  0x7d   :  { %7803 = vsyncadd [#allocation12], 4294967104  ;;  %v118_v0 = vlaneseq  ;;  %v117_v6 = vld [vmem:[#allocation5] sm:$0xff]  ;;  %v6660_v11 = vld [vmem:[#allocation8 + $0x4] ss:$48 sps:$4 sm:$0xff]   ;;  %vm1151_vm0 = vcmask 1041409  }
  0x7e   :  { %v6662_v12 = vld [vmem:[#allocation8 + $0x604] ss:$48 sps:$4 sm:$0xff]   ;;  %v6664_v13 = vld [vmem:[#allocation8] ss:$48 sps:$4 sm:$0xff]   ;;  %4764 = vmatprep.subr.bf16.mxu0 %v6660_v11  ;;  %v7981_v53 = vld [vmem:[#allocation2 + $0x30] sm:$0xff]  ;;  %vm1153_vm1 = vcmask 1042434  }
  0x7f   :  { %v119_v1 = vshrl.u32 %v118_v0, 7  ;;  %v6665_v14 = vld [vmem:[#allocation8 + $0x600] ss:$48 sps:$4 sm:$0xff]   ;;  %v6666_v17 = vld [vmem:[#allocation8 + $0x64] ss:$48 sps:$4 sm:$0xff]   ;;  %4805 = vmatprep.subr.bf16.mxu1 %v6662_v12  ;;  %4765 = vmatpush1.bf16.msra.mxu0 %v6664_v13  ;;  %v7985_v55 = vld [vmem:[#allocation2 + $0x40] sm:$0xff] }
  0x80   :  { %v6668_v18 = vld [vmem:[#allocation8 + $0x664] ss:$48 sps:$4 sm:$0xff]   ;;  %4806 = vmatpush1.bf16.msra.mxu1 %v6665_v14  ;;  %v6670_v19 = vld [vmem:[#allocation8 + $0x60] ss:$48 sps:$4 sm:$0xff]   ;;  %4766 = vmatprep.subr.bf16.mxu0 %v6666_v17  ;;  %v7987_v56 = vld [vmem:[#allocation2] sm:$0xff]  ;;  %vm1155_vm2 = vcmask 1043459  }
  0x81   :  { %v134_v2 = vsub.s32 2, %v119_v1  ;;  %v7975_v3 = vsub.s32 0, %v119_v1  ;;  %v141_v4 = vsub.s32 3, %v119_v1  ;;  %v7977_v5 = vsub.s32 1, %v119_v1  ;;  %v6671_v20 = vld [vmem:[#allocation8 + $0x660] ss:$48 sps:$4 sm:$0xff]   ;;  %4807 = vmatprep.subr.bf16.mxu1 %v6668_v18 }
  0x82   :  { %v155_v9 = vsub.s32 5, %v119_v1  ;;  %v148_v10 = vsub.s32 4, %v119_v1  ;;  %v169_v21 = vsub.s32 7, %v119_v1  ;;  %v162_v22 = vsub.s32 6, %v119_v1  ;;  %v6672_v23 = vld [vmem:[#allocation8 + $0xc4] ss:$48 sps:$4 sm:$0xff]  }
  0x83   :  { %8812 = vst [vmem:[#allocation20_spill] sm:$0xff] %v7975_v3  ;;  %8813 = vst [vmem:[#allocation21_spill] sm:$0xff] %v7977_v5  ;;  %v135_v7 = vrot.slane %v117_v6, %v134_v2  ;;  %v121_v8 = vrot.slane %v117_v6, %v7975_v3  ;;  %v142_v15 = vrot.slane %v117_v6, %v141_v4  ;;  %v6674_v26 = vld [vmem:[#allocation8 + $0x6c4] ss:$48 sps:$4 sm:$0xff]   ;;  %v6676_v27 = vld [vmem:[#allocation8 + $0xc0] ss:$48 sps:$4 sm:$0xff]   ;;  %4767 = vmatpush1.bf16.msra.mxu0 %v6670_v19 }
  0x84   :  { %v128_v16 = vrot.slane %v117_v6, %v7977_v5  ;;  %v156_v24 = vrot.slane %v117_v6, %v155_v9  ;;  %v149_v25 = vrot.slane %v117_v6, %v148_v10  ;;  %4808 = vmatpush1.bf16.msra.mxu1 %v6671_v20  ;;  %v6677_v28 = vld [vmem:[#allocation8 + $0x6c0] ss:$48 sps:$4 sm:$0xff]   ;;  %4768 = vmatprep.subr.bf16.mxu0 %v6672_v23  ;;  %v6678_v29 = vld [vmem:[#allocation8 + $0x124] ss:$48 sps:$4 sm:$0xff]   ;;  %v7991_v58 = vld [vmem:[#allocation2 + $0x10] sm:$0xff]  ;;  %vm1157_vm3 = vcmask 1044484  }
  0x85   :  { %137 = vbcast.lane.b32.xlu1 %v135_v7, 256  ;;  %123 = vbcast.lane.b32.xlu0 %v121_v8, 256  ;;  %v6680_v30 = vld [vmem:[#allocation8 + $0x724] ss:$48 sps:$4 sm:$0xff]   ;;  %v170_v31 = vrot.slane %v117_v6, %v169_v21  ;;  %v163_v32 = vrot.slane %v117_v6, %v162_v22  ;;  %v6682_v33 = vld [vmem:[#allocation8 + $0x120] ss:$48 sps:$4 sm:$0xff]  }
  0x86   :  { %4809 = vmatprep.subr.bf16.mxu1 %v6674_v26  ;;  %v6683_v34 = vld [vmem:[#allocation8 + $0x720] ss:$48 sps:$4 sm:$0xff]   ;;  %v6684_v35 = vld [vmem:[#allocation8 + $0x184] ss:$48 sps:$4 sm:$0xff]   ;;  %v7995_v60 = vld [vmem:[#allocation2 + $0x50] sm:$0xff]  ;;  %vm1161_vm4 = vcmask 1046534  }
  0x87   :  { %4769 = vmatpush1.bf16.msra.mxu0 %v6676_v27  ;;  %v6686_v36 = vld [vmem:[#allocation8 + $0x784] ss:$48 sps:$4 sm:$0xff]   ;;  %v6688_v37 = vld [vmem:[#allocation8 + $0x180] ss:$48 sps:$4 sm:$0xff]   ;;  %v8003_v4 = vld [vmem:[#allocation2 + $0x20] sm:$0xff]  ;;  %vm1159_vm5 = vcmask 1045509  }
  0x88   :  { %4810 = vmatpush1.bf16.msra.mxu1 %v6677_v28  ;;  %4770 = vmatprep.subr.bf16.mxu0 %v6678_v29  ;;  %v6689_v38 = vld [vmem:[#allocation8 + $0x780] ss:$48 sps:$4 sm:$0xff]   ;;  %v6690_v39 = vld [vmem:[#allocation8 + $0x1e4] ss:$48 sps:$4 sm:$0xff]   ;;  %v8071_v27 = vld [vmem:[#allocation2 + $0xa0] sm:$0xff]  ;;  %vm1163_vm6 = vcmask 1047559  }
  0x89   :  { %144 = vbcast.lane.b32.xlu1 %v142_v15, 256  ;;  %130 = vbcast.lane.b32.xlu0 %v128_v16, 256  ;;  %v6692_v40 = vld [vmem:[#allocation8 + $0x7e4] ss:$48 sps:$4 sm:$0xff]   ;;  %v6694_v41 = vld [vmem:[#allocation8 + $0x1e0] ss:$48 sps:$4 sm:$0xff]  }
  0x8a   :  { %4811 = vmatprep.subr.bf16.mxu1 %v6680_v30  ;;  %v6695_v42 = vld [vmem:[#allocation8 + $0x7e0] ss:$48 sps:$4 sm:$0xff]   ;;  %v6696_v43 = vld [vmem:[#allocation8 + $0x244] ss:$48 sps:$4 sm:$0xff]   ;;  %v8017_v16 = vld [vmem:[#allocation2 + $0x80] sm:$0xff]  ;;  %8819 = vst [vmem:[#allocation27_spill] sm:$0xff] %v8071_v27 }
  0x8b   :  { %4771 = vmatpush1.bf16.msra.mxu0 %v6682_v33  ;;  %v6698_v44 = vld [vmem:[#allocation8 + $0x844] ss:$48 sps:$4 sm:$0xff]   ;;  %v6700_v45 = vld [vmem:[#allocation8 + $0x240] ss:$48 sps:$4 sm:$0xff]   ;;  %v8079_v12 = vld [vmem:[#allocation7 + $0x8] sm:$0xff]  ;;  %vm5521_vm7 = vcmask 187392  }
  0x8c   :  { %4812 = vmatpush1.bf16.msra.mxu1 %v6683_v34  ;;  %4772 = vmatprep.subr.bf16.mxu0 %v6684_v35  ;;  %v6701_v46 = vld [vmem:[#allocation8 + $0x840] ss:$48 sps:$4 sm:$0xff]   ;;  %v6702_v47 = vld [vmem:[#allocation8 + $0x2a4] ss:$48 sps:$4 sm:$0xff]   ;;  %s7817_s6 = smov 32   ;;  %s7819_s23 = smov 64  }
  0x8d   :  { %158 = vbcast.lane.b32.xlu1 %v156_v24, 256  ;;  %151 = vbcast.lane.b32.xlu0 %v149_v25, 256  ;;  %v6704_v48 = vld [vmem:[#allocation8 + $0x8a4] ss:$48 sps:$4 sm:$0xff]   ;;  %v6706_v49 = vld [vmem:[#allocation8 + $0x2a0] ss:$48 sps:$4 sm:$0xff]  }
  0x8e   :  { %4813 = vmatprep.subr.bf16.mxu1 %v6686_v36  ;;  %v6707_v50 = vld [vmem:[#allocation8 + $0x8a0] ss:$48 sps:$4 sm:$0xff]   ;;  %v6708_v51 = vld [vmem:[#allocation8 + $0x304] ss:$48 sps:$4 sm:$0xff]   ;;  %v8025_v24 = vld [vmem:[#allocation2 + $0x60] sm:$0xff]  ;;  %vm5564_vm8 = vcmask 261120  }
  0x8f   :  { %4773 = vmatpush1.bf16.msra.mxu0 %v6688_v37  ;;  %v6710_v52 = vld [vmem:[#allocation8 + $0x904] ss:$48 sps:$4 sm:$0xff]   ;;  %v6712_v62 = vld [vmem:[#allocation8 + $0x300] ss:$48 sps:$4 sm:$0xff]   ;;  %v8037_v36 = vld [vmem:[#allocation2 + $0x70] sm:$0xff]  ;;  %vm5566_vm9 = vcmask 449536  }
  0x90   :  { %4814 = vmatpush1.bf16.msra.mxu1 %v6689_v38  ;;  %4774 = vmatprep.subr.bf16.mxu0 %v6690_v39  ;;  %v7983_v54 = vld [vmem:[#allocation2 + $0x38] sm:$0xff]  ;;  %v7989_v57 = vld [vmem:[#allocation2 + $0x8] sm:$0xff]  ;;  %v709_v39 = vld [vmem:[#allocation7 + $0x78] sm:$0xff]  ;;  %vm5568_vm10 = vcmask 523264   ;;  %vm5570_vm11 = vcmask 711680   ;;  %vm5789_vm12 = vcmask 785408  }
  0x91   :  { %172 = vbcast.lane.b32.xlu1 %v170_v31, 256  ;;  %165 = vbcast.lane.b32.xlu0 %v163_v32, 256  ;;  %v7993_v59 = vld [vmem:[#allocation2 + $0x48] sm:$0xff]  ;;  %v7997_v61 = vld [vmem:[#allocation2 + $0x58] sm:$0xff]  ;;  %s7820_s8 = smov [#allocation14]  }
  0x92   :  { %4815 = vmatprep.subr.bf16.mxu1 %v6692_v40  ;;  %v6713_v63 = vld [vmem:[#allocation8 + $0x900] ss:$48 sps:$4 sm:$0xff]   ;;  %v6714_v18 = vld [vmem:[#allocation8 + $0x364] ss:$48 sps:$4 sm:$0xff]   ;;  %s5983_s14 = sshll.u32 %s7820_s8, 4  ;;  %s5984_s14 = int_to_ptr.vmem [resolvable:$true] %s5983_s14 }
  0x93   :  { %4775 = vmatpush1.bf16.msra.mxu0 %v6694_v41  ;;  %v8001_v2 = vld [vmem:[#allocation2 + $0x18] sm:$0xff]  ;;  %v8009_v10 = vld [vmem:[#allocation2 + $0x28] sm:$0xff]  ;;  %s7774_s3 = scalar_lea.vmem %s5984_s14, 1152  ;;  %p7779_p1 = scmp.lt.s32.totalorder %s5984_s14, %s5984_s14 }
  0x94   :  { %4816 = vmatpush1.bf16.msra.mxu1 %v6695_v42  ;;  %4776 = vmatprep.subr.bf16.mxu0 %v6696_v43  ;;  %v8011_v11 = vld [vmem:[#allocation2 + $0x78] sm:$0xff]  ;;  %v8019_v17 = vld [vmem:[#allocation2 + $0x88] sm:$0xff]  ;;  %p7775_p0 = scmp.ne.s32.totalorder %s5984_s14, %s7774_s3  ;;  %p7780_p2 = scmp.lt.s32.totalorder %s7774_s3, %s7774_s3 }
  0x95   :  { %4817 = vmatprep.subr.bf16.mxu1 %v6698_v44  ;;  %v6716_v19 = vld [vmem:[#allocation8 + $0x964] ss:$48 sps:$4 sm:$0xff]   ;;  %v6718_v25 = vld [vmem:[#allocation8 + $0x360] ss:$48 sps:$4 sm:$0xff]  }
  0x96   :  { %v6719_v26 = vld [vmem:[#allocation8 + $0x960] ss:$48 sps:$4 sm:$0xff]   ;;  %v6720_v41 = vld [vmem:[#allocation8 + $0x3c4] ss:$48 sps:$4 sm:$0xff]   ;;  %p7781_p3 = por %p7780_p2, %p7779_p1 }
  0x97   :  { %4777 = vmatpush1.bf16.msra.mxu0 %v6700_v45  ;;  %v8031_v31 = vld [vmem:[#allocation2 + $0x68] sm:$0xff]  ;;  %v712_v33 = vld [vmem:[#allocation7 + $0x90] sm:$0xff] }
  0x98   :  { %4818 = vmatpush1.bf16.msra.mxu1 %v6701_v46  ;;  %4778 = vmatprep.subr.bf16.mxu0 %v6702_v47  ;;  %v6722_v42 = vld [vmem:[#allocation8 + $0x9c4] ss:$48 sps:$4 sm:$0xff]   ;;  %v6724_v47 = vld [vmem:[#allocation8 + $0x3c0] ss:$48 sps:$4 sm:$0xff]   ;;  %v8058_v46 = vld [vmem:[#allocation2 + $0xb0] sm:$0xff]  ;;  %p7782_p4 = pnand %p7781_p3, %p7775_p0 }
  0x99   :  { %4819 = vmatprep.subr.bf16.mxu1 %v6704_v48  ;;  %v8043_v43 = vld [vmem:[#allocation7] sm:$0xff]  ;;  %v8069_v28 = vld [vmem:[#allocation2 + $0x98] sm:$0xff] }
  0x9a   :  { %8814 = vst [vmem:[#allocation22_spill] sm:$0xff] %v8043_v43  ;;  %v6725_v48 = vld [vmem:[#allocation8 + $0x9c0] ss:$48 sps:$4 sm:$0xff]   ;;  %v6728_v40 = vld [vmem:[#allocation8 + $0xa24] ss:$48 sps:$4 sm:$0xff]   ;;  %8818 = vst [vmem:[#allocation26_spill] sm:$0xff] %v8069_v28 }
  0x9b   :  { %4779 = vmatpush1.bf16.msra.mxu0 %v6706_v49  ;;  %v8048_v49 = vld [vmem:[#allocation7 + $0x18] sm:$0xff]  ;;  %v706_v45 = vld [vmem:[#allocation7 + $0x60] sm:$0xff] }
  0x9c   :  { %4820 = vmatpush1.bf16.msra.mxu1 %v6707_v50  ;;  %4780 = vmatprep.subr.bf16.mxu0 %v6708_v51  ;;  %8815 = vst [vmem:[#allocation23_spill] sm:$0xff] %v8048_v49  ;;  %v719_v50 = vunpack.c.h.bf16 %v8043_v43  ;;  %v743_v38 = vunpack.c.h.bf16 %v706_v45  ;;  %v6730_v35 = vld [vmem:[#allocation8 + $0x420] ss:$48 sps:$4 sm:$0xff]   ;;  %v6738_v21 = vld [vmem:[#allocation8 + $0x4e4] ss:$48 sps:$4 sm:$0xff]  }
  0x9d   :  { %4821 = vmatprep.subr.bf16.mxu1 %v6710_v52  ;;  %v6731_v34 = vld [vmem:[#allocation8 + $0xa20] ss:$48 sps:$4 sm:$0xff]   ;;  %v6740_v14 = vld [vmem:[#allocation8 + $0xae4] ss:$48 sps:$4 sm:$0xff]  }
  0x9e   :  { %v772_v52 = vrot.slane %v719_v50, 4  ;;  %v916_v29 = vrot.slane %v743_v38, 4  ;;  %v6736_v23 = vld [vmem:[#allocation8 + $0x480] ss:$48 sps:$4 sm:$0xff]  }
  0x9f   :  { %4781 = vmatpush1.bf16.msra.mxu0 %v6712_v62  ;;  %v6737_v22 = vld [vmem:[#allocation8 + $0xa80] ss:$48 sps:$4 sm:$0xff]  }
  0xa0   :  { %4822 = vmatpush1.bf16.msra.mxu1 %v6713_v63  ;;  %4782 = vmatprep.subr.bf16.mxu0 %v6714_v18  ;;  %v700_v63 = vld [vmem:[#allocation7 + $0x30] sm:$0xff]  ;;  %v703_v18 = vld [vmem:[#allocation7 + $0x48] sm:$0xff]  ;;  %v917_v13 = vadd.f32 %v916_v29, %v743_v38  ;;  %v8081_v9 = vld [vmem:[#allocation7 + $0x20] sm:$0xff] }
  0xa1   :  { %4823 = vmatprep.subr.bf16.mxu1 %v6716_v19  ;;  %v725_v19 = vunpack.c.h.bf16 %v8048_v49  ;;  %v731_v51 = vunpack.c.h.bf16 %v700_v63  ;;  %v737_v44 = vunpack.c.h.bf16 %v703_v18  ;;  %v8063_v63 = vld [vmem:[#allocation2 + $0xb8] sm:$0xff]  ;;  %v8065_v18 = vld [vmem:[#allocation2 + $0x90] sm:$0xff]  ;;  %v8098_v8 = vld [vmem:[#allocation7 + $0x80] sm:$0xff] }
  0xa2   :  { %8816 = vst [vmem:[#allocation24_spill] sm:$0xff] %v8063_v63  ;;  %8817 = vst [vmem:[#allocation25_spill] sm:$0xff] %v8065_v18  ;;  %v6750_v38 = vld [vmem:[#allocation8 + $0x5a4] ss:$48 sps:$4 sm:$0xff]   ;;  %v6754_v3 = vld [vmem:[#allocation8 + $0x5a0] ss:$48 sps:$4 sm:$0xff]  }
  0xa3   :  { %4783 = vmatpush1.bf16.msra.mxu0 %v6718_v25  ;;  %v808_v37 = vrot.slane %v725_v19, 4  ;;  %v844_v32 = vrot.slane %v731_v51, 4  ;;  %v880_v30 = vrot.slane %v737_v44, 4  ;;  %8821 = vst [vmem:[#allocation29_spill] sm:$0xff] %v8098_v8  ;;  %v6755_v27 = vld [vmem:[#allocation8 + $0xba0] ss:$48 sps:$4 sm:$0xff]  }
  0xa4   :  { %4824 = vmatpush1.bf16.msra.mxu1 %v6719_v26  ;;  %4784 = vmatprep.subr.bf16.mxu0 %v6720_v41  ;;  %v8056_v26 = vld [vmem:[#allocation2 + $0xa8] sm:$0xff]  ;;  %v755_v41 = vunpack.c.h.bf16 %v712_v33 }
  0xa5   :  { %4825 = vmatprep.subr.bf16.mxu1 %v6722_v42  ;;  %v6726_v42 = vld [vmem:[#allocation8 + $0x424] ss:$48 sps:$4 sm:$0xff]   ;;  %v809_v62 = vadd.f32 %v808_v37, %v725_v19 }
  0xa6   :  { %v6732_v37 = vld [vmem:[#allocation8 + $0x484] ss:$48 sps:$4 sm:$0xff]   ;;  %v988_v45 = vrot.slane %v755_v41, 4 }
  0xa7   :  { %4785 = vmatpush1.bf16.msra.mxu0 %v6724_v47  ;;  %v749_v47 = vunpack.c.h.bf16 %v709_v39  ;;  %v8073_v39 = vld [vmem:[#allocation7 + $0xa8] sm:$0xff]  ;;  %v6734_v19 = vld [vmem:[#allocation8 + $0xa84] ss:$48 sps:$4 sm:$0xff]  }
  0xa8   :  { %4826 = vmatpush1.bf16.msra.mxu1 %v6725_v48  ;;  %v773_v48 = vadd.f32 %v772_v52, %v719_v50  ;;  %4786 = vmatprep.subr.bf16.mxu0 %v6726_v42  ;;  %v810_v42 = vrot.slane %v809_v62, 2 }
  0xa9   :  { %4827 = vmatprep.subr.bf16.mxu1 %v6728_v40  ;;  %v952_v52 = vrot.slane %v749_v47, 4 }
  0xaa   :  { %v774_v50 = vrot.slane %v773_v48, 2  ;;  %v811_v40 = vadd.f32 %v810_v42, %v809_v62  ;;  %v6752_v62 = vld [vmem:[#allocation8 + $0xba4] ss:$48 sps:$4 sm:$0xff]   ;;  %v8100_v42 = vld [vmem:[#allocation7 + $0x98] sm:$0xff] }
  0xab   :  { %4787 = vmatpush1.bf16.msra.mxu0 %v6730_v35  ;;  %v845_v35 = vadd.f32 %v844_v32, %v731_v51  ;;  %v953_v33 = vadd.f32 %v952_v52, %v749_v47  ;;  %v6742_v32 = vld [vmem:[#allocation8 + $0x4e0] ss:$48 sps:$4 sm:$0xff]   ;;  %v989_v51 = vadd.f32 %v988_v45, %v755_v41  ;;  %v8094_v45 = vld [vmem:[#allocation7 + $0x68] sm:$0xff]  ;;  %8822 = vst [vmem:[#allocation30_spill] sm:$0xff] %v8100_v42 }
  0xac   :  { %4828 = vmatpush1.bf16.msra.mxu1 %v6731_v34  ;;  %v775_v20 = vadd.f32 %v774_v50, %v773_v48  ;;  %v881_v34 = vadd.f32 %v880_v30, %v737_v44  ;;  %4788 = vmatprep.subr.bf16.mxu0 %v6732_v37  ;;  %v6743_v30 = vld [vmem:[#allocation8 + $0xae0] ss:$48 sps:$4 sm:$0xff]   ;;  %v761_v44 = vunpack.c.h.bf16 %v8073_v39  ;;  %v8086_v48 = vld [vmem:[#allocation7 + $0x38] sm:$0xff]  ;;  %v6744_v50 = vld [vmem:[#allocation8 + $0x544] ss:$48 sps:$4 sm:$0xff]   ;;  %v812_v41 = vrot.slane %v811_v40, 1 }
  0xad   :  { %4829 = vmatprep.subr.bf16.mxu1 %v6734_v19  ;;  %v6748_v52 = vld [vmem:[#allocation8 + $0x540] ss:$48 sps:$4 sm:$0xff]   ;;  %8820 = vst [vmem:[#allocation28_spill] sm:$0xff] %v8094_v45  ;;  %v846_v29 = vrot.slane %v845_v35, 2  ;;  %v990_v7 = vrot.slane %v989_v51, 2  ;;  %v8800_v5 = vunpack.c.h.bf16 %v8086_v48 }
  0xae   :  { %v6749_v37 = vld [vmem:[#allocation8 + $0xb40] ss:$48 sps:$4 sm:$0xff]   ;;  %v776_v39 = vrot.slane %v775_v20, 1  ;;  %v882_v47 = vrot.slane %v881_v34, 2  ;;  %v813_v15 = vadd.f32 %v812_v41, %v811_v40  ;;  %v1024_v6 = vrot.slane %v761_v44, 4 }
  0xaf   :  { %4789 = vmatpush1.bf16.msra.mxu0 %v6736_v23  ;;  %v6746_v23 = vld [vmem:[#allocation8 + $0xb44] ss:$48 sps:$4 sm:$0xff]   ;;  %v847_v1 = vadd.f32 %v846_v29, %v845_v35  ;;  %v991_v18 = vadd.f32 %v990_v7, %v989_v51  ;;  %v8798_v35 = vunpack.c.h.bf16 %v8094_v45 }
  0xb0   :  { %4830 = vmatpush1.bf16.msra.mxu1 %v6737_v22  ;;  %4790 = vmatprep.subr.bf16.mxu0 %v6738_v21  ;;  %v8092_v22 = vld [vmem:[#allocation7 + $0x50] sm:$0xff]  ;;  %v918_v21 = vrot.slane %v917_v13, 2  ;;  %v777_v25 = vadd.f32 %v776_v39, %v775_v20  ;;  %v883_v0 = vadd.f32 %v882_v47, %v881_v34  ;;  %v1025_v63 = vadd.f32 %v1024_v6, %v761_v44 }
  0xb1   :  { %4831 = vmatprep.subr.bf16.mxu1 %v6740_v14  ;;  %v954_v14 = vrot.slane %v953_v33, 2  ;;  %v848_v20 = vrot.slane %v847_v1, 1  ;;  %v8104_v39 = vld [vmem:[#allocation7 + $0xb0] sm:$0xff]  ;;  %v992_v34 = vrot.slane %v991_v18, 1  ;;  %v1062_v44 = vmul.f32 0.125, %v813_v15 }
  0xb2   :  { %v919_v19 = vadd.f32 %v918_v21, %v917_v13  ;;  %v884_v40 = vrot.slane %v883_v0, 1  ;;  %8823 = vst [vmem:[#allocation31_spill] sm:$0xff] %v8104_v39  ;;  %v1026_v29 = vrot.slane %v1025_v63, 2  ;;  %v8824_v15 = vunpack.c.h.bf16 %v8079_v12 }
  0xb3   :  { %4791 = vmatpush1.bf16.msra.mxu0 %v6742_v32  ;;  %v955_v28 = vadd.f32 %v954_v14, %v953_v33  ;;  %v8799_v32 = vunpack.c.h.bf16 %v8092_v22  ;;  %v849_v7 = vadd.f32 %v848_v20, %v847_v1  ;;  %v1056_v33 = vmul.f32 0.125, %v777_v25 }
  0xb4   :  { %4832 = vmatpush1.bf16.msra.mxu1 %v6743_v30  ;;  %4792 = vmatprep.subr.bf16.mxu0 %v6744_v50  ;;  %v920_v30 = vrot.slane %v919_v19, 1  ;;  %v885_v6 = vadd.f32 %v884_v40, %v883_v0  ;;  %v1027_v50 = vadd.f32 %v1026_v29, %v1025_v63  ;;  %v784_v25 = vrot.slane %v8824_v15, 4  ;;  %v6761_v0 = vld [vmem:[#allocation8 + $0xc] ss:$48 sps:$4 sm:$0xff]  }
  0xb5   :  { %4833 = vmatprep.subr.bf16.mxu1 %v6746_v23  ;;  %v956_v13 = vrot.slane %v955_v28, 1  ;;  %v1261_v1 = vsel %vm1151_vm0, %v1062_v44, %v1056_v33  ;;  %v8825_v63 = vunpack.c.h.bf16 %v8081_v9  ;;  %v856_v20 = vrot.slane %v8800_v5, 4 }
  0xb6   :  { %v921_v51 = vadd.f32 %v920_v30, %v919_v19  ;;  %v1028_v47 = vrot.slane %v1027_v50, 1  ;;  %v8829_v44 = vunpack.c.h.bf16 %v7981_v53  ;;  %v8831_v12 = vunpack.c.h.bf16 %v7983_v54 }
  0xb7   :  { %4793 = vmatpush1.bf16.msra.mxu0 %v6748_v52  ;;  %v957_v21 = vadd.f32 %v956_v13, %v955_v28  ;;  %v993_v52 = vadd.f32 %v992_v34, %v991_v18  ;;  %v820_v28 = vrot.slane %v8825_v63, 4  ;;  %v8826_v13 = vmov %v8824_v15 }
  0xb8   :  { %4834 = vmatpush1.bf16.msra.mxu1 %v6749_v37  ;;  %4794 = vmatprep.subr.bf16.mxu0 %v6750_v38  ;;  %v1068_v37 = vmul.f32 0.125, %v849_v7  ;;  %v1074_v38 = vmul.f32 0.125, %v885_v6  ;;  %v1080_v18 = vmul.f32 0.125, %v921_v51  ;;  %v8127_v34 = vadd.f32 %v784_v25, %v8826_v13 }
  0xb9   :  { %4835 = vmatprep.subr.bf16.mxu1 %v6752_v62  ;;  %v8118_v62 = vmul.f32 0.125, %v957_v21  ;;  %v8120_v19 = vmul.f32 0.125, %v993_v52  ;;  %v8827_v29 = vmov %v8825_v63  ;;  %v8828_v6 = vunpack.c.l.bf16 %v7981_v53 }
  0xba   :  { %v8131_v7 = vadd.f32 %v820_v28, %v8827_v29  ;;  %v8149_v25 = vrot.slane %v8798_v35, 4 }
  0xbb   :  { %4795 = vmatpush1.bf16.msra.mxu0 %v6754_v3  ;;  %v1262_v3 = vsel %vm1153_vm1, %v1068_v37, %v1261_v1  ;;  %v8832_v37 = vunpack.c.l.bf16 %v7985_v55 }
  0xbc   :  { %4836 = vmatpush1.bf16.msra.mxu1 %v6755_v27  ;;  %v1029_v27 = vadd.f32 %v1028_v47, %v1027_v50  ;;  %v1263_v30 = vsel %vm1155_vm2, %v1074_v38, %v1262_v3  ;;  %v892_v47 = vrot.slane %v8799_v32, 4  ;;  %v8830_v50 = vunpack.c.l.bf16 %v7983_v54  ;;  %8834 = vst [vmem:[#allocation32_spill] sm:$0xff] %v8149_v25 }
  0xbd   :  { %v8833_v38 = vunpack.c.h.bf16 %v7985_v55  ;;  %v8154_v35 = vsel %vm1157_vm3, %v1080_v18, %v1263_v30  ;;  %4887 = vmatprep.subr.bf16.mxu1 %v6761_v0  ;;  %v8836_v30 = vunpack.c.h.bf16 %v7987_v56 }
  0xbe   :  { %v8151_v54 = vmul.f32 0.125, %v1029_v27 }
  0xf7   :  { %v138_v40 = vpop.permute.xlu1 %137 }
  0xf8   :  { %v258_v33 = vmul.f32 %v8828_v6, %v138_v40  ;;  %v259_v51 = vmul.f32 %v8829_v44, %v138_v40  ;;  %v260_v21 = vmul.f32 %v8830_v50, %v138_v40  ;;  %v261_v52 = vmul.f32 %v8831_v12, %v138_v40  ;;  %v6758_v44 = vld [vmem:[#allocation8 + $0xc04] ss:$48 sps:$4 sm:$0xff]  }
  0xf9   :  { %v262_v9 = vmul.f32 %v8832_v37, %v138_v40  ;;  %v263_v1 = vmul.f32 %v8833_v38, %v138_v40  ;;  %v594_v15 = vrot.slane %v138_v40, 4  ;;  %v124_v38 = vpop.permute.xlu0 %123  ;;  %4846 = vmatprep.subr.bf16.mxu0 %v6758_v44  ;;  %v8838_v44 = vunpack.c.h.bf16 %v7989_v57 }
  0xfa   :  { %v366_v63 = vrot.slane %v258_v33, 4  ;;  %v372_v53 = vrot.slane %v259_v51, 4  ;;  %v378_v28 = vrot.slane %v260_v21, 4  ;;  %v384_v3 = vrot.slane %v261_v52, 4 }
  0xfb   :  { %v390_v13 = vrot.slane %v262_v9, 4  ;;  %v396_v29 = vrot.slane %v263_v1, 4  ;;  %v595_v6 = vadd.f32 %v594_v15, %v138_v40 }
  0xfc   :  { %v367_v50 = vadd.f32 %v366_v63, %v258_v33  ;;  %v373_v12 = vadd.f32 %v372_v53, %v259_v51  ;;  %v379_v37 = vadd.f32 %v378_v28, %v260_v21  ;;  %v385_v55 = vadd.f32 %v384_v3, %v261_v52 }
  0xfd   :  { %v391_v14 = vadd.f32 %v390_v13, %v262_v9  ;;  %v397_v41 = vadd.f32 %v396_v29, %v263_v1  ;;  %v596_v23 = vrot.slane %v595_v6, 2  ;;  %v8835_v51 = vunpack.c.l.bf16 %v7987_v56 }
  0xfe   :  { %v368_v32 = vrot.slane %v367_v50, 2  ;;  %v374_v5 = vrot.slane %v373_v12, 2  ;;  %v380_v49 = vrot.slane %v379_v37, 2  ;;  %v386_v40 = vrot.slane %v385_v55, 2 }
  0xff   :  { %v392_v27 = vrot.slane %v391_v14, 2  ;;  %v398_v15 = vrot.slane %v397_v41, 2  ;;  %v597_v33 = vadd.f32 %v596_v23, %v595_v6  ;;  %v246_v21 = vmul.f32 %v8835_v51, %v124_v38 }
 0x100   :  { %v369_v52 = vadd.f32 %v368_v32, %v367_v50  ;;  %v375_v63 = vadd.f32 %v374_v5, %v373_v12  ;;  %v381_v9 = vadd.f32 %v380_v49, %v379_v37  ;;  %v387_v1 = vadd.f32 %v386_v40, %v385_v55 }
 0x101   :  { %v393_v53 = vadd.f32 %v392_v27, %v391_v14  ;;  %v399_v28 = vadd.f32 %v398_v15, %v397_v41  ;;  %v598_v18 = vrot.slane %v597_v33, 1  ;;  %v247_v3 = vmul.f32 %v8836_v30, %v124_v38 }
 0x102   :  { %v370_v13 = vrot.slane %v369_v52, 1  ;;  %v8837_v29 = vunpack.c.l.bf16 %v7989_v57  ;;  %v249_v23 = vmul.f32 %v8838_v44, %v124_v38  ;;  %v8839_v6 = vunpack.c.l.bf16 %v7991_v58 }
 0x103   :  { %v376_v32 = vrot.slane %v375_v63, 1  ;;  %v382_v5 = vrot.slane %v381_v9, 1  ;;  %v599_v49 = vadd.f32 %v598_v18, %v597_v33  ;;  %v8840_v14 = vunpack.c.h.bf16 %v7991_v58 }
 0x104   :  { %v248_v0 = vmul.f32 %v8837_v29, %v124_v38  ;;  %v250_v51 = vmul.f32 %v8839_v6, %v124_v38  ;;  %v388_v50 = vrot.slane %v387_v1, 1  ;;  %v394_v12 = vrot.slane %v393_v53, 1 }
 0x105   :  { %v251_v41 = vmul.f32 %v8840_v14, %v124_v38  ;;  %v400_v56 = vrot.slane %v399_v28, 1  ;;  %v8841_v37 = vunpack.c.h.bf16 %v8086_v48  ;;  %v8172_v40 = vadd.f32 %v370_v13, %v369_v52 }
 0x106   :  { %v632_v57 = vmax.f32 %v599_v49, 1e-09  ;;  %v294_v27 = vrot.slane %v246_v21, 4  ;;  %v8842_v15 = vunpack.c.h.bf16 %v8092_v22  ;;  %v300_v29 = vrot.slane %v247_v3, 4 }
 0x107   :  { %v8170_v55 = vadd.f32 %v856_v20, %v8841_v37  ;;  %v306_v33 = vrot.slane %v248_v0, 4  ;;  %v312_v18 = vrot.slane %v249_v23, 4  ;;  %v318_v58 = vrot.slane %v250_v51, 4 }
 0x108   :  { %v8176_v30 = vadd.f32 %v892_v47, %v8842_v15  ;;  %7578 = vrcp.f32 %v632_v57  ;;  %v295_v44 = vadd.f32 %v294_v27, %v246_v21  ;;  %v324_v6 = vrot.slane %v251_v41, 4 }
 0x109   :  { %v582_v14 = vrot.slane %v124_v38, 4  ;;  %v301_v43 = vadd.f32 %v300_v29, %v247_v3  ;;  %v307_v48 = vadd.f32 %v306_v33, %v248_v0  ;;  %v313_v20 = vadd.f32 %v312_v18, %v249_v23  ;;  %v145_v23 = vpop.permute.xlu1 %144 }
 0x10a   :  { %v319_v37 = vadd.f32 %v318_v58, %v250_v51  ;;  %v8178_v52 = vadd.f32 %v376_v32, %v375_v63  ;;  %v296_v13 = vrot.slane %v295_v44, 2  ;;  %v325_v49 = vadd.f32 %v324_v6, %v251_v41 }
 0x10b   :  { %v583_v39 = vadd.f32 %v582_v14, %v124_v38  ;;  %v302_v22 = vrot.slane %v301_v43, 2  ;;  %v308_v47 = vrot.slane %v307_v48, 2  ;;  %v314_v15 = vrot.slane %v313_v20, 2 }
 0x10c   :  { %v320_v42 = vrot.slane %v319_v37, 2  ;;  %v8180_v8 = vadd.f32 %v382_v5, %v381_v9  ;;  %v297_v25 = vadd.f32 %v296_v13, %v295_v44  ;;  %v326_v57 = vrot.slane %v325_v49, 2 }
 0x10d   :  { %v584_v21 = vrot.slane %v583_v39, 2  ;;  %v303_v27 = vadd.f32 %v302_v22, %v301_v43  ;;  %v309_v45 = vadd.f32 %v308_v47, %v307_v48  ;;  %v315_v3 = vadd.f32 %v314_v15, %v313_v20 }
 0x10e   :  { %v321_v0 = vadd.f32 %v320_v42, %v319_v37  ;;  %v8182_v51 = vadd.f32 %v388_v50, %v387_v1  ;;  %v298_v63 = vrot.slane %v297_v25, 1  ;;  %v327_v32 = vadd.f32 %v326_v57, %v325_v49 }
 0x10f   :  { %v585_v41 = vadd.f32 %v584_v21, %v583_v39  ;;  %v304_v38 = vrot.slane %v303_v27, 1  ;;  %v310_v29 = vrot.slane %v309_v45, 1  ;;  %v316_v33 = vrot.slane %v315_v3, 1 }
 0x110   :  { %v322_v18 = vrot.slane %v321_v0, 1  ;;  %v395_v58 = vadd.f32 %v394_v12, %v393_v53  ;;  %v401_v9 = vadd.f32 %v400_v56, %v399_v28  ;;  %v8843_v44 = vunpack.c.l.bf16 %v7993_v59 }
 0x111   :  { %v586_v5 = vrot.slane %v585_v41, 1  ;;  %v8186_v43 = vadd.f32 %v298_v63, %v297_v25  ;;  %v8844_v42 = vunpack.c.h.bf16 %v7993_v59  ;;  %v8845_v1 = vunpack.c.l.bf16 %v7995_v60 }
 0x112   :  { %v264_v6 = vmul.f32 %v8843_v44, %v145_v23  ;;  %v8846_v39 = vunpack.c.h.bf16 %v7995_v60  ;;  %v7579_v20 = vpop.eup %7578  ;;  %v328_v37 = vrot.slane %v327_v32, 1  ;;  %v8847_v53 = vunpack.c.l.bf16 %v7997_v61 }
 0x113   :  { %v265_v14 = vmul.f32 %v8844_v42, %v145_v23  ;;  %v266_v50 = vmul.f32 %v8845_v1, %v145_v23  ;;  %v587_v13 = vadd.f32 %v586_v5, %v585_v41  ;;  %v8848_v12 = vunpack.c.h.bf16 %v7997_v61 }
 0x114   :  { %v267_v48 = vmul.f32 %v8846_v39, %v145_v23  ;;  %v268_v28 = vmul.f32 %v8847_v53, %v145_v23  ;;  %v8198_v25 = vadd.f32 %v304_v38, %v303_v27  ;;  %v8200_v49 = vadd.f32 %v310_v29, %v309_v45 }
 0x115   :  { %v269_v56 = vmul.f32 %v8848_v12, %v145_v23  ;;  %v8202_v59 = vadd.f32 %v316_v33, %v315_v3  ;;  %v323_v22 = vadd.f32 %v322_v18, %v321_v0  ;;  %v8204_v47 = vmul.f32 %v7579_v20, %v395_v58 }
 0x116   :  { %v8206_v60 = vmul.f32 %v7579_v20, %v401_v9  ;;  %v630_v15 = vmax.f32 %v587_v13, 1e-09  ;;  %v402_v57 = vrot.slane %v264_v6, 4  ;;  %v408_v21 = vrot.slane %v265_v14, 4 }
 0x117   :  { %8849 = vst [vmem:[#allocation33_spill] sm:$0xff] %v8204_v47  ;;  %v414_v63 = vrot.slane %v266_v50, 4  ;;  %v420_v41 = vrot.slane %v267_v48, 4  ;;  %v426_v5 = vrot.slane %v268_v28, 4  ;;  %v432_v44 = vrot.slane %v269_v56, 4 }
 0x118   :  { %8850 = vst [vmem:[#allocation34_spill] sm:$0xff] %v8206_v60  ;;  %7580 = vrcp.f32 %v630_v15  ;;  %v403_v61 = vadd.f32 %v402_v57, %v264_v6  ;;  %v600_v27 = vrot.slane %v145_v23, 4  ;;  %v409_v38 = vadd.f32 %v408_v21, %v265_v14 }
 0x119   :  { %v415_v45 = vadd.f32 %v414_v63, %v266_v50  ;;  %v421_v29 = vadd.f32 %v420_v41, %v267_v48  ;;  %v427_v3 = vadd.f32 %v426_v5, %v268_v28  ;;  %v329_v33 = vadd.f32 %v328_v37, %v327_v32  ;;  %v131_v48 = vpop.permute.xlu0 %130 }
 0x11a   :  { %v404_v0 = vrot.slane %v403_v61, 2  ;;  %v433_v18 = vadd.f32 %v432_v44, %v269_v56  ;;  %v601_v58 = vadd.f32 %v600_v27, %v145_v23  ;;  %v410_v9 = vrot.slane %v409_v38, 2 }
 0x11b   :  { %v416_v42 = vrot.slane %v415_v45, 2  ;;  %v422_v1 = vrot.slane %v421_v29, 2  ;;  %v428_v39 = vrot.slane %v427_v3, 2  ;;  %v8209_v13 = vmul.f32 %v7579_v20, %v8172_v40 }
 0x11c   :  { %v405_v53 = vadd.f32 %v404_v0, %v403_v61  ;;  %v434_v12 = vrot.slane %v433_v18, 2  ;;  %v602_v6 = vrot.slane %v601_v58, 2  ;;  %v411_v15 = vadd.f32 %v410_v9, %v409_v38 }
 0x11d   :  { %8851 = vst [vmem:[#allocation35_spill] sm:$0xff] %v8209_v13  ;;  %v417_v57 = vadd.f32 %v416_v42, %v415_v45  ;;  %v423_v14 = vadd.f32 %v422_v1, %v421_v29  ;;  %v429_v50 = vadd.f32 %v428_v39, %v427_v3  ;;  %v8212_v32 = vmul.f32 %v7579_v20, %v8178_v52 }
 0x11e   :  { %v406_v37 = vrot.slane %v405_v53, 1  ;;  %v435_v23 = vadd.f32 %v434_v12, %v433_v18  ;;  %v603_v28 = vadd.f32 %v602_v6, %v601_v58  ;;  %v412_v56 = vrot.slane %v411_v15, 1 }
 0x11f   :  { %v418_v21 = vrot.slane %v417_v57, 1  ;;  %v424_v63 = vrot.slane %v423_v14, 1  ;;  %v430_v41 = vrot.slane %v429_v50, 1  ;;  %v8215_v40 = vmul.f32 %v7579_v20, %v8180_v8 }
 0x120   :  { %v8218_v5 = vmul.f32 %v7579_v20, %v8182_v51  ;;  %v604_v61 = vrot.slane %v603_v28, 1  ;;  %v8853_v44 = vunpack.c.l.bf16 %v8001_v2  ;;  %v8222_v38 = vadd.f32 %v406_v37, %v405_v53 }
 0x121   :  { %8852 = vst [vmem:[#allocation36_spill] sm:$0xff] %v8215_v40  ;;  %v8854_v52 = vunpack.c.h.bf16 %v8001_v2  ;;  %v8855_v29 = vunpack.c.l.bf16 %v8003_v4  ;;  %v8856_v0 = vunpack.c.h.bf16 %v8003_v4  ;;  %v436_v58 = vrot.slane %v435_v23, 1 }
 0x122   :  { %v252_v27 = vmul.f32 %v8853_v44, %v131_v48  ;;  %v7581_v8 = vpop.eup %7580  ;;  %v605_v9 = vadd.f32 %v604_v61, %v603_v28  ;;  %v8857_v51 = vunpack.c.l.bf16 %v8009_v10  ;;  %v8858_v42 = vunpack.c.h.bf16 %v8009_v10 }
 0x123   :  { %v253_v45 = vmul.f32 %v8854_v52, %v131_v48  ;;  %v254_v3 = vmul.f32 %v8855_v29, %v131_v48  ;;  %v255_v18 = vmul.f32 %v8856_v0, %v131_v48  ;;  %v8234_v39 = vadd.f32 %v412_v56, %v411_v15 }
 0x124   :  { %v256_v20 = vmul.f32 %v8857_v51, %v131_v48  ;;  %v257_v1 = vmul.f32 %v8858_v42, %v131_v48  ;;  %v8236_v53 = vadd.f32 %v418_v21, %v417_v57  ;;  %v8238_v2 = vadd.f32 %v424_v63, %v423_v14 }
 0x125   :  { %v431_v12 = vadd.f32 %v430_v41, %v429_v50  ;;  %v8240_v6 = vmul.f32 %v7581_v8, %v323_v22  ;;  %v8242_v4 = vmul.f32 %v7581_v8, %v329_v33  ;;  %v633_v37 = vmax.f32 %v605_v9, 1e-09 }
 0x126   :  { %v330_v44 = vrot.slane %v252_v27, 4  ;;  %v336_v28 = vrot.slane %v253_v45, 4  ;;  %v342_v61 = vrot.slane %v254_v3, 4  ;;  %v348_v52 = vrot.slane %v255_v18, 4 }
 0x127   :  { %8859 = vst [vmem:[#allocation37_spill] sm:$0xff] %v8240_v6  ;;  %8860 = vst [vmem:[#allocation38_spill] sm:$0xff] %v8242_v4  ;;  %v354_v29 = vrot.slane %v256_v20, 4  ;;  %7582 = vrcp.f32 %v633_v37  ;;  %v360_v0 = vrot.slane %v257_v1, 4  ;;  %v588_v15 = vrot.slane %v131_v48, 4 }
 0x128   :  { %v331_v10 = vadd.f32 %v330_v44, %v252_v27  ;;  %v337_v56 = vadd.f32 %v336_v28, %v253_v45  ;;  %v343_v57 = vadd.f32 %v342_v61, %v254_v3  ;;  %v349_v21 = vadd.f32 %v348_v52, %v255_v18  ;;  %v159_v18 = vpop.permute.xlu1 %158 }
 0x129   :  { %v355_v14 = vadd.f32 %v354_v29, %v256_v20  ;;  %v437_v63 = vadd.f32 %v436_v58, %v435_v23  ;;  %v361_v22 = vadd.f32 %v360_v0, %v257_v1  ;;  %v589_v41 = vadd.f32 %v588_v15, %v131_v48 }
 0x12a   :  { %v332_v50 = vrot.slane %v331_v10, 2  ;;  %v338_v33 = vrot.slane %v337_v56, 2  ;;  %v344_v51 = vrot.slane %v343_v57, 2  ;;  %v350_v9 = vrot.slane %v349_v21, 2 }
 0x12b   :  { %v356_v42 = vrot.slane %v355_v14, 2  ;;  %v8245_v47 = vmul.f32 %v7581_v8, %v8186_v43  ;;  %v362_v37 = vrot.slane %v361_v22, 2  ;;  %v590_v27 = vrot.slane %v589_v41, 2 }
 0x12c   :  { %v333_v6 = vadd.f32 %v332_v50, %v331_v10  ;;  %v339_v44 = vadd.f32 %v338_v33, %v337_v56  ;;  %v345_v60 = vadd.f32 %v344_v51, %v343_v57  ;;  %v351_v45 = vadd.f32 %v350_v9, %v349_v21 }
 0x12d   :  { %v357_v3 = vadd.f32 %v356_v42, %v355_v14  ;;  %v8248_v23 = vmul.f32 %v7581_v8, %v8198_v25  ;;  %v363_v48 = vadd.f32 %v362_v37, %v361_v22  ;;  %v591_v20 = vadd.f32 %v590_v27, %v589_v41 }
 0x12e   :  { %v334_v58 = vrot.slane %v333_v6, 1  ;;  %v340_v1 = vrot.slane %v339_v44, 1  ;;  %v346_v28 = vrot.slane %v345_v60, 1  ;;  %v352_v61 = vrot.slane %v351_v45, 1 }
 0x12f   :  { %v358_v52 = vrot.slane %v357_v3, 1  ;;  %v8251_v43 = vmul.f32 %v7581_v8, %v8200_v49  ;;  %v8254_v29 = vmul.f32 %v7581_v8, %v8202_v59  ;;  %v592_v10 = vrot.slane %v591_v20, 1 }
 0x130   :  { %v8862_v0 = vunpack.c.l.bf16 %v8011_v11  ;;  %v8258_v56 = vadd.f32 %v334_v58, %v333_v6  ;;  %v8863_v25 = vunpack.c.h.bf16 %v8011_v11  ;;  %v8864_v21 = vunpack.c.l.bf16 %v8017_v16 }
 0x131   :  { %8861 = vst [vmem:[#allocation39_spill] sm:$0xff] %v8251_v43  ;;  %v8865_v50 = vunpack.c.h.bf16 %v8017_v16  ;;  %v7583_v49 = vpop.eup %7582  ;;  %v364_v41 = vrot.slane %v363_v48, 1  ;;  %v593_v33 = vadd.f32 %v592_v10, %v591_v20  ;;  %v8866_v59 = vunpack.c.l.bf16 %v8019_v17 }
 0x132   :  { %v276_v15 = vmul.f32 %v8862_v0, %v159_v18  ;;  %v277_v57 = vmul.f32 %v8863_v25, %v159_v18  ;;  %v278_v14 = vmul.f32 %v8864_v21, %v159_v18  ;;  %v8867_v51 = vunpack.c.h.bf16 %v8019_v17 }
 0x133   :  { %v279_v22 = vmul.f32 %v8865_v50, %v159_v18  ;;  %v280_v8 = vmul.f32 %v8866_v59, %v159_v18  ;;  %v8270_v6 = vadd.f32 %v340_v1, %v339_v44  ;;  %v8272_v42 = vadd.f32 %v346_v28, %v345_v60 }
 0x134   :  { %v281_v9 = vmul.f32 %v8867_v51, %v159_v18  ;;  %v8274_v11 = vadd.f32 %v352_v61, %v351_v45  ;;  %v359_v37 = vadd.f32 %v358_v52, %v357_v3  ;;  %v8276_v27 = vmul.f32 %v7583_v49, %v431_v12 }
 0x135   :  { %v8278_v16 = vmul.f32 %v7583_v49, %v437_v63  ;;  %v631_v58 = vmax.f32 %v593_v33, 1e-09  ;;  %v474_v0 = vrot.slane %v276_v15, 4  ;;  %v480_v20 = vrot.slane %v277_v57, 4 }
 0x136   :  { %8868 = vst [vmem:[#allocation40_spill] sm:$0xff] %v8276_v27  ;;  %v486_v10 = vrot.slane %v278_v14, 4  ;;  %v492_v25 = vrot.slane %v279_v22, 4  ;;  %v498_v21 = vrot.slane %v280_v8, 4  ;;  %v504_v50 = vrot.slane %v281_v9, 4 }
 0x137   :  { %8869 = vst [vmem:[#allocation41_spill] sm:$0xff] %v8278_v16  ;;  %7584 = vrcp.f32 %v631_v58  ;;  %v475_v17 = vadd.f32 %v474_v0, %v276_v15  ;;  %v612_v44 = vrot.slane %v159_v18, 4  ;;  %v481_v1 = vadd.f32 %v480_v20, %v277_v57 }
 0x138   :  { %v487_v60 = vadd.f32 %v486_v10, %v278_v14  ;;  %v493_v28 = vadd.f32 %v492_v25, %v279_v22  ;;  %v499_v45 = vadd.f32 %v498_v21, %v280_v8  ;;  %v365_v61 = vadd.f32 %v364_v41, %v363_v48  ;;  %v152_v22 = vpop.permute.xlu0 %151 }
 0x139   :  { %v476_v3 = vrot.slane %v475_v17, 2  ;;  %v505_v12 = vadd.f32 %v504_v50, %v281_v9  ;;  %v613_v52 = vadd.f32 %v612_v44, %v159_v18  ;;  %v482_v63 = vrot.slane %v481_v1, 2 }
 0x13a   :  { %v488_v59 = vrot.slane %v487_v60, 2  ;;  %v494_v33 = vrot.slane %v493_v28, 2  ;;  %v500_v51 = vrot.slane %v499_v45, 2  ;;  %v8281_v27 = vmul.f32 %v7583_v49, %v8222_v38 }
 0x13b   :  { %v477_v16 = vadd.f32 %v476_v3, %v475_v17  ;;  %v506_v58 = vrot.slane %v505_v12, 2  ;;  %v614_v15 = vrot.slane %v613_v52, 2  ;;  %v483_v0 = vadd.f32 %v482_v63, %v481_v1 }
 0x13c   :  { %8870 = vst [vmem:[#allocation42_spill] sm:$0xff] %v8281_v27  ;;  %v489_v4 = vadd.f32 %v488_v59, %v487_v60  ;;  %v495_v57 = vadd.f32 %v494_v33, %v493_v28  ;;  %v501_v14 = vadd.f32 %v500_v51, %v499_v45  ;;  %v8284_v48 = vmul.f32 %v7583_v49, %v8234_v39 }
 0x13d   :  { %v478_v41 = vrot.slane %v477_v16, 1  ;;  %v507_v18 = vadd.f32 %v506_v58, %v505_v12  ;;  %v615_v8 = vadd.f32 %v614_v15, %v613_v52  ;;  %v484_v9 = vrot.slane %v483_v0, 1 }
 0x13e   :  { %v490_v20 = vrot.slane %v489_v4, 1  ;;  %v496_v10 = vrot.slane %v495_v57, 1  ;;  %v502_v25 = vrot.slane %v501_v14, 1  ;;  %v8287_v38 = vmul.f32 %v7583_v49, %v8236_v53 }
 0x13f   :  { %v508_v21 = vrot.slane %v507_v18, 1  ;;  %v616_v17 = vrot.slane %v615_v8, 1  ;;  %v8872_v50 = vunpack.c.l.bf16 %v8025_v24  ;;  %v8292_v1 = vmul.f32 %v7583_v49, %v8238_v2 }
 0x140   :  { %8871 = vst [vmem:[#allocation43_spill] sm:$0xff] %v8287_v38  ;;  %v8873_v39 = vunpack.c.h.bf16 %v8025_v24  ;;  %v8874_v28 = vunpack.c.l.bf16 %v8031_v31  ;;  %v8875_v3 = vunpack.c.h.bf16 %v8031_v31  ;;  %v8300_v53 = vadd.f32 %v478_v41, %v477_v16 }
 0x141   :  { %v270_v44 = vmul.f32 %v8872_v50, %v152_v22  ;;  %v7585_v52 = vpop.eup %7584  ;;  %v8302_v63 = vadd.f32 %v484_v9, %v483_v0  ;;  %v8876_v59 = vunpack.c.l.bf16 %v8037_v36  ;;  %v8877_v2 = vunpack.c.h.bf16 %v8037_v36 }
 0x142   :  { %v271_v60 = vmul.f32 %v8873_v39, %v152_v22  ;;  %v272_v45 = vmul.f32 %v8874_v28, %v152_v22  ;;  %v273_v12 = vmul.f32 %v8875_v3, %v152_v22  ;;  %v8308_v51 = vadd.f32 %v490_v20, %v489_v4 }
 0x143   :  { %v274_v33 = vmul.f32 %v8876_v59, %v152_v22  ;;  %v275_v49 = vmul.f32 %v8877_v2, %v152_v22  ;;  %v8310_v24 = vadd.f32 %v496_v10, %v495_v57  ;;  %v8312_v58 = vadd.f32 %v502_v25, %v501_v14 }
 0x144   :  { %8878 = vst [vmem:[#allocation44_spill] sm:$0xff] %v8308_v51  ;;  %v8314_v15 = vadd.f32 %v508_v21, %v507_v18  ;;  %v8316_v31 = vmul.f32 %v7585_v52, %v359_v37  ;;  %v8318_v16 = vmul.f32 %v7585_v52, %v365_v61  ;;  %v617_v0 = vadd.f32 %v616_v17, %v615_v8 }
 0x145   :  { %8879 = vst [vmem:[#allocation45_spill] sm:$0xff] %v8312_v58  ;;  %v438_v41 = vrot.slane %v270_v44, 4  ;;  %v444_v9 = vrot.slane %v271_v60, 4  ;;  %v450_v50 = vrot.slane %v272_v45, 4  ;;  %v456_v39 = vrot.slane %v273_v12, 4 }
 0x146   :  { %8880 = vst [vmem:[#allocation46_spill] sm:$0xff] %v8314_v15  ;;  %8881 = vst [vmem:[#allocation47_spill] sm:$0xff] %v8316_v31  ;;  %v462_v28 = vrot.slane %v274_v33, 4  ;;  %v8321_v36 = vmul.f32 %v7585_v52, %v8258_v56  ;;  %v468_v57 = vrot.slane %v275_v49, 4  ;;  %v606_v20 = vrot.slane %v152_v22, 4 }
 0x147   :  { %8882 = vst [vmem:[#allocation48_spill] sm:$0xff] %v8318_v16  ;;  %v439_v4 = vadd.f32 %v438_v41, %v270_v44  ;;  %v445_v14 = vadd.f32 %v444_v9, %v271_v60  ;;  %v451_v10 = vadd.f32 %v450_v50, %v272_v45  ;;  %v457_v18 = vadd.f32 %v456_v39, %v273_v12  ;;  %v173_v41 = vpop.permute.xlu1 %172 }
 0x148   :  { %v463_v25 = vadd.f32 %v462_v28, %v274_v33  ;;  %v8324_v37 = vmul.f32 %v7585_v52, %v8270_v6  ;;  %v469_v8 = vadd.f32 %v468_v57, %v275_v49  ;;  %v607_v21 = vadd.f32 %v606_v20, %v152_v22 }
 0x149   :  { %v440_v61 = vrot.slane %v439_v4, 2  ;;  %v446_v17 = vrot.slane %v445_v14, 2  ;;  %v452_v3 = vrot.slane %v451_v10, 2  ;;  %v458_v59 = vrot.slane %v457_v18, 2 }
 0x14a   :  { %v464_v2 = vrot.slane %v463_v25, 2  ;;  %v635_v31 = vmax.f32 %v617_v0, 1e-09  ;;  %v470_v58 = vrot.slane %v469_v8, 2  ;;  %v608_v44 = vrot.slane %v607_v21, 2 }
 0x14b   :  { %v441_v56 = vadd.f32 %v440_v61, %v439_v4  ;;  %v447_v16 = vadd.f32 %v446_v17, %v445_v14  ;;  %v453_v60 = vadd.f32 %v452_v3, %v451_v10  ;;  %v8326_v45 = vadd.f32 %v458_v59, %v457_v18 }
 0x14c   :  { %v465_v12 = vadd.f32 %v464_v2, %v463_v25  ;;  %v8329_v6 = vmul.f32 %v7585_v52, %v8272_v42  ;;  %v471_v49 = vadd.f32 %v470_v58, %v469_v8  ;;  %v609_v22 = vadd.f32 %v608_v44, %v607_v21  ;;  %v8888_v8 = vld [vmem:[#allocation24_spill] sm:$0xff] }
 0x14d   :  { %v442_v33 = vrot.slane %v441_v56, 1  ;;  %v8332_v9 = vmul.f32 %v7585_v52, %v8274_v11  ;;  %v8884_v0 = vunpack.c.l.bf16 %v8056_v26  ;;  %v8885_v39 = vunpack.c.h.bf16 %v8056_v26 }
 0x14e   :  { %8883 = vst [vmem:[#allocation49_spill] sm:$0xff] %v8329_v6  ;;  %v8886_v4 = vunpack.c.l.bf16 %v8058_v46  ;;  %7586 = vrcp.f32 %v635_v31  ;;  %v448_v20 = vrot.slane %v447_v16, 1  ;;  %v610_v14 = vrot.slane %v609_v22, 1 }
 0x14f   :  { %v288_v50 = vmul.f32 %v8884_v0, %v173_v41  ;;  %v289_v28 = vmul.f32 %v8885_v39, %v173_v41  ;;  %v8887_v42 = vunpack.c.h.bf16 %v8058_v46  ;;  %v8342_v58 = vadd.f32 %v442_v33, %v441_v56 }
 0x150   :  { %v290_v57 = vmul.f32 %v8886_v4, %v173_v41  ;;  %v454_v18 = vrot.slane %v453_v60, 1  ;;  %v466_v52 = vrot.slane %v465_v12, 1  ;;  %v472_v25 = vrot.slane %v471_v49, 1 }
 0x151   :  { %v291_v10 = vmul.f32 %v8887_v42, %v173_v41  ;;  %v611_v61 = vadd.f32 %v610_v14, %v609_v22  ;;  %v8889_v26 = vunpack.c.l.bf16 %v8888_v8  ;;  %v8890_v17 = vunpack.c.h.bf16 %v8888_v8 }
 0x152   :  { %v546_v31 = vrot.slane %v288_v50, 4  ;;  %v552_v59 = vrot.slane %v289_v28, 4  ;;  %v558_v2 = vrot.slane %v290_v57, 4  ;;  %v624_v33 = vrot.slane %v173_v41, 4 }
 0x153   :  { %v292_v21 = vmul.f32 %v8889_v26, %v173_v41  ;;  %v293_v3 = vmul.f32 %v8890_v17, %v173_v41  ;;  %v564_v44 = vrot.slane %v291_v10, 4  ;;  %v634_v46 = vmax.f32 %v611_v61, 1e-09  ;;  %v166_v26 = vpop.permute.xlu0 %165 }
 0x154   :  { %v547_v39 = vadd.f32 %v546_v31, %v288_v50  ;;  %v553_v4 = vadd.f32 %v552_v59, %v289_v28  ;;  %v559_v42 = vadd.f32 %v558_v2, %v290_v57  ;;  %v625_v15 = vadd.f32 %v624_v33, %v173_v41  ;;  %v8891_v28 = vld [vmem:[#allocation25_spill] sm:$0xff] }
 0x155   :  { %v570_v0 = vrot.slane %v292_v21, 4  ;;  %v576_v56 = vrot.slane %v293_v3, 4  ;;  %v565_v11 = vadd.f32 %v564_v44, %v291_v10  ;;  %7588 = vrcp.f32 %v634_v46 }
 0x156   :  { %v548_v38 = vrot.slane %v547_v39, 2  ;;  %v554_v8 = vrot.slane %v553_v4, 2  ;;  %v560_v17 = vrot.slane %v559_v42, 2  ;;  %v449_v6 = vadd.f32 %v448_v20, %v447_v16 }
 0x157   :  { %v571_v22 = vadd.f32 %v570_v0, %v292_v21  ;;  %v577_v14 = vadd.f32 %v576_v56, %v293_v3  ;;  %v566_v40 = vrot.slane %v565_v11, 2  ;;  %v626_v61 = vrot.slane %v625_v15, 2  ;;  %v8894_v0 = vld [vmem:[#allocation26_spill] sm:$0xff] }
 0x158   :  { %v455_v27 = vadd.f32 %v454_v18, %v453_v60  ;;  %v8349_v13 = vadd.f32 %v548_v38, %v547_v39  ;;  %v8351_v50 = vadd.f32 %v554_v8, %v553_v4  ;;  %v8892_v57 = vunpack.c.l.bf16 %v8891_v28  ;;  %v8355_v21 = vpop.eup %7586 }
 0x159   :  { %v572_v43 = vrot.slane %v571_v22, 2  ;;  %v578_v51 = vrot.slane %v577_v14, 2  ;;  %v467_v41 = vadd.f32 %v466_v52, %v465_v12  ;;  %v473_v3 = vadd.f32 %v472_v25, %v471_v49  ;;  %v8897_v25 = vld [vmem:[#allocation27_spill] sm:$0xff] }
 0x15a   :  { %v282_v10 = vmul.f32 %v8892_v57, %v166_v26  ;;  %v627_v31 = vadd.f32 %v626_v61, %v625_v15  ;;  %v8893_v59 = vunpack.c.h.bf16 %v8891_v28  ;;  %v8359_v16 = vadd.f32 %v560_v17, %v559_v42 }
 0x15b   :  { %v8361_v20 = vadd.f32 %v566_v40, %v565_v11  ;;  %v8363_v60 = vadd.f32 %v572_v43, %v571_v22  ;;  %v8365_v38 = vadd.f32 %v578_v51, %v577_v14  ;;  %v556_v44 = vrot.slane %v8351_v50, 1 }
 0x15c   :  { %v283_v2 = vmul.f32 %v8893_v59, %v166_v26  ;;  %v628_v46 = vrot.slane %v627_v31, 1  ;;  %v8895_v12 = vunpack.c.l.bf16 %v8894_v0  ;;  %v8896_v15 = vunpack.c.h.bf16 %v8894_v0 }
 0x15d   :  { %v8898_v56 = vunpack.c.l.bf16 %v8897_v25  ;;  %v8899_v40 = vunpack.c.h.bf16 %v8897_v25  ;;  %v510_v11 = vrot.slane %v282_v10, 4  ;;  %v618_v42 = vrot.slane %v166_v26, 4 }
 0x15e   :  { %v284_v49 = vmul.f32 %v8895_v12, %v166_v26  ;;  %v285_v52 = vmul.f32 %v8896_v15, %v166_v26  ;;  %v629_v51 = vadd.f32 %v628_v46, %v627_v31  ;;  %v516_v39 = vrot.slane %v283_v2, 4 }
 0x15f   :  { %v286_v33 = vmul.f32 %v8898_v56, %v166_v26  ;;  %v287_v43 = vmul.f32 %v8899_v40, %v166_v26  ;;  %v511_v22 = vadd.f32 %v510_v11, %v282_v10  ;;  %v7589_v61 = vpop.eup %7588  ;;  %v619_v0 = vadd.f32 %v618_v42, %v166_v26 }
 0x160   :  { %v522_v4 = vrot.slane %v284_v49, 4  ;;  %v528_v14 = vrot.slane %v285_v52, 4  ;;  %v637_v28 = vmax.f32 %v629_v51, 1e-09  ;;  %v517_v57 = vadd.f32 %v516_v39, %v283_v2 }
 0x161   :  { %v534_v8 = vrot.slane %v286_v33, 4  ;;  %v540_v17 = vrot.slane %v287_v43, 4  ;;  %v8900_v12 = vrot.slane %v8326_v45, 1  ;;  %v568_v31 = vrot.slane %v8361_v20, 1 }
 0x162   :  { %v523_v59 = vadd.f32 %v522_v4, %v284_v49  ;;  %v8383_v10 = vmul.f32 %v7589_v61, %v467_v41  ;;  %v8385_v56 = vmul.f32 %v7589_v61, %v473_v3  ;;  %7590 = vrcp.f32 %v637_v28 }
 0x163   :  { %v461_v15 = vadd.f32 %v8900_v12, %v8326_v45  ;;  %v512_v2 = vrot.slane %v511_v22, 2  ;;  %v518_v26 = vrot.slane %v517_v57, 2  ;;  %v529_v40 = vadd.f32 %v528_v14, %v285_v52 }
 0x164   :  { %8901 = vst [vmem:[#allocation24_spill] sm:$0xff] %v8383_v10  ;;  %v524_v49 = vrot.slane %v523_v59, 2  ;;  %v535_v11 = vadd.f32 %v534_v8, %v286_v33  ;;  %v580_v45 = vrot.slane %v8365_v38, 1  ;;  %v541_v39 = vadd.f32 %v540_v17, %v287_v43 }
 0x165   :  { %v513_v51 = vadd.f32 %v512_v2, %v511_v22  ;;  %v620_v4 = vrot.slane %v619_v0, 2  ;;  %v8389_v42 = vmul.f32 %v7589_v61, %v8342_v58  ;;  %v519_v12 = vadd.f32 %v518_v26, %v517_v57 }
 0x166   :  { %v8391_v41 = vadd.f32 %v524_v49, %v523_v59  ;;  %v530_v3 = vrot.slane %v529_v40, 2  ;;  %v671_v46 = vmul.f32 %v7589_v61, %v449_v6  ;;  %v536_v28 = vrot.slane %v535_v11, 2 }
 0x167   :  { %v542_v25 = vrot.slane %v541_v39, 2  ;;  %v621_v18 = vadd.f32 %v620_v4, %v619_v0  ;;  %v8393_v10 = vmul.f32 %v7589_v61, %v455_v27  ;;  %v514_v52 = vrot.slane %v513_v51, 1  ;;  %v8904_v4 = vld [vmem:[#allocation32_spill] sm:$0xff] }
 0x168   :  { %v520_v33 = vrot.slane %v519_v12, 1  ;;  %v531_v14 = vadd.f32 %v530_v3, %v529_v40  ;;  %v8395_v8 = vmul.f32 %v7589_v61, %v461_v15  ;;  %v1165_v58 = vsel %vm1151_vm0, %v8324_v37, %v8248_v23 }
 0x169   :  { %v8397_v43 = vadd.f32 %v542_v25, %v541_v39  ;;  %v622_v22 = vrot.slane %v621_v18, 1  ;;  %v526_v17 = vrot.slane %v8391_v41, 1  ;;  %v557_v57 = vadd.f32 %v556_v44, %v8351_v50 }
 0x16a   :  { %v532_v6 = vrot.slane %v531_v14, 1  ;;  %v677_v27 = vmul.f32 %v8355_v21, %v8302_v63  ;;  %v8406_v59 = vadd.f32 %v536_v28, %v535_v11  ;;  %v1166_v61 = vsel %vm1153_vm1, %v8212_v32, %v1165_v58 }
 0x16b   :  { %v623_v0 = vadd.f32 %v622_v22, %v621_v18  ;;  %v1265_v15 = vsel %vm1159_vm5, %v8118_v62, %v8154_v35  ;;  %v8413_v25 = vadd.f32 %v514_v52, %v513_v51  ;;  %v521_v23 = vadd.f32 %v520_v33, %v519_v12  ;;  %v8902_v51 = vld [vmem:[#allocation28_spill] sm:$0xff]  ;;  %v8907_v33 = vld [vmem:[#allocation30_spill] sm:$0xff] }
 0x16c   :  { %v1167_v37 = vsel %vm1155_vm2, %v8284_v48, %v1166_v61  ;;  %v1266_v50 = vsel %vm1161_vm4, %v8120_v19, %v1265_v15  ;;  %v8419_v63 = vpop.eup %7590  ;;  %v533_v44 = vadd.f32 %v532_v6, %v531_v14  ;;  %v544_v18 = vrot.slane %v8397_v43, 1 }
 0x16d   :  { %v636_v2 = vmax.f32 %v623_v0, 1e-09  ;;  %v1168_v32 = vsel %vm1157_vm3, %v671_v46, %v1167_v37  ;;  %v689_v26 = vmul.f32 %v8419_v63, %v557_v57  ;;  %v8427_v62 = vsel %vm1163_vm6, %v8151_v54, %v1266_v50  ;;  %v8905_v54 = vld [vmem:[#allocation29_spill] sm:$0xff] }
 0x16e   :  { %v1169_v35 = vsel %vm1159_vm5, %v677_v27, %v1168_v32  ;;  %v569_v48 = vadd.f32 %v568_v31, %v8361_v20  ;;  %v786_v19 = vrot.slane %v8127_v34, 2  ;;  %v822_v49 = vrot.slane %v8131_v7, 2  ;;  %v8910_v27 = vld [vmem:[#allocation31_spill] sm:$0xff] }
 0x16f   :  { %7592 = vrcp.f32 %v636_v2  ;;  %v858_v40 = vrot.slane %v8170_v55, 2  ;;  %v679_v46 = vmul.f32 %v8355_v21, %v8310_v24  ;;  %v894_v11 = vrot.slane %v8176_v30, 2 }
 0x170   :  { %v8903_v39 = vunpack.c.h.bf16 %v8902_v51  ;;  %v8906_v3 = vunpack.c.h.bf16 %v8905_v54  ;;  %v787_v20 = vadd.f32 %v786_v19, %v8127_v34  ;;  %v823_v31 = vadd.f32 %v822_v49, %v8131_v7 }
 0x171   :  { %v859_v52 = vadd.f32 %v858_v40, %v8170_v55  ;;  %v8908_v14 = vunpack.c.h.bf16 %v8907_v33  ;;  %v895_v24 = vadd.f32 %v894_v11, %v8176_v30  ;;  %v8911_v0 = vunpack.c.h.bf16 %v8910_v27 }
 0x172   :  { %v929_v12 = vadd.f32 %v8904_v4, %v8903_v39  ;;  %v964_v28 = vrot.slane %v8906_v3, 4  ;;  %v8909_v6 = vmov %v8906_v3  ;;  %v788_v15 = vrot.slane %v787_v20, 1 }
 0x173   :  { %v1000_v22 = vrot.slane %v8908_v14, 4  ;;  %v1036_v61 = vrot.slane %v8911_v0, 4  ;;  %v824_v37 = vrot.slane %v823_v31, 1  ;;  %v860_v50 = vrot.slane %v859_v52, 1 }
 0x174   :  { %v930_v58 = vrot.slane %v929_v12, 2  ;;  %v965_v57 = vadd.f32 %v964_v28, %v8909_v6  ;;  %v8912_v34 = vmov %v8908_v14  ;;  %v896_v2 = vrot.slane %v895_v24, 1 }
 0x175   :  { %v1001_v7 = vadd.f32 %v1000_v22, %v8912_v34  ;;  %v8913_v19 = vmov %v8911_v0  ;;  %v789_v30 = vadd.f32 %v788_v15, %v787_v20  ;;  %v825_v40 = vadd.f32 %v824_v37, %v823_v31 }
 0x176   :  { %v931_v55 = vadd.f32 %v930_v58, %v929_v12  ;;  %v966_v32 = vrot.slane %v965_v57, 2  ;;  %v1037_v49 = vadd.f32 %v1036_v61, %v8913_v19  ;;  %v861_v11 = vadd.f32 %v860_v50, %v859_v52 }
 0x177   :  { %v1002_v51 = vrot.slane %v1001_v7, 2  ;;  %v897_v39 = vadd.f32 %v896_v2, %v895_v24  ;;  %v1058_v14 = vmul.f32 0.125, %v789_v30  ;;  %v1064_v6 = vmul.f32 0.125, %v825_v40 }
 0x178   :  { %v932_v4 = vrot.slane %v931_v55, 1  ;;  %v967_v54 = vadd.f32 %v966_v32, %v965_v57  ;;  %v1038_v3 = vrot.slane %v1037_v49, 2  ;;  %v1070_v0 = vmul.f32 0.125, %v861_v11 }
 0x179   :  { %v1003_v28 = vadd.f32 %v1002_v51, %v1001_v7  ;;  %v691_v33 = vmul.f32 %v8419_v63, %v569_v48  ;;  %v8456_v34 = vpop.eup %7592  ;;  %v1076_v20 = vmul.f32 0.125, %v897_v39  ;;  %v1179_v31 = vsel %vm1151_vm0, %v8332_v9, %v8254_v29  ;;  %v7606_v51 = vld [vmem:[#allocation7 + $0x30] sm:$0xff]  ;;  %v7607_v39 = vld [vmem:[#allocation7 + $0x48] sm:$0xff] }
 0x17a   :  { %v933_v22 = vadd.f32 %v932_v4, %v931_v55  ;;  %v968_v12 = vrot.slane %v967_v54, 1  ;;  %v1039_v58 = vadd.f32 %v1038_v3, %v1037_v49  ;;  %v1275_v52 = vsel %vm1151_vm0, %v1064_v6, %v1058_v14 }
 0x17b   :  { %v1004_v27 = vrot.slane %v1003_v28, 1  ;;  %v683_v24 = vmul.f32 %v8456_v34, %v521_v23  ;;  %v685_v57 = vmul.f32 %v8456_v34, %v533_v44  ;;  %v1180_v50 = vsel %vm1153_vm1, %v8218_v5, %v1179_v31 }
 0x17c   :  { %v969_v61 = vadd.f32 %v968_v12, %v967_v54  ;;  %v1040_v15 = vrot.slane %v1039_v58, 1  ;;  %v1082_v37 = vmul.f32 0.125, %v933_v22  ;;  %v1276_v7 = vsel %vm1153_vm1, %v1070_v0, %v1275_v52  ;;  %v7608_v54 = vld [vmem:[#allocation7 + $0x60] sm:$0xff]  ;;  %v7611_v0 = vld [vmem:[#allocation7 + $0xa8] sm:$0xff] }
 0x17d   :  { %v1005_v48 = vadd.f32 %v1004_v27, %v1003_v28  ;;  %v1170_v2 = vsel %vm1161_vm4, %v683_v24, %v1169_v35  ;;  %v1181_v29 = vsel %vm1155_vm2, %v8292_v1, %v1180_v50  ;;  %v1277_v19 = vsel %vm1155_vm2, %v1076_v20, %v1276_v7  ;;  %v7609_v28 = vld [vmem:[#allocation7 + $0x78] sm:$0xff]  ;;  %v8914_v12 = vld [vmem:[#allocation22_spill] sm:$0xff]  ;;  %v8916_v27 = vld [vmem:[#allocation23_spill] sm:$0xff] }
 0x17e   :  { %v1041_v55 = vadd.f32 %v1040_v15, %v1039_v58  ;;  %v1088_v32 = vmul.f32 0.125, %v969_v61  ;;  %v1171_v9 = vsel %vm1163_vm6, %v689_v26, %v1170_v2  ;;  %v1182_v44 = vsel %vm1157_vm3, %v8395_v8, %v1181_v29 }
 0x17f   :  { %v1094_v23 = vmul.f32 0.125, %v1005_v48  ;;  %v8475_v49 = vpack.c.bf16 %v8427_v62, %v1171_v9  ;;  %v1183_v30 = vsel %vm1159_vm5, %v679_v46, %v1182_v44  ;;  %v1278_v35 = vsel %vm1157_vm3, %v1082_v37, %v1277_v19 }
 0x180   :  { %v1100_v5 = vmul.f32 0.125, %v1041_v55  ;;  %v8482_v1 = vadd.f32 %v526_v17, %v8391_v41  ;;  %v538_v26 = vrot.slane %v8406_v59, 1  ;;  %v1184_v40 = vsel %vm1161_vm4, %v685_v57, %v1183_v30 }
 0x181   :  { %v1279_v8 = vsel %vm1159_vm5, %v1088_v32, %v1278_v35  ;;  %v8490_v62 = vadd.f32 %v544_v18, %v8397_v43  ;;  %4796 = vmatprep.mubr.bf16.mxu0 %v8475_v49  ;;  %v1185_v46 = vsel %vm1163_vm6, %v691_v33, %v1184_v40  ;;  %v730_v41 = vunpack.c.l.bf16 %v7606_v51  ;;  %v7610_v43 = vld [vmem:[#allocation7 + $0x90] sm:$0xff] }
 0x182   :  { %v1280_v11 = vsel %vm1161_vm4, %v1094_v23, %v1279_v8  ;;  %v736_v4 = vunpack.c.l.bf16 %v7607_v39  ;;  %v742_v3 = vunpack.c.l.bf16 %v7608_v54  ;;  %v748_v14 = vunpack.c.l.bf16 %v7609_v28 }
 0x183   :  { %v1281_v17 = vsel %vm1163_vm6, %v1100_v5, %v1280_v11  ;;  %v754_v18 = vunpack.c.l.bf16 %v7610_v43  ;;  %v760_v22 = vunpack.c.l.bf16 %v7611_v0  ;;  %v8915_v33 = vunpack.c.l.bf16 %v8914_v12 }
 0x184   :  { %v8496_v6 = vpack.c.bf16 %v1281_v17, %v1185_v46  ;;  %v8917_v20 = vunpack.c.l.bf16 %v8916_v27  ;;  %v838_v52 = vrot.slane %v730_v41, 4  ;;  %v874_v24 = vrot.slane %v736_v4, 4 }
 0x185   :  { %v766_v58 = vrot.slane %v8915_v33, 4  ;;  %v910_v57 = vrot.slane %v742_v3, 4  ;;  %v8918_v61 = vmov %v8915_v33  ;;  %v946_v48 = vrot.slane %v748_v14, 4 }
 0x186   :  { %v802_v31 = vrot.slane %v8917_v20, 4  ;;  %4837 = vmatprep.mubr.bf16.mxu1 %v8496_v6  ;;  %v982_v37 = vrot.slane %v754_v18, 4  ;;  %v1018_v50 = vrot.slane %v760_v22, 4  ;;  %v8919_v7 = vmov %v8917_v20 }
 0x187   :  { %v767_v15 = vadd.f32 %v766_v58, %v8918_v61  ;;  %v839_v55 = vadd.f32 %v838_v52, %v730_v41  ;;  %v875_v32 = vadd.f32 %v874_v24, %v736_v4  ;;  %v911_v29 = vadd.f32 %v910_v57, %v742_v3 }
 0x188   :  { %v803_v2 = vadd.f32 %v802_v31, %v8919_v7  ;;  %v947_v23 = vadd.f32 %v946_v48, %v748_v14  ;;  %v983_v44 = vadd.f32 %v982_v37, %v754_v18  ;;  %v1019_v19 = vadd.f32 %v1018_v50, %v760_v22 }
 0x189   :  { %v768_v9 = vrot.slane %v767_v15, 2  ;;  %v840_v30 = vrot.slane %v839_v55, 2  ;;  %v876_v35 = vrot.slane %v875_v32, 2  ;;  %v912_v40 = vrot.slane %v911_v29, 2 }
 0x18a   :  { %v804_v5 = vrot.slane %v803_v2, 2  ;;  %v948_v46 = vrot.slane %v947_v23, 2  ;;  %v984_v11 = vrot.slane %v983_v44, 2  ;;  %v1020_v51 = vrot.slane %v1019_v19, 2 }
 0x18b   :  { %v769_v8 = vadd.f32 %v768_v9, %v767_v15  ;;  %v841_v39 = vadd.f32 %v840_v30, %v839_v55  ;;  %v877_v54 = vadd.f32 %v876_v35, %v875_v32  ;;  %v913_v28 = vadd.f32 %v912_v40, %v911_v29 }
 0x18c   :  { %v805_v17 = vadd.f32 %v804_v5, %v803_v2  ;;  %v949_v41 = vadd.f32 %v948_v46, %v947_v23  ;;  %v985_v4 = vadd.f32 %v984_v11, %v983_v44  ;;  %v1021_v3 = vadd.f32 %v1020_v51, %v1019_v19  ;;  %v8921_v5 = vld [vmem:[#allocation35_spill] sm:$0xff]  ;;  %v7613_v51 = vld [vmem:[#allocation7 + $0x20] sm:$0xff] }
 0x18d   :  { %v770_v43 = vrot.slane %v769_v8, 1  ;;  %v842_v14 = vrot.slane %v841_v39, 1  ;;  %v878_v18 = vrot.slane %v877_v54, 1  ;;  %v914_v22 = vrot.slane %v913_v28, 1 }
 0x18e   :  { %v806_v0 = vrot.slane %v805_v17, 1  ;;  %v950_v33 = vrot.slane %v949_v41, 1  ;;  %v986_v58 = vrot.slane %v985_v4, 1  ;;  %v1022_v27 = vrot.slane %v1021_v3, 1 }
 0x18f   :  { %v771_v12 = vadd.f32 %v770_v43, %v769_v8  ;;  %v843_v31 = vadd.f32 %v842_v14, %v841_v39  ;;  %v879_v52 = vadd.f32 %v878_v18, %v877_v54  ;;  %v915_v24 = vadd.f32 %v914_v22, %v913_v28  ;;  %v8922_v8 = vld [vmem:[#allocation42_spill] sm:$0xff]  ;;  %v7614_v28 = vld [vmem:[#allocation7 + $0x38] sm:$0xff] }
 0x190   :  { %v807_v20 = vadd.f32 %v806_v0, %v805_v17  ;;  %v951_v57 = vadd.f32 %v950_v33, %v949_v41  ;;  %v987_v61 = vadd.f32 %v986_v58, %v985_v4  ;;  %v1023_v15 = vadd.f32 %v1022_v27, %v1021_v3  ;;  %v7615_v41 = vld [vmem:[#allocation7 + $0x50] sm:$0xff]  ;;  %v7616_v14 = vld [vmem:[#allocation7 + $0x68] sm:$0xff]  ;;  %v7617_v18 = vld [vmem:[#allocation7 + $0x80] sm:$0xff] }
 0x191   :  { %v1055_v48 = vmul.f32 0.125, %v771_v12  ;;  %v8920_v37 = vrot.slane %v8349_v13, 1  ;;  %v1067_v2 = vmul.f32 0.125, %v843_v31  ;;  %v1073_v55 = vmul.f32 0.125, %v879_v52  ;;  %v7618_v58 = vld [vmem:[#allocation7 + $0x98] sm:$0xff] }
 0x192   :  { %v1061_v7 = vmul.f32 0.125, %v807_v20  ;;  %v676_v32 = vmul.f32 %v8355_v21, %v8300_v53  ;;  %v682_v29 = vmul.f32 %v8456_v34, %v8413_v25  ;;  %v1079_v9 = vmul.f32 0.125, %v915_v24  ;;  %v7619_v20 = vld [vmem:[#allocation7 + $0xb0] sm:$0xff] }
 0x193   :  { %v551_v50 = vadd.f32 %v8920_v37, %v8349_v13  ;;  %v1152_v23 = vsel %vm1151_vm0, %v8321_v36, %v8245_v47  ;;  %v1085_v19 = vmul.f32 0.125, %v951_v57  ;;  %v1091_v35 = vmul.f32 0.125, %v987_v61  ;;  %v7612_v36 = vld [vmem:[#allocation7 + $0x8] sm:$0xff]  ;;  %v6756_v52 = vld [vmem:[#allocation8 + $0xc00] ss:$48 sps:$4 sm:$0xff]  }
 0x194   :  { %v1154_v13 = vsel %vm1153_vm1, %v8921_v5, %v1152_v23  ;;  %v1254_v30 = vsel %vm1151_vm0, %v1061_v7, %v1055_v48  ;;  %v1097_v40 = vmul.f32 0.125, %v1023_v15  ;;  %v720_v11 = vunpack.c.l.bf16 %v7612_v36  ;;  %v6770_v36 = vld [vmem:[#allocation8 + $0xcc4] ss:$48 sps:$4 sm:$0xff]  }
 0x195   :  { %v688_v44 = vmul.f32 %v8419_v63, %v551_v50  ;;  %v1156_v53 = vsel %vm1155_vm2, %v8922_v8, %v1154_v13  ;;  %v1255_v25 = vsel %vm1153_vm1, %v1067_v2, %v1254_v30  ;;  %v726_v17 = vunpack.c.l.bf16 %v7613_v51  ;;  %v6764_v2 = vld [vmem:[#allocation8 + $0xc64] ss:$48 sps:$4 sm:$0xff]   ;;  %v6762_v8 = vld [vmem:[#allocation8 + $0xc60] ss:$48 sps:$4 sm:$0xff]  }
 0x196   :  { %v1158_v46 = vsel %vm1157_vm3, %v8389_v42, %v1156_v53  ;;  %v1256_v47 = vsel %vm1155_vm2, %v1073_v55, %v1255_v25  ;;  %v732_v43 = vunpack.c.l.bf16 %v7614_v28  ;;  %v738_v4 = vunpack.c.l.bf16 %v7615_v41 }
 0x197   :  { %v1160_v39 = vsel %vm1159_vm5, %v676_v32, %v1158_v46  ;;  %v1257_v54 = vsel %vm1157_vm3, %v1079_v9, %v1256_v47  ;;  %v744_v42 = vunpack.c.l.bf16 %v7616_v14  ;;  %v750_v22 = vunpack.c.l.bf16 %v7617_v18 }
 0x198   :  { %v1162_v3 = vsel %vm1161_vm4, %v682_v29, %v1160_v39  ;;  %v1258_v0 = vsel %vm1159_vm5, %v1085_v19, %v1257_v54  ;;  %v756_v27 = vunpack.c.l.bf16 %v7618_v58  ;;  %v762_v31 = vunpack.c.l.bf16 %v7619_v20  ;;  %v6776_v58 = vld [vmem:[#allocation8 + $0xd24] ss:$48 sps:$4 sm:$0xff]  }
 0x199   :  { %v1164_v12 = vsel %vm1163_vm6, %v688_v44, %v1162_v3  ;;  %v1259_v33 = vsel %vm1161_vm4, %v1091_v35, %v1258_v0  ;;  %v778_v57 = vrot.slane %v720_v11, 4  ;;  %v814_v61 = vrot.slane %v726_v17, 4 }
 0x19a   :  { %v1260_v24 = vsel %vm1163_vm6, %v1097_v40, %v1259_v33  ;;  %v850_v15 = vrot.slane %v732_v43, 4  ;;  %v886_v37 = vrot.slane %v738_v4, 4  ;;  %v922_v50 = vrot.slane %v744_v42, 4 }
 0x19b   :  { %v8534_v48 = vpack.c.bf16 %v1260_v24, %v1164_v12  ;;  %v958_v7 = vrot.slane %v750_v22, 4  ;;  %v779_v55 = vadd.f32 %v778_v57, %v720_v11  ;;  %v815_v32 = vadd.f32 %v814_v61, %v726_v17 }
 0x19c   :  { %v851_v29 = vadd.f32 %v850_v15, %v732_v43  ;;  %v994_v9 = vrot.slane %v756_v27, 4  ;;  %v887_v23 = vadd.f32 %v886_v37, %v738_v4  ;;  %v923_v44 = vadd.f32 %v922_v50, %v744_v42  ;;  %v6768_v42 = vld [vmem:[#allocation8 + $0xcc0] ss:$48 sps:$4 sm:$0xff]  }
 0x19d   :  { %4797 = vmatmul.mubr.bf16.vlgmr.msra.gmra.mrb[0].mxu0 %v8534_v48  ;;  %v959_v19 = vadd.f32 %v958_v7, %v750_v22  ;;  %v1030_v5 = vrot.slane %v762_v31, 4  ;;  %v780_v13 = vrot.slane %v779_v55, 2  ;;  %v816_v30 = vrot.slane %v815_v32, 2 }
 0x19e   :  { %v852_v35 = vrot.slane %v851_v29, 2  ;;  %v995_v40 = vadd.f32 %v994_v9, %v756_v27  ;;  %4847 = vmatpush1.bf16.msra.mxu0 %v6756_v52  ;;  %v888_v53 = vrot.slane %v887_v23, 2  ;;  %v924_v25 = vrot.slane %v923_v44, 2 }
 0x19f   :  { %v960_v46 = vrot.slane %v959_v19, 2  ;;  %v1031_v47 = vadd.f32 %v1030_v5, %v762_v31  ;;  %4848 = vmatprep.subr.bf16.mxu0 %v6764_v2  ;;  %v781_v11 = vadd.f32 %v780_v13, %v779_v55  ;;  %v817_v51 = vadd.f32 %v816_v30, %v815_v32  ;;  %v8537_v55 = vld [vmem:[#allocation7 + $0x10] sm:$0xff]  ;;  %v8539_v32 = vld [vmem:[#allocation7 + $0x28] sm:$0xff]  ;;  %v8544_v13 = vld [vmem:[#allocation7 + $0x40] sm:$0xff] }
 0x1a0   :  { %v853_v17 = vadd.f32 %v852_v35, %v851_v29  ;;  %v996_v39 = vrot.slane %v995_v40, 2  ;;  %v889_v54 = vadd.f32 %v888_v53, %v887_v23  ;;  %v925_v28 = vadd.f32 %v924_v25, %v923_v44  ;;  %v6774_v29 = vld [vmem:[#allocation8 + $0xd20] ss:$48 sps:$4 sm:$0xff]   ;;  %v8546_v30 = vld [vmem:[#allocation7 + $0x58] sm:$0xff]  ;;  %v6782_v35 = vld [vmem:[#allocation8 + $0xd84] ss:$48 sps:$4 sm:$0xff]  }
 0x1a1   :  { %v961_v43 = vadd.f32 %v960_v46, %v959_v19  ;;  %v1032_v41 = vrot.slane %v1031_v47, 2  ;;  %v782_v4 = vrot.slane %v781_v11, 1  ;;  %v818_v3 = vrot.slane %v817_v51, 1  ;;  %v8925_v25 = vld [vmem:[#allocation39_spill] sm:$0xff]  ;;  %v8926_v46 = vld [vmem:[#allocation49_spill] sm:$0xff] }
 0x1a2   :  { %v854_v0 = vrot.slane %v853_v17, 1  ;;  %v997_v14 = vadd.f32 %v996_v39, %v995_v40  ;;  %4849 = vmatpush1.bf16.msra.mxu0 %v6762_v8  ;;  %v890_v18 = vrot.slane %v889_v54, 1  ;;  %v926_v22 = vrot.slane %v925_v28, 1  ;;  %v8924_v40 = vld [vmem:[#allocation44_spill] sm:$0xff] }
 0x1a3   :  { %v962_v12 = vrot.slane %v961_v43, 1  ;;  %v1033_v33 = vadd.f32 %v1032_v41, %v1031_v47  ;;  %4850 = vmatprep.subr.bf16.mxu0 %v6770_v36  ;;  %v783_v27 = vadd.f32 %v782_v4, %v781_v11  ;;  %v819_v20 = vadd.f32 %v818_v3, %v817_v51  ;;  %v8556_v11 = vld [vmem:[#allocation7 + $0x88] sm:$0xff]  ;;  %v8927_v39 = vld [vmem:[#allocation36_spill] sm:$0xff] }
 0x1a4   :  { %v855_v31 = vadd.f32 %v854_v0, %v853_v17  ;;  %v998_v52 = vrot.slane %v997_v14, 1  ;;  %v891_v24 = vadd.f32 %v890_v18, %v889_v54  ;;  %v927_v57 = vadd.f32 %v926_v22, %v925_v28  ;;  %v8928_v4 = vld [vmem:[#allocation43_spill] sm:$0xff]  ;;  %v8572_v22 = vld [vmem:[#allocation7 + $0xb8] sm:$0xff] }
 0x1a5   :  { %v963_v61 = vadd.f32 %v962_v12, %v961_v43  ;;  %v1034_v15 = vrot.slane %v1033_v33, 1  ;;  %v1057_v50 = vmul.f32 0.125, %v783_v27  ;;  %v1063_v7 = vmul.f32 0.125, %v819_v20  ;;  %v6759_v27 = vld [vmem:[#allocation8 + $0x8] ss:$48 sps:$4 sm:$0xff]  }
 0x1a6   :  { %v999_v37 = vadd.f32 %v998_v52, %v997_v14  ;;  %v1069_v2 = vmul.f32 0.125, %v855_v31  ;;  %4851 = vmatpush1.bf16.msra.mxu0 %v6768_v42  ;;  %v8923_v9 = vrot.slane %v8359_v16, 1  ;;  %v1075_v19 = vmul.f32 0.125, %v891_v24  ;;  %v8567_v14 = vld [vmem:[#allocation7 + $0xa0] sm:$0xff] }
 0x1a7   :  { %v1035_v44 = vadd.f32 %v1034_v15, %v1033_v33  ;;  %v1081_v5 = vmul.f32 0.125, %v927_v57  ;;  %4852 = vmatprep.subr.bf16.mxu0 %v6776_v58  ;;  %v678_v8 = vmul.f32 %v8355_v21, %v8924_v40  ;;  %v1087_v53 = vmul.f32 0.125, %v963_v61  ;;  %v6780_v42 = vld [vmem:[#allocation8 + $0xd80] ss:$48 sps:$4 sm:$0xff]   ;;  %v6788_v58 = vld [vmem:[#allocation8 + $0xde4] ss:$48 sps:$4 sm:$0xff]  }
 0x1a8   :  { %v563_v23 = vadd.f32 %v8923_v9, %v8359_v16  ;;  %v1172_v47 = vsel %vm1151_vm0, %v8926_v46, %v8925_v25  ;;  %v1268_v36 = vsel %vm1151_vm0, %v1063_v7, %v1057_v50  ;;  %v8554_v16 = vld [vmem:[#allocation7 + $0x70] sm:$0xff]  ;;  %v684_v51 = vmul.f32 %v8456_v34, %v8482_v1 }
 0x1a9   :  { %v1093_v17 = vmul.f32 0.125, %v999_v37  ;;  %v1173_v54 = vsel %vm1153_vm1, %v8927_v39, %v1172_v47  ;;  %v1269_v28 = vsel %vm1153_vm1, %v1069_v2, %v1268_v36  ;;  %v1099_v41 = vmul.f32 0.125, %v1035_v44  ;;  %v6767_v37 = vld [vmem:[#allocation8 + $0x6c] ss:$48 sps:$4 sm:$0xff]   ;;  %v6786_v9 = vld [vmem:[#allocation8 + $0xde0] ss:$48 sps:$4 sm:$0xff]  }
 0x1aa   :  { %v690_v43 = vmul.f32 %v8419_v63, %v563_v23  ;;  %v1174_v3 = vsel %vm1155_vm2, %v8928_v4, %v1173_v54  ;;  %v1270_v0 = vsel %vm1155_vm2, %v1075_v19, %v1269_v28  ;;  %4853 = vmatpush1.bf16.msra.mxu0 %v6774_v29  ;;  %v723_v12 = vunpack.c.h.bf16 %v8537_v55 }
 0x1ab   :  { %v1175_v1 = vsel %vm1157_vm3, %v8393_v10, %v1174_v3  ;;  %v1271_v18 = vsel %vm1157_vm3, %v1081_v5, %v1270_v0  ;;  %v729_v33 = vunpack.c.h.bf16 %v8539_v32  ;;  %4854 = vmatprep.subr.bf16.mxu0 %v6782_v35  ;;  %v735_v52 = vunpack.c.h.bf16 %v8544_v13 }
 0x1ac   :  { %v1176_v20 = vsel %vm1159_vm5, %v678_v8, %v1175_v1  ;;  %v1272_v31 = vsel %vm1159_vm5, %v1087_v53, %v1271_v18  ;;  %v741_v24 = vunpack.c.h.bf16 %v8546_v30  ;;  %v747_v61 = vunpack.c.h.bf16 %v8554_v16 }
 0x1ad   :  { %v1177_v10 = vsel %vm1161_vm4, %v684_v51, %v1176_v20  ;;  %v1273_v57 = vsel %vm1161_vm4, %v1093_v17, %v1272_v31  ;;  %v753_v15 = vunpack.c.h.bf16 %v8556_v11  ;;  %v759_v2 = vunpack.c.h.bf16 %v8567_v14  ;;  %v6794_v51 = vld [vmem:[#allocation8 + $0xe44] ss:$48 sps:$4 sm:$0xff]  }
 0x1ae   :  { %v1178_v50 = vsel %vm1163_vm6, %v690_v43, %v1177_v10  ;;  %v1274_v7 = vsel %vm1163_vm6, %v1099_v41, %v1273_v57  ;;  %v765_v29 = vunpack.c.h.bf16 %v8572_v22  ;;  %4855 = vmatpush1.bf16.msra.mxu0 %v6780_v42  ;;  %v796_v44 = vrot.slane %v723_v12, 4  ;;  %v6765_v43 = vld [vmem:[#allocation8 + $0x68] ss:$48 sps:$4 sm:$0xff]   ;;  %v6773_v42 = vld [vmem:[#allocation8 + $0xcc] ss:$48 sps:$4 sm:$0xff]  }
 0x1af   :  { %v8588_v23 = vpack.c.bf16 %v1274_v7, %v1178_v50  ;;  %v832_v19 = vrot.slane %v729_v33, 4  ;;  %v868_v5 = vrot.slane %v735_v52, 4  ;;  %4856 = vmatprep.subr.bf16.mxu0 %v6788_v58  ;;  %v904_v35 = vrot.slane %v741_v24, 4  ;;  %v6792_v58 = vld [vmem:[#allocation8 + $0xe40] ss:$48 sps:$4 sm:$0xff]  }
 0x1b0   :  { %v940_v40 = vrot.slane %v747_v61, 4  ;;  %v976_v8 = vrot.slane %v753_v15, 4  ;;  %v1012_v53 = vrot.slane %v759_v2, 4  ;;  %v797_v25 = vadd.f32 %v796_v44, %v723_v12  ;;  %v6771_v50 = vld [vmem:[#allocation8 + $0xc8] ss:$48 sps:$4 sm:$0xff]  }
 0x1b1   :  { %4838 = vmatmul.mubr.bf16.vlgmr.msra.gmra.mrb[0].mxu1 %v8588_v23  ;;  %v833_v46 = vadd.f32 %v832_v19, %v729_v33  ;;  %v869_v47 = vadd.f32 %v868_v5, %v735_v52  ;;  %v1048_v36 = vrot.slane %v765_v29, 4  ;;  %v905_v17 = vadd.f32 %v904_v35, %v741_v24  ;;  %v6800_v24 = vld [vmem:[#allocation8 + $0xea4] ss:$48 sps:$4 sm:$0xff]  }
 0x1b2   :  { %4888 = vmatpush1.bf16.msra.mxu1 %v6759_v27  ;;  %v941_v39 = vadd.f32 %v940_v40, %v747_v61  ;;  %v977_v54 = vadd.f32 %v976_v8, %v753_v15  ;;  %v1013_v28 = vadd.f32 %v1012_v53, %v759_v2  ;;  %v798_v41 = vrot.slane %v797_v25, 2  ;;  %4919 = vmatprep.mubr.bf16.mxu1 %v8475_v49  ;;  %v6806_v8 = vld [vmem:[#allocation8 + $0xf04] ss:$48 sps:$4 sm:$0xff]  }
 0x1b3   :  { %v834_v4 = vrot.slane %v833_v46, 2  ;;  %v870_v3 = vrot.slane %v869_v47, 2  ;;  %v1049_v0 = vadd.f32 %v1048_v36, %v765_v29  ;;  %4889 = vmatprep.subr.bf16.mxu1 %v6767_v37  ;;  %v906_v1 = vrot.slane %v905_v17, 2  ;;  %4857 = vmatpush1.bf16.msra.mxu0 %v6786_v9  ;;  %v6779_v37 = vld [vmem:[#allocation8 + $0x12c] ss:$48 sps:$4 sm:$0xff]  }
 0x1b4   :  { %v942_v18 = vrot.slane %v941_v39, 2  ;;  %v978_v12 = vrot.slane %v977_v54, 2  ;;  %v1014_v33 = vrot.slane %v1013_v28, 2  ;;  %v799_v27 = vadd.f32 %v798_v41, %v797_v25  ;;  %4858 = vmatprep.subr.bf16.mxu0 %v6794_v51  ;;  %v6798_v9 = vld [vmem:[#allocation8 + $0xea0] ss:$48 sps:$4 sm:$0xff]  }
 0x1b5   :  { %v835_v20 = vadd.f32 %v834_v4, %v833_v46  ;;  %v871_v31 = vadd.f32 %v870_v3, %v869_v47  ;;  %v1050_v52 = vrot.slane %v1049_v0, 2  ;;  %v907_v10 = vadd.f32 %v906_v1, %v905_v17  ;;  %v6785_v3 = vld [vmem:[#allocation8 + $0x18c] ss:$48 sps:$4 sm:$0xff]  }
 0x1b6   :  { %v943_v57 = vadd.f32 %v942_v18, %v941_v39  ;;  %v979_v61 = vadd.f32 %v978_v12, %v977_v54  ;;  %v1015_v15 = vadd.f32 %v1014_v33, %v1013_v28  ;;  %4890 = vmatpush1.bf16.msra.mxu1 %v6765_v43  ;;  %v800_v7 = vrot.slane %v799_v27, 1  ;;  %v6777_v54 = vld [vmem:[#allocation8 + $0x128] ss:$48 sps:$4 sm:$0xff]   ;;  %v6804_v33 = vld [vmem:[#allocation8 + $0xf00] ss:$48 sps:$4 sm:$0xff]  }
 0x1b7   :  { %v836_v2 = vrot.slane %v835_v20, 1  ;;  %v872_v29 = vrot.slane %v871_v31, 1  ;;  %v1051_v44 = vadd.f32 %v1050_v52, %v1049_v0  ;;  %4891 = vmatprep.subr.bf16.mxu1 %v6773_v42  ;;  %v908_v19 = vrot.slane %v907_v10, 1  ;;  %4859 = vmatpush1.bf16.msra.mxu0 %v6792_v58  ;;  %v8929_v42 = vld [vmem:[#allocation46_spill] sm:$0xff]  ;;  %v8931_v52 = vld [vmem:[#allocation48_spill] sm:$0xff] }
 0x1b8   :  { %v944_v5 = vrot.slane %v943_v57, 1  ;;  %v980_v35 = vrot.slane %v979_v61, 1  ;;  %v1016_v40 = vrot.slane %v1015_v15, 1  ;;  %v801_v53 = vadd.f32 %v800_v7, %v799_v27  ;;  %4860 = vmatprep.subr.bf16.mxu0 %v6800_v24  ;;  %v6812_v58 = vld [vmem:[#allocation8 + $0xf64] ss:$48 sps:$4 sm:$0xff]   ;;  %v8933_v7 = vld [vmem:[#allocation41_spill] sm:$0xff] }
 0x1b9   :  { %v837_v25 = vadd.f32 %v836_v2, %v835_v20  ;;  %v873_v46 = vadd.f32 %v872_v29, %v871_v31  ;;  %v1052_v47 = vrot.slane %v1051_v44, 1  ;;  %v909_v36 = vadd.f32 %v908_v19, %v907_v10  ;;  %v8930_v31 = vld [vmem:[#allocation38_spill] sm:$0xff] }
 0x1ba   :  { %v945_v51 = vadd.f32 %v944_v5, %v943_v57  ;;  %v981_v17 = vadd.f32 %v980_v35, %v979_v61  ;;  %v1017_v39 = vadd.f32 %v1016_v40, %v1015_v15  ;;  %4892 = vmatpush1.bf16.msra.mxu1 %v6771_v50  ;;  %v1060_v43 = vmul.f32 0.125, %v801_v53  ;;  %v8932_v57 = vld [vmem:[#allocation34_spill] sm:$0xff] }
 0x1bb   :  { %v1053_v28 = vadd.f32 %v1052_v47, %v1051_v44  ;;  %v1066_v41 = vmul.f32 0.125, %v837_v25  ;;  %v1072_v4 = vmul.f32 0.125, %v873_v46  ;;  %4893 = vmatprep.subr.bf16.mxu1 %v6779_v37  ;;  %v581_v0 = vadd.f32 %v580_v45, %v8365_v38  ;;  %4861 = vmatpush1.bf16.msra.mxu0 %v6798_v9  ;;  %v6783_v50 = vld [vmem:[#allocation8 + $0x188] ss:$48 sps:$4 sm:$0xff]   ;;  %v6791_v37 = vld [vmem:[#allocation8 + $0x1ec] ss:$48 sps:$4 sm:$0xff]  }
 0x1bc   :  { %v681_v1 = vmul.f32 %v8355_v21, %v8929_v42  ;;  %v1078_v18 = vmul.f32 0.125, %v909_v36  ;;  %v1084_v12 = vmul.f32 0.125, %v945_v51  ;;  %v687_v27 = vmul.f32 %v8456_v34, %v8490_v62  ;;  %4862 = vmatprep.subr.bf16.mxu0 %v6806_v8  ;;  %v6810_v44 = vld [vmem:[#allocation8 + $0xf60] ss:$48 sps:$4 sm:$0xff]   ;;  %v6818_v9 = vld [vmem:[#allocation8 + $0xfc4] ss:$48 sps:$4 sm:$0xff]  }
 0x1bd   :  { %v1090_v20 = vmul.f32 0.125, %v981_v17  ;;  %v1193_v24 = vsel %vm1151_vm0, %v8931_v52, %v8930_v31  ;;  %v1289_v10 = vsel %vm1151_vm0, %v1066_v41, %v1060_v43  ;;  %v693_v38 = vmul.f32 %v8419_v63, %v581_v0  ;;  %v6789_v36 = vld [vmem:[#allocation8 + $0x1e8] ss:$48 sps:$4 sm:$0xff]   ;;  %v6797_v51 = vld [vmem:[#allocation8 + $0x24c] ss:$48 sps:$4 sm:$0xff]  }
 0x1be   :  { %v1096_v45 = vmul.f32 0.125, %v1017_v39  ;;  %v1194_v61 = vsel %vm1153_vm1, %v8932_v57, %v1193_v24  ;;  %v1290_v15 = vsel %vm1153_vm1, %v1072_v4, %v1289_v10  ;;  %4894 = vmatpush1.bf16.msra.mxu1 %v6777_v54  ;;  %v1102_v62 = vmul.f32 0.125, %v1053_v28  ;;  %v6816_v54 = vld [vmem:[#allocation8 + $0xfc0] ss:$48 sps:$4 sm:$0xff]  }
 0x1bf   :  { %v1195_v2 = vsel %vm1155_vm2, %v8933_v7, %v1194_v61  ;;  %v1291_v29 = vsel %vm1155_vm2, %v1078_v18, %v1290_v15  ;;  %4895 = vmatprep.subr.bf16.mxu1 %v6785_v3  ;;  %v722_v19 = vunpack.c.l.bf16 %v8537_v55  ;;  %4863 = vmatpush1.bf16.msra.mxu0 %v6804_v33  ;;  %v728_v40 = vunpack.c.l.bf16 %v8539_v32  ;;  %v6803_v18 = vld [vmem:[#allocation8 + $0x2ac] ss:$48 sps:$4 sm:$0xff]   ;;  %v6801_v7 = vld [vmem:[#allocation8 + $0x2a8] ss:$48 sps:$4 sm:$0xff]  }
 0x1c0   :  { %v1196_v5 = vsel %vm1157_vm3, %v8385_v56, %v1195_v2  ;;  %v1292_v35 = vsel %vm1157_vm3, %v1084_v12, %v1291_v29  ;;  %v734_v8 = vunpack.c.l.bf16 %v8544_v13  ;;  %4864 = vmatprep.subr.bf16.mxu0 %v6812_v58  ;;  %v740_v46 = vunpack.c.l.bf16 %v8546_v30  ;;  %v6824_v30 = vld [vmem:[#allocation8 + $0x1024] ss:$48 sps:$4 sm:$0xff]   ;;  %v6809_v2 = vld [vmem:[#allocation8 + $0x30c] ss:$48 sps:$4 sm:$0xff]  }
 0x1c1   :  { %v1197_v53 = vsel %vm1159_vm5, %v681_v1, %v1196_v5  ;;  %v1293_v25 = vsel %vm1159_vm5, %v1090_v20, %v1292_v35  ;;  %v746_v47 = vunpack.c.l.bf16 %v8554_v16  ;;  %v752_v32 = vunpack.c.l.bf16 %v8556_v11  ;;  %v6795_v1 = vld [vmem:[#allocation8 + $0x248] ss:$48 sps:$4 sm:$0xff]   ;;  %v6830_v20 = vld [vmem:[#allocation8 + $0x1084] ss:$48 sps:$4 sm:$0xff]   ;;  %v6828_v5 = vld [vmem:[#allocation8 + $0x1080] ss:$48 sps:$4 sm:$0xff]  }
 0x1c2   :  { %v1198_v55 = vsel %vm1161_vm4, %v687_v27, %v1197_v53  ;;  %v1294_v56 = vsel %vm1161_vm4, %v1096_v45, %v1293_v25  ;;  %4896 = vmatpush1.bf16.msra.mxu1 %v6783_v50  ;;  %v758_v13 = vunpack.c.l.bf16 %v8567_v14  ;;  %v764_v16 = vunpack.c.l.bf16 %v8572_v22  ;;  %v6822_v27 = vld [vmem:[#allocation8 + $0x1020] ss:$48 sps:$4 sm:$0xff]   ;;  %v6836_v35 = vld [vmem:[#allocation8 + $0x10e4] ss:$48 sps:$4 sm:$0xff]  }
 0x1c3   :  { %v1199_v17 = vsel %vm1163_vm6, %v693_v38, %v1198_v55  ;;  %v1295_v39 = vsel %vm1163_vm6, %v1102_v62, %v1294_v56  ;;  %4897 = vmatprep.subr.bf16.mxu1 %v6791_v37  ;;  %v790_v28 = vrot.slane %v722_v19, 4  ;;  %4865 = vmatpush1.bf16.msra.mxu0 %v6810_v44  ;;  %v826_v41 = vrot.slane %v728_v40, 4 }
 0x1c4   :  { %v8627_v43 = vpack.c.bf16 %v1295_v39, %v1199_v17  ;;  %v862_v4 = vrot.slane %v734_v8, 4  ;;  %v898_v3 = vrot.slane %v740_v46, 4  ;;  %4866 = vmatprep.subr.bf16.mxu0 %v6818_v9  ;;  %v934_v0 = vrot.slane %v746_v47, 4  ;;  %v6807_v17 = vld [vmem:[#allocation8 + $0x308] ss:$48 sps:$4 sm:$0xff]  }
 0x1c5   :  { %v791_v11 = vadd.f32 %v790_v28, %v722_v19  ;;  %v970_v14 = vrot.slane %v752_v32, 4  ;;  %v1006_v42 = vrot.slane %v758_v13, 4  ;;  %v827_v12 = vadd.f32 %v826_v41, %v728_v40  ;;  %v6815_v39 = vld [vmem:[#allocation8 + $0x36c] ss:$48 sps:$4 sm:$0xff]   ;;  %v6834_v41 = vld [vmem:[#allocation8 + $0x10e0] ss:$48 sps:$4 sm:$0xff]  }
 0x1c6   :  { %4878 = vmatprep.mubr.bf16.mxu0 %v8627_v43  ;;  %4898 = vmatpush1.bf16.msra.mxu1 %v6789_v36  ;;  %v863_v33 = vadd.f32 %v862_v4, %v734_v8  ;;  %v899_v22 = vadd.f32 %v898_v3, %v740_v46  ;;  %v1042_v58 = vrot.slane %v764_v16, 4  ;;  %v935_v52 = vadd.f32 %v934_v0, %v746_v47  ;;  %v6842_v4 = vld [vmem:[#allocation8 + $0x1144] ss:$48 sps:$4 sm:$0xff]  }
 0x1c7   :  { %4899 = vmatprep.subr.bf16.mxu1 %v6797_v51  ;;  %v792_v31 = vrot.slane %v791_v11, 2  ;;  %v971_v24 = vadd.f32 %v970_v14, %v752_v32  ;;  %v1007_v10 = vadd.f32 %v1006_v42, %v758_v13  ;;  %4867 = vmatpush1.bf16.msra.mxu0 %v6816_v54  ;;  %v828_v38 = vrot.slane %v827_v12, 2 }
 0x1c8   :  { %v864_v45 = vrot.slane %v863_v33, 2  ;;  %v900_v57 = vrot.slane %v899_v22, 2  ;;  %v1043_v61 = vadd.f32 %v1042_v58, %v764_v16  ;;  %4868 = vmatprep.subr.bf16.mxu0 %v6824_v30  ;;  %v936_v50 = vrot.slane %v935_v52, 2 }
 0x1c9   :  { %v793_v15 = vadd.f32 %v792_v31, %v791_v11  ;;  %v972_v37 = vrot.slane %v971_v24, 2  ;;  %v1008_v62 = vrot.slane %v1007_v10, 2  ;;  %v829_v29 = vadd.f32 %v828_v38, %v827_v12  ;;  %v8937_v38 = vld [vmem:[#allocation33_spill] sm:$0xff] }
 0x1ca   :  { %4900 = vmatpush1.bf16.msra.mxu1 %v6795_v1  ;;  %v865_v44 = vadd.f32 %v864_v45, %v863_v33  ;;  %v901_v9 = vadd.f32 %v900_v57, %v899_v22  ;;  %v1044_v19 = vrot.slane %v1043_v61, 2  ;;  %v937_v8 = vadd.f32 %v936_v50, %v935_v52  ;;  %v8934_v33 = vld [vmem:[#allocation45_spill] sm:$0xff]  ;;  %v6813_v52 = vld [vmem:[#allocation8 + $0x368] ss:$48 sps:$4 sm:$0xff]  }
 0x1cb   :  { %4901 = vmatprep.subr.bf16.mxu1 %v6803_v18  ;;  %v794_v40 = vrot.slane %v793_v15, 1  ;;  %v973_v53 = vadd.f32 %v972_v37, %v971_v24  ;;  %v1009_v25 = vadd.f32 %v1008_v62, %v1007_v10  ;;  %4869 = vmatpush1.bf16.msra.mxu0 %v6822_v27  ;;  %v830_v46 = vrot.slane %v829_v29, 1  ;;  %v8935_v27 = vld [vmem:[#allocation37_spill] sm:$0xff] }
 0x1cc   :  { %v866_v47 = vrot.slane %v865_v44, 1  ;;  %v902_v55 = vrot.slane %v901_v9, 1  ;;  %v1045_v56 = vadd.f32 %v1044_v19, %v1043_v61  ;;  %4870 = vmatprep.subr.bf16.mxu0 %v6830_v20  ;;  %v938_v51 = vrot.slane %v937_v8, 1  ;;  %v8936_v20 = vld [vmem:[#allocation47_spill] sm:$0xff] }
 0x1cd   :  { %v795_v36 = vadd.f32 %v794_v40, %v793_v15  ;;  %v974_v32 = vrot.slane %v973_v53, 1  ;;  %v1010_v13 = vrot.slane %v1009_v25, 1  ;;  %v831_v54 = vadd.f32 %v830_v46, %v829_v29  ;;  %v8938_v15 = vld [vmem:[#allocation40_spill] sm:$0xff]  ;;  %v6846_v46 = vld [vmem:[#allocation8 + $0x11a0] ss:$48 sps:$4 sm:$0xff]  }
 0x1ce   :  { %4902 = vmatpush1.bf16.msra.mxu1 %v6801_v7  ;;  %v867_v30 = vadd.f32 %v866_v47, %v865_v44  ;;  %v903_v16 = vadd.f32 %v902_v55, %v901_v9  ;;  %v1046_v28 = vrot.slane %v1045_v56, 1  ;;  %v939_v3 = vadd.f32 %v938_v51, %v937_v8  ;;  %v6848_v9 = vld [vmem:[#allocation8 + $0x11a4] ss:$48 sps:$4 sm:$0xff]   ;;  %v6825_v55 = vld [vmem:[#allocation8 + $0x428] ss:$48 sps:$4 sm:$0xff]  }
 0x1cf   :  { %4903 = vmatprep.subr.bf16.mxu1 %v6809_v2  ;;  %v975_v11 = vadd.f32 %v974_v32, %v973_v53  ;;  %v1011_v0 = vadd.f32 %v1010_v13, %v1009_v25  ;;  %v1059_v14 = vmul.f32 0.125, %v795_v36  ;;  %4871 = vmatpush1.bf16.msra.mxu0 %v6828_v5  ;;  %v1065_v42 = vmul.f32 0.125, %v831_v54  ;;  %v8940_v2 = vld [vmem:[#allocation24_spill] sm:$0xff]  ;;  %v6855_v51 = vld [vmem:[#allocation8 + $0x10] ss:$48 sps:$4 sm:$0xff]  }
 0x1d0   :  { %v1071_v1 = vmul.f32 0.125, %v867_v30  ;;  %v1077_v18 = vmul.f32 0.125, %v903_v16  ;;  %v539_v12 = vadd.f32 %v538_v26, %v8406_v59  ;;  %4872 = vmatprep.subr.bf16.mxu0 %v6836_v35  ;;  %v680_v22 = vmul.f32 %v8355_v21, %v8934_v33  ;;  %v6821_v59 = vld [vmem:[#allocation8 + $0x3cc] ss:$48 sps:$4 sm:$0xff]   ;;  %v6840_v26 = vld [vmem:[#allocation8 + $0x1140] ss:$48 sps:$4 sm:$0xff]  }
 0x1d1   :  { %v1083_v58 = vmul.f32 0.125, %v939_v3  ;;  %v1186_v31 = vsel %vm1151_vm0, %v8936_v20, %v8935_v27  ;;  %v1047_v24 = vadd.f32 %v1046_v28, %v1045_v56  ;;  %v1089_v10 = vmul.f32 0.125, %v975_v11  ;;  %v6819_v5 = vld [vmem:[#allocation8 + $0x3c8] ss:$48 sps:$4 sm:$0xff]   ;;  %v6857_v47 = vld [vmem:[#allocation8 + $0x14] ss:$48 sps:$4 sm:$0xff]  }
 0x1d2   :  { %4904 = vmatpush1.bf16.msra.mxu1 %v6807_v17  ;;  %v1187_v45 = vsel %vm1153_vm1, %v8937_v38, %v1186_v31  ;;  %v1282_v57 = vsel %vm1151_vm0, %v1065_v42, %v1059_v14  ;;  %v686_v61 = vmul.f32 %v8456_v34, %v539_v12  ;;  %v1095_v21 = vmul.f32 0.125, %v1011_v0  ;;  %v6863_v13 = vld [vmem:[#allocation8 + $0x74] ss:$48 sps:$4 sm:$0xff]   ;;  %v6831_v17 = vld [vmem:[#allocation8 + $0x488] ss:$48 sps:$4 sm:$0xff]  }
 0x1d3   :  { %4905 = vmatprep.subr.bf16.mxu1 %v6815_v39  ;;  %v1188_v50 = vsel %vm1155_vm2, %v8938_v15, %v1187_v45  ;;  %v1283_v37 = vsel %vm1153_vm1, %v1071_v1, %v1282_v57  ;;  %4873 = vmatpush1.bf16.msra.mxu0 %v6834_v41  ;;  %v8939_v62 = vrot.slane %v8363_v60, 1  ;;  %v1101_v40 = vmul.f32 0.125, %v1047_v24  ;;  %v6839_v39 = vld [vmem:[#allocation8 + $0x4ec] ss:$48 sps:$4 sm:$0xff]   ;;  %v6861_v54 = vld [vmem:[#allocation8 + $0x70] ss:$48 sps:$4 sm:$0xff]  }
 0x1d4   :  { %v1189_v29 = vsel %vm1157_vm3, %v8940_v2, %v1188_v50  ;;  %v1284_v44 = vsel %vm1155_vm2, %v1077_v18, %v1283_v37  ;;  %4874 = vmatprep.subr.bf16.mxu0 %v6842_v4  ;;  %v6869_v30 = vld [vmem:[#allocation8 + $0xd4] ss:$48 sps:$4 sm:$0xff]   ;;  %v6837_v16 = vld [vmem:[#allocation8 + $0x4e8] ss:$48 sps:$4 sm:$0xff]   ;;  %v6845_v28 = vld [vmem:[#allocation8 + $0x54c] ss:$48 sps:$4 sm:$0xff]  }
 0x1d5   :  { %v575_v7 = vadd.f32 %v8939_v62, %v8363_v60  ;;  %v1190_v34 = vsel %vm1159_vm5, %v680_v22, %v1189_v29  ;;  %v1285_v19 = vsel %vm1157_vm3, %v1083_v58, %v1284_v44  ;;  %v6827_v60 = vld [vmem:[#allocation8 + $0x42c] ss:$48 sps:$4 sm:$0xff]   ;;  %v6867_v41 = vld [vmem:[#allocation8 + $0xd0] ss:$48 sps:$4 sm:$0xff]   ;;  %v6875_v4 = vld [vmem:[#allocation8 + $0x134] ss:$48 sps:$4 sm:$0xff]  }
 0x1d6   :  { %4906 = vmatpush1.bf16.msra.mxu1 %v6813_v52  ;;  %v1286_v8 = vsel %vm1159_vm5, %v1089_v10, %v1285_v19  ;;  %v1191_v53 = vsel %vm1161_vm4, %v686_v61, %v1190_v34  ;;  %v6843_v3 = vld [vmem:[#allocation8 + $0x548] ss:$48 sps:$4 sm:$0xff]   ;;  %v6851_v11 = vld [vmem:[#allocation8 + $0x5ac] ss:$48 sps:$4 sm:$0xff]   ;;  %v6873_v0 = vld [vmem:[#allocation8 + $0x130] ss:$48 sps:$4 sm:$0xff]  }
 0x1d7   :  { %v692_v35 = vmul.f32 %v8419_v63, %v575_v7  ;;  %4907 = vmatprep.subr.bf16.mxu1 %v6821_v59  ;;  %v1287_v25 = vsel %vm1161_vm4, %v1095_v21, %v1286_v8  ;;  %4875 = vmatpush1.bf16.msra.mxu0 %v6840_v26  ;;  %v6833_v63 = vld [vmem:[#allocation8 + $0x48c] ss:$48 sps:$4 sm:$0xff]   ;;  %v6881_v14 = vld [vmem:[#allocation8 + $0x194] ss:$48 sps:$4 sm:$0xff]   ;;  %v6849_v42 = vld [vmem:[#allocation8 + $0x5a8] ss:$48 sps:$4 sm:$0xff]  }
 0x1d8   :  { %4876 = vmatprep.subr.bf16.mxu0 %v6848_v9  ;;  %v1288_v36 = vsel %vm1163_vm6, %v1101_v40, %v1287_v25  ;;  %v6854_v1 = vld [vmem:[#allocation8 + $0x60c] ss:$48 sps:$4 sm:$0xff]   ;;  %v6879_v18 = vld [vmem:[#allocation8 + $0x190] ss:$48 sps:$4 sm:$0xff]   ;;  %v6887_v12 = vld [vmem:[#allocation8 + $0x1f4] ss:$48 sps:$4 sm:$0xff]  }
 0x1d9   :  { %v1192_v56 = vsel %vm1163_vm6, %v692_v35, %v1191_v53  ;;  %v6852_v33 = vld [vmem:[#allocation8 + $0x608] ss:$48 sps:$4 sm:$0xff]   ;;  %v6860_v22 = vld [vmem:[#allocation8 + $0x66c] ss:$48 sps:$4 sm:$0xff]   ;;  %v6885_v58 = vld [vmem:[#allocation8 + $0x1f0] ss:$48 sps:$4 sm:$0xff]  }
 0x1da   :  { %4908 = vmatpush1.bf16.msra.mxu1 %v6819_v5  ;;  %v8659_v32 = vpack.c.bf16 %v1288_v36, %v1192_v56  ;;  %v6893_v27 = vld [vmem:[#allocation8 + $0x254] ss:$48 sps:$4 sm:$0xff]   ;;  %v6858_v20 = vld [vmem:[#allocation8 + $0x668] ss:$48 sps:$4 sm:$0xff]   ;;  %v6866_v31 = vld [vmem:[#allocation8 + $0x6cc] ss:$48 sps:$4 sm:$0xff]  }
 0x1db   :  { %4909 = vmatprep.subr.bf16.mxu1 %v6827_v60  ;;  %4877 = vmatpush1.bf16.msra.mxu0 %v6846_v46  ;;  %v6891_v52 = vld [vmem:[#allocation8 + $0x250] ss:$48 sps:$4 sm:$0xff]   ;;  %v6899_v24 = vld [vmem:[#allocation8 + $0x2b4] ss:$48 sps:$4 sm:$0xff]   ;;  %v6864_v10 = vld [vmem:[#allocation8 + $0x6c8] ss:$48 sps:$4 sm:$0xff]  }
 0x1dc   :  { %5010 = vmatprep.subr.bf16.mxu0 %v6857_v47  ;;  %v6872_v38 = vld [vmem:[#allocation8 + $0x72c] ss:$48 sps:$4 sm:$0xff]   ;;  %v6897_v45 = vld [vmem:[#allocation8 + $0x2b0] ss:$48 sps:$4 sm:$0xff]   ;;  %v6905_v57 = vld [vmem:[#allocation8 + $0x314] ss:$48 sps:$4 sm:$0xff]  }
 0x1dd   :  { %v6870_v59 = vld [vmem:[#allocation8 + $0x728] ss:$48 sps:$4 sm:$0xff]   ;;  %v6878_v26 = vld [vmem:[#allocation8 + $0x78c] ss:$48 sps:$4 sm:$0xff]   ;;  %v6903_v61 = vld [vmem:[#allocation8 + $0x310] ss:$48 sps:$4 sm:$0xff]  }
 0x1de   :  { %4910 = vmatpush1.bf16.msra.mxu1 %v6825_v55  ;;  %4879 = vmatmul.mubr.bf16.vlgmr.msra.gmra.mrb[4].mxu0 %v8659_v32  ;;  %v6911_v21 = vld [vmem:[#allocation8 + $0x374] ss:$48 sps:$4 sm:$0xff]   ;;  %v6876_v15 = vld [vmem:[#allocation8 + $0x788] ss:$48 sps:$4 sm:$0xff]   ;;  %v6884_v50 = vld [vmem:[#allocation8 + $0x7ec] ss:$48 sps:$4 sm:$0xff]  }
 0x1df   :  { %4911 = vmatprep.subr.bf16.mxu1 %v6833_v63  ;;  %5011 = vmatpush1.bf16.msra.mxu0 %v6855_v51  ;;  %v6909_v37 = vld [vmem:[#allocation8 + $0x370] ss:$48 sps:$4 sm:$0xff]   ;;  %v6917_v62 = vld [vmem:[#allocation8 + $0x3d4] ss:$48 sps:$4 sm:$0xff]   ;;  %v6882_v7 = vld [vmem:[#allocation8 + $0x7e8] ss:$48 sps:$4 sm:$0xff]  }
 0x1e0   :  { %5042 = vmatprep.mubr.bf16.mxu0 %v8475_v49  ;;  %5012 = vmatprep.subr.bf16.mxu0 %v6863_v13  ;;  %v6890_v2 = vld [vmem:[#allocation8 + $0x84c] ss:$48 sps:$4 sm:$0xff]   ;;  %v6915_v29 = vld [vmem:[#allocation8 + $0x3d0] ss:$48 sps:$4 sm:$0xff]   ;;  %v6923_v44 = vld [vmem:[#allocation8 + $0x434] ss:$48 sps:$4 sm:$0xff]  }
 0x1e1   :  { %v6888_v9 = vld [vmem:[#allocation8 + $0x848] ss:$48 sps:$4 sm:$0xff]   ;;  %v6896_v34 = vld [vmem:[#allocation8 + $0x8ac] ss:$48 sps:$4 sm:$0xff]   ;;  %v6921_v19 = vld [vmem:[#allocation8 + $0x430] ss:$48 sps:$4 sm:$0xff]  }
 0x1e2   :  { %4912 = vmatpush1.bf16.msra.mxu1 %v6831_v17  ;;  %v6929_v5 = vld [vmem:[#allocation8 + $0x494] ss:$48 sps:$4 sm:$0xff]   ;;  %v6894_v35 = vld [vmem:[#allocation8 + $0x8a8] ss:$48 sps:$4 sm:$0xff]   ;;  %v6902_v40 = vld [vmem:[#allocation8 + $0x90c] ss:$48 sps:$4 sm:$0xff]  }
 0x1e3   :  { %4913 = vmatprep.subr.bf16.mxu1 %v6839_v39  ;;  %5013 = vmatpush1.bf16.msra.mxu0 %v6861_v54  ;;  %v6927_v8 = vld [vmem:[#allocation8 + $0x490] ss:$48 sps:$4 sm:$0xff]   ;;  %v6935_v60 = vld [vmem:[#allocation8 + $0x4f4] ss:$48 sps:$4 sm:$0xff]   ;;  %v6900_v53 = vld [vmem:[#allocation8 + $0x908] ss:$48 sps:$4 sm:$0xff]  }
 0x1e4   :  { %5014 = vmatprep.subr.bf16.mxu0 %v6869_v30  ;;  %v6908_v25 = vld [vmem:[#allocation8 + $0x96c] ss:$48 sps:$4 sm:$0xff]   ;;  %v6933_v46 = vld [vmem:[#allocation8 + $0x4f0] ss:$48 sps:$4 sm:$0xff]   ;;  %v6941_v47 = vld [vmem:[#allocation8 + $0x554] ss:$48 sps:$4 sm:$0xff]  }
 0x1e5   :  { %v6906_v55 = vld [vmem:[#allocation8 + $0x968] ss:$48 sps:$4 sm:$0xff]   ;;  %v6914_v56 = vld [vmem:[#allocation8 + $0x9cc] ss:$48 sps:$4 sm:$0xff]   ;;  %v6939_v36 = vld [vmem:[#allocation8 + $0x550] ss:$48 sps:$4 sm:$0xff]  }
 0x1e6   :  { %4914 = vmatpush1.bf16.msra.mxu1 %v6837_v16  ;;  %v6947_v63 = vld [vmem:[#allocation8 + $0x5b4] ss:$48 sps:$4 sm:$0xff]   ;;  %v6912_v51 = vld [vmem:[#allocation8 + $0x9c8] ss:$48 sps:$4 sm:$0xff]   ;;  %v6920_v13 = vld [vmem:[#allocation8 + $0xa2c] ss:$48 sps:$4 sm:$0xff]  }
 0x1e7   :  { %4915 = vmatprep.subr.bf16.mxu1 %v6845_v28  ;;  %5015 = vmatpush1.bf16.msra.mxu0 %v6867_v41  ;;  %v6945_v17 = vld [vmem:[#allocation8 + $0x5b0] ss:$48 sps:$4 sm:$0xff]   ;;  %v6953_v39 = vld [vmem:[#allocation8 + $0x614] ss:$48 sps:$4 sm:$0xff]   ;;  %v6918_v54 = vld [vmem:[#allocation8 + $0xa28] ss:$48 sps:$4 sm:$0xff]  }
 0x1e8   :  { %5016 = vmatprep.subr.bf16.mxu0 %v6875_v4  ;;  %v6926_v30 = vld [vmem:[#allocation8 + $0xa8c] ss:$48 sps:$4 sm:$0xff]   ;;  %v6951_v16 = vld [vmem:[#allocation8 + $0x610] ss:$48 sps:$4 sm:$0xff]   ;;  %v6959_v28 = vld [vmem:[#allocation8 + $0x674] ss:$48 sps:$4 sm:$0xff]  }
 0x1e9   :  { %v6924_v41 = vld [vmem:[#allocation8 + $0xa88] ss:$48 sps:$4 sm:$0xff]   ;;  %v6932_v4 = vld [vmem:[#allocation8 + $0xaec] ss:$48 sps:$4 sm:$0xff]  }
 0x1ea   :  { %4916 = vmatpush1.bf16.msra.mxu1 %v6843_v3  ;;  %v6957_v3 = vld [vmem:[#allocation8 + $0x670] ss:$48 sps:$4 sm:$0xff]  }
 0x1eb   :  { %4917 = vmatprep.subr.bf16.mxu1 %v6851_v11  ;;  %5017 = vmatpush1.bf16.msra.mxu0 %v6873_v0  ;;  %v6965_v11 = vld [vmem:[#allocation8 + $0x6d4] ss:$48 sps:$4 sm:$0xff]   ;;  %v6930_v0 = vld [vmem:[#allocation8 + $0xae8] ss:$48 sps:$4 sm:$0xff]  }
 0x1ec   :  { %5018 = vmatprep.subr.bf16.mxu0 %v6881_v14  ;;  %v6938_v14 = vld [vmem:[#allocation8 + $0xb4c] ss:$48 sps:$4 sm:$0xff]  }
 0x1ee   :  { %4918 = vmatpush1.bf16.msra.mxu1 %v6849_v42  ;;  %v6963_v42 = vld [vmem:[#allocation8 + $0x6d0] ss:$48 sps:$4 sm:$0xff]  }
 0x1ef   :  { %4928 = vmatprep.subr.bf16.mxu1 %v6854_v1  ;;  %5019 = vmatpush1.bf16.msra.mxu0 %v6879_v18  ;;  %v6971_v1 = vld [vmem:[#allocation8 + $0x734] ss:$48 sps:$4 sm:$0xff]   ;;  %v6936_v18 = vld [vmem:[#allocation8 + $0xb48] ss:$48 sps:$4 sm:$0xff]  }
 0x1f0   :  { %5020 = vmatprep.subr.bf16.mxu0 %v6887_v12  ;;  %v6944_v12 = vld [vmem:[#allocation8 + $0xbac] ss:$48 sps:$4 sm:$0xff]  }
 0x1f1   :  { %4920 = vmatmul.mubr.bf16.vlgmr.msra.gmra.mrb[4].mxu1 %v8534_v48 }
 0x1f2   :  { %4929 = vmatpush1.bf16.msra.mxu1 %v6852_v33  ;;  %4960 = vmatprep.mubr.bf16.mxu1 %v8496_v6  ;;  %v6969_v33 = vld [vmem:[#allocation8 + $0x730] ss:$48 sps:$4 sm:$0xff]  }
 0x1f3   :  { %4930 = vmatprep.subr.bf16.mxu1 %v6860_v22  ;;  %5021 = vmatpush1.bf16.msra.mxu0 %v6885_v58  ;;  %v6977_v22 = vld [vmem:[#allocation8 + $0x794] ss:$48 sps:$4 sm:$0xff]   ;;  %v6942_v58 = vld [vmem:[#allocation8 + $0xba8] ss:$48 sps:$4 sm:$0xff]  }
 0x1f4   :  { %5022 = vmatprep.subr.bf16.mxu0 %v6893_v27  ;;  %v6950_v27 = vld [vmem:[#allocation8 + $0xc0c] ss:$48 sps:$4 sm:$0xff]  }
 0x1f6   :  { %4931 = vmatpush1.bf16.msra.mxu1 %v6858_v20  ;;  %v6975_v20 = vld [vmem:[#allocation8 + $0x790] ss:$48 sps:$4 sm:$0xff]  }
 0x1f7   :  { %4932 = vmatprep.subr.bf16.mxu1 %v6866_v31  ;;  %5023 = vmatpush1.bf16.msra.mxu0 %v6891_v52  ;;  %v6983_v31 = vld [vmem:[#allocation8 + $0x7f4] ss:$48 sps:$4 sm:$0xff]   ;;  %v6948_v52 = vld [vmem:[#allocation8 + $0xc08] ss:$48 sps:$4 sm:$0xff]  }
 0x1f8   :  { %5024 = vmatprep.subr.bf16.mxu0 %v6899_v24  ;;  %v6956_v24 = vld [vmem:[#allocation8 + $0xc6c] ss:$48 sps:$4 sm:$0xff]  }
 0x1fa   :  { %4933 = vmatpush1.bf16.msra.mxu1 %v6864_v10  ;;  %v6981_v10 = vld [vmem:[#allocation8 + $0x7f0] ss:$48 sps:$4 sm:$0xff]  }
 0x1fb   :  { %4934 = vmatprep.subr.bf16.mxu1 %v6872_v38  ;;  %5025 = vmatpush1.bf16.msra.mxu0 %v6897_v45  ;;  %v6989_v38 = vld [vmem:[#allocation8 + $0x854] ss:$48 sps:$4 sm:$0xff]   ;;  %v6954_v45 = vld [vmem:[#allocation8 + $0xc68] ss:$48 sps:$4 sm:$0xff]  }
 0x1fc   :  { %5026 = vmatprep.subr.bf16.mxu0 %v6905_v57  ;;  %v6962_v57 = vld [vmem:[#allocation8 + $0xccc] ss:$48 sps:$4 sm:$0xff]  }
 0x1fe   :  { %4935 = vmatpush1.bf16.msra.mxu1 %v6870_v59  ;;  %v6987_v59 = vld [vmem:[#allocation8 + $0x850] ss:$48 sps:$4 sm:$0xff]  }
 0x1ff   :  { %4936 = vmatprep.subr.bf16.mxu1 %v6878_v26  ;;  %5027 = vmatpush1.bf16.msra.mxu0 %v6903_v61  ;;  %v6995_v26 = vld [vmem:[#allocation8 + $0x8b4] ss:$48 sps:$4 sm:$0xff]   ;;  %v6960_v61 = vld [vmem:[#allocation8 + $0xcc8] ss:$48 sps:$4 sm:$0xff]  }
 0x200   :  { %5028 = vmatprep.subr.bf16.mxu0 %v6911_v21  ;;  %v6968_v21 = vld [vmem:[#allocation8 + $0xd2c] ss:$48 sps:$4 sm:$0xff]  }
 0x202   :  { %4937 = vmatpush1.bf16.msra.mxu1 %v6876_v15  ;;  %v6993_v15 = vld [vmem:[#allocation8 + $0x8b0] ss:$48 sps:$4 sm:$0xff]  }
 0x203   :  { %4938 = vmatprep.subr.bf16.mxu1 %v6884_v50  ;;  %5029 = vmatpush1.bf16.msra.mxu0 %v6909_v37  ;;  %v7001_v50 = vld [vmem:[#allocation8 + $0x914] ss:$48 sps:$4 sm:$0xff]   ;;  %v6966_v37 = vld [vmem:[#allocation8 + $0xd28] ss:$48 sps:$4 sm:$0xff]  }
 0x204   :  { %5030 = vmatprep.subr.bf16.mxu0 %v6917_v62  ;;  %v6974_v62 = vld [vmem:[#allocation8 + $0xd8c] ss:$48 sps:$4 sm:$0xff]  }
 0x206   :  { %4939 = vmatpush1.bf16.msra.mxu1 %v6882_v7  ;;  %v6999_v7 = vld [vmem:[#allocation8 + $0x910] ss:$48 sps:$4 sm:$0xff]  }
 0x207   :  { %4940 = vmatprep.subr.bf16.mxu1 %v6890_v2  ;;  %5031 = vmatpush1.bf16.msra.mxu0 %v6915_v29  ;;  %v7007_v2 = vld [vmem:[#allocation8 + $0x974] ss:$48 sps:$4 sm:$0xff]   ;;  %v6972_v29 = vld [vmem:[#allocation8 + $0xd88] ss:$48 sps:$4 sm:$0xff]  }
 0x208   :  { %5032 = vmatprep.subr.bf16.mxu0 %v6923_v44  ;;  %v6980_v44 = vld [vmem:[#allocation8 + $0xdec] ss:$48 sps:$4 sm:$0xff]  }
 0x20a   :  { %4941 = vmatpush1.bf16.msra.mxu1 %v6888_v9  ;;  %v7005_v9 = vld [vmem:[#allocation8 + $0x970] ss:$48 sps:$4 sm:$0xff]  }
 0x20b   :  { %4942 = vmatprep.subr.bf16.mxu1 %v6896_v34  ;;  %5033 = vmatpush1.bf16.msra.mxu0 %v6921_v19  ;;  %v7013_v34 = vld [vmem:[#allocation8 + $0x9d4] ss:$48 sps:$4 sm:$0xff]   ;;  %v6978_v19 = vld [vmem:[#allocation8 + $0xde8] ss:$48 sps:$4 sm:$0xff]  }
 0x20c   :  { %5034 = vmatprep.subr.bf16.mxu0 %v6929_v5  ;;  %v6986_v5 = vld [vmem:[#allocation8 + $0xe4c] ss:$48 sps:$4 sm:$0xff]  }
 0x20e   :  { %4943 = vmatpush1.bf16.msra.mxu1 %v6894_v35  ;;  %v7011_v35 = vld [vmem:[#allocation8 + $0x9d0] ss:$48 sps:$4 sm:$0xff]  }
 0x20f   :  { %4944 = vmatprep.subr.bf16.mxu1 %v6902_v40  ;;  %5035 = vmatpush1.bf16.msra.mxu0 %v6927_v8  ;;  %v7019_v40 = vld [vmem:[#allocation8 + $0xa34] ss:$48 sps:$4 sm:$0xff]   ;;  %v6984_v8 = vld [vmem:[#allocation8 + $0xe48] ss:$48 sps:$4 sm:$0xff]  }
 0x210   :  { %5036 = vmatprep.subr.bf16.mxu0 %v6935_v60  ;;  %v6992_v60 = vld [vmem:[#allocation8 + $0xeac] ss:$48 sps:$4 sm:$0xff]  }
 0x212   :  { %4945 = vmatpush1.bf16.msra.mxu1 %v6900_v53  ;;  %v7017_v53 = vld [vmem:[#allocation8 + $0xa30] ss:$48 sps:$4 sm:$0xff]  }
 0x213   :  { %4946 = vmatprep.subr.bf16.mxu1 %v6908_v25  ;;  %5037 = vmatpush1.bf16.msra.mxu0 %v6933_v46  ;;  %v7025_v25 = vld [vmem:[#allocation8 + $0xa94] ss:$48 sps:$4 sm:$0xff]   ;;  %v6990_v46 = vld [vmem:[#allocation8 + $0xea8] ss:$48 sps:$4 sm:$0xff]  }
 0x214   :  { %5038 = vmatprep.subr.bf16.mxu0 %v6941_v47  ;;  %v6998_v47 = vld [vmem:[#allocation8 + $0xf0c] ss:$48 sps:$4 sm:$0xff]  }
 0x216   :  { %4947 = vmatpush1.bf16.msra.mxu1 %v6906_v55  ;;  %v7023_v55 = vld [vmem:[#allocation8 + $0xa90] ss:$48 sps:$4 sm:$0xff]  }
 0x217   :  { %4948 = vmatprep.subr.bf16.mxu1 %v6914_v56  ;;  %5039 = vmatpush1.bf16.msra.mxu0 %v6939_v36  ;;  %v7031_v56 = vld [vmem:[#allocation8 + $0xaf4] ss:$48 sps:$4 sm:$0xff]   ;;  %v6996_v36 = vld [vmem:[#allocation8 + $0xf08] ss:$48 sps:$4 sm:$0xff]  }
 0x218   :  { %5040 = vmatprep.subr.bf16.mxu0 %v6947_v63  ;;  %v7004_v63 = vld [vmem:[#allocation8 + $0xf6c] ss:$48 sps:$4 sm:$0xff]  }
 0x21a   :  { %4949 = vmatpush1.bf16.msra.mxu1 %v6912_v51  ;;  %v7029_v51 = vld [vmem:[#allocation8 + $0xaf0] ss:$48 sps:$4 sm:$0xff]  }
 0x21b   :  { %4950 = vmatprep.subr.bf16.mxu1 %v6920_v13  ;;  %5041 = vmatpush1.bf16.msra.mxu0 %v6945_v17  ;;  %v7037_v13 = vld [vmem:[#allocation8 + $0xb54] ss:$48 sps:$4 sm:$0xff]   ;;  %v7002_v17 = vld [vmem:[#allocation8 + $0xf68] ss:$48 sps:$4 sm:$0xff]  }
 0x21c   :  { %5051 = vmatprep.subr.bf16.mxu0 %v6953_v39  ;;  %v7010_v39 = vld [vmem:[#allocation8 + $0xfcc] ss:$48 sps:$4 sm:$0xff]  }
 0x21e   :  { %4951 = vmatpush1.bf16.msra.mxu1 %v6918_v54  ;;  %5043 = vmatmul.mubr.bf16.vlgmr.msra.gmra.mrb[8].mxu0 %v8534_v48  ;;  %v7035_v54 = vld [vmem:[#allocation8 + $0xb50] ss:$48 sps:$4 sm:$0xff]  }
 0x21f   :  { %4952 = vmatprep.subr.bf16.mxu1 %v6926_v30  ;;  %5052 = vmatpush1.bf16.msra.mxu0 %v6951_v16  ;;  %v7043_v30 = vld [vmem:[#allocation8 + $0xbb4] ss:$48 sps:$4 sm:$0xff]   ;;  %v7008_v16 = vld [vmem:[#allocation8 + $0xfc8] ss:$48 sps:$4 sm:$0xff]  }
 0x220   :  { %5083 = vmatprep.mubr.bf16.mxu0 %v8496_v6  ;;  %5053 = vmatprep.subr.bf16.mxu0 %v6959_v28  ;;  %v7016_v28 = vld [vmem:[#allocation8 + $0x102c] ss:$48 sps:$4 sm:$0xff]  }
 0x222   :  { %4953 = vmatpush1.bf16.msra.mxu1 %v6924_v41  ;;  %v7041_v41 = vld [vmem:[#allocation8 + $0xbb0] ss:$48 sps:$4 sm:$0xff]  }
 0x223   :  { %4954 = vmatprep.subr.bf16.mxu1 %v6932_v4  ;;  %5054 = vmatpush1.bf16.msra.mxu0 %v6957_v3  ;;  %v7046_v4 = vld [vmem:[#allocation8 + $0xc14] ss:$48 sps:$4 sm:$0xff]   ;;  %v7014_v3 = vld [vmem:[#allocation8 + $0x1028] ss:$48 sps:$4 sm:$0xff]  }
 0x224   :  { %5055 = vmatprep.subr.bf16.mxu0 %v6965_v11  ;;  %v7022_v11 = vld [vmem:[#allocation8 + $0x108c] ss:$48 sps:$4 sm:$0xff]  }
 0x226   :  { %4955 = vmatpush1.bf16.msra.mxu1 %v6930_v0  ;;  %v7044_v0 = vld [vmem:[#allocation8 + $0xc10] ss:$48 sps:$4 sm:$0xff]  }
 0x227   :  { %4956 = vmatprep.subr.bf16.mxu1 %v6938_v14  ;;  %5056 = vmatpush1.bf16.msra.mxu0 %v6963_v42  ;;  %v7052_v14 = vld [vmem:[#allocation8 + $0xc74] ss:$48 sps:$4 sm:$0xff]   ;;  %v7020_v42 = vld [vmem:[#allocation8 + $0x1088] ss:$48 sps:$4 sm:$0xff]  }
 0x228   :  { %5057 = vmatprep.subr.bf16.mxu0 %v6971_v1  ;;  %v7028_v1 = vld [vmem:[#allocation8 + $0x10ec] ss:$48 sps:$4 sm:$0xff]  }
 0x22a   :  { %4957 = vmatpush1.bf16.msra.mxu1 %v6936_v18  ;;  %v7050_v18 = vld [vmem:[#allocation8 + $0xc70] ss:$48 sps:$4 sm:$0xff]  }
 0x22b   :  { %4958 = vmatprep.subr.bf16.mxu1 %v6944_v12  ;;  %5058 = vmatpush1.bf16.msra.mxu0 %v6969_v33  ;;  %v7058_v12 = vld [vmem:[#allocation8 + $0xcd4] ss:$48 sps:$4 sm:$0xff]   ;;  %v7026_v33 = vld [vmem:[#allocation8 + $0x10e8] ss:$48 sps:$4 sm:$0xff]  }
 0x22c   :  { %5059 = vmatprep.subr.bf16.mxu0 %v6977_v22  ;;  %v7034_v22 = vld [vmem:[#allocation8 + $0x114c] ss:$48 sps:$4 sm:$0xff]  }
 0x22e   :  { %4959 = vmatpush1.bf16.msra.mxu1 %v6942_v58  ;;  %v7056_v58 = vld [vmem:[#allocation8 + $0xcd0] ss:$48 sps:$4 sm:$0xff]  }
 0x22f   :  { %4969 = vmatprep.subr.bf16.mxu1 %v6950_v27  ;;  %5060 = vmatpush1.bf16.msra.mxu0 %v6975_v20  ;;  %v7064_v27 = vld [vmem:[#allocation8 + $0xd34] ss:$48 sps:$4 sm:$0xff]   ;;  %v7032_v20 = vld [vmem:[#allocation8 + $0x1148] ss:$48 sps:$4 sm:$0xff]  }
 0x230   :  { %5061 = vmatprep.subr.bf16.mxu0 %v6983_v31  ;;  %v7040_v31 = vld [vmem:[#allocation8 + $0x11ac] ss:$48 sps:$4 sm:$0xff]  }
 0x231   :  { %4961 = vmatmul.mubr.bf16.vlgmr.msra.gmra.mrb[4].mxu1 %v8588_v23 }
 0x232   :  { %4970 = vmatpush1.bf16.msra.mxu1 %v6948_v52  ;;  %5001 = vmatprep.mubr.bf16.mxu1 %v8627_v43  ;;  %v7062_v52 = vld [vmem:[#allocation8 + $0xd30] ss:$48 sps:$4 sm:$0xff]  }
 0x233   :  { %4971 = vmatprep.subr.bf16.mxu1 %v6956_v24  ;;  %5062 = vmatpush1.bf16.msra.mxu0 %v6981_v10  ;;  %v7070_v24 = vld [vmem:[#allocation8 + $0xd94] ss:$48 sps:$4 sm:$0xff]   ;;  %v7038_v10 = vld [vmem:[#allocation8 + $0x11a8] ss:$48 sps:$4 sm:$0xff]  }
 0x234   :  { %5063 = vmatprep.subr.bf16.mxu0 %v6989_v38  ;;  %v7049_v38 = vld [vmem:[#allocation8 + $0x1c] ss:$48 sps:$4 sm:$0xff]  }
 0x236   :  { %4972 = vmatpush1.bf16.msra.mxu1 %v6954_v45  ;;  %v7068_v45 = vld [vmem:[#allocation8 + $0xd90] ss:$48 sps:$4 sm:$0xff]  }
 0x237   :  { %4973 = vmatprep.subr.bf16.mxu1 %v6962_v57  ;;  %5064 = vmatpush1.bf16.msra.mxu0 %v6987_v59  ;;  %v7076_v57 = vld [vmem:[#allocation8 + $0xdf4] ss:$48 sps:$4 sm:$0xff]   ;;  %v7047_v59 = vld [vmem:[#allocation8 + $0x18] ss:$48 sps:$4 sm:$0xff]  }
 0x238   :  { %5065 = vmatprep.subr.bf16.mxu0 %v6995_v26  ;;  %v7055_v26 = vld [vmem:[#allocation8 + $0x7c] ss:$48 sps:$4 sm:$0xff]  }
 0x23a   :  { %4974 = vmatpush1.bf16.msra.mxu1 %v6960_v61 }
 0x23b   :  { %4975 = vmatprep.subr.bf16.mxu1 %v6968_v21  ;;  %5066 = vmatpush1.bf16.msra.mxu0 %v6993_v15  ;;  %v7074_v21 = vld [vmem:[#allocation8 + $0xdf0] ss:$48 sps:$4 sm:$0xff]  }
 0x23c   :  { %5067 = vmatprep.subr.bf16.mxu0 %v7001_v50  ;;  %v7082_v50 = vld [vmem:[#allocation8 + $0xe54] ss:$48 sps:$4 sm:$0xff]  }
 0x23e   :  { %4976 = vmatpush1.bf16.msra.mxu1 %v6966_v37  ;;  %v7053_v37 = vld [vmem:[#allocation8 + $0x78] ss:$48 sps:$4 sm:$0xff]  }
 0x23f   :  { %4977 = vmatprep.subr.bf16.mxu1 %v6974_v62  ;;  %5068 = vmatpush1.bf16.msra.mxu0 %v6999_v7  ;;  %v7061_v7 = vld [vmem:[#allocation8 + $0xdc] ss:$48 sps:$4 sm:$0xff]  }
 0x240   :  { %5069 = vmatprep.subr.bf16.mxu0 %v7007_v2 }
 0x242   :  { %4978 = vmatpush1.bf16.msra.mxu1 %v6972_v29  ;;  %v7080_v29 = vld [vmem:[#allocation8 + $0xe50] ss:$48 sps:$4 sm:$0xff]  }
 0x243   :  { %4979 = vmatprep.subr.bf16.mxu1 %v6980_v44  ;;  %5070 = vmatpush1.bf16.msra.mxu0 %v7005_v9  ;;  %v7088_v44 = vld [vmem:[#allocation8 + $0xeb4] ss:$48 sps:$4 sm:$0xff]   ;;  %v7059_v9 = vld [vmem:[#allocation8 + $0xd8] ss:$48 sps:$4 sm:$0xff]  }
 0x244   :  { %5071 = vmatprep.subr.bf16.mxu0 %v7013_v34  ;;  %v7067_v34 = vld [vmem:[#allocation8 + $0x13c] ss:$48 sps:$4 sm:$0xff]  }
 0x246   :  { %4980 = vmatpush1.bf16.msra.mxu1 %v6978_v19  ;;  %v7086_v19 = vld [vmem:[#allocation8 + $0xeb0] ss:$48 sps:$4 sm:$0xff]  }
 0x247   :  { %4981 = vmatprep.subr.bf16.mxu1 %v6986_v5  ;;  %5072 = vmatpush1.bf16.msra.mxu0 %v7011_v35  ;;  %v7094_v5 = vld [vmem:[#allocation8 + $0xf14] ss:$48 sps:$4 sm:$0xff]   ;;  %v7065_v35 = vld [vmem:[#allocation8 + $0x138] ss:$48 sps:$4 sm:$0xff]  }
 0x248   :  { %5073 = vmatprep.subr.bf16.mxu0 %v7019_v40  ;;  %v7073_v40 = vld [vmem:[#allocation8 + $0x19c] ss:$48 sps:$4 sm:$0xff]  }
 0x24a   :  { %4982 = vmatpush1.bf16.msra.mxu1 %v6984_v8  ;;  %v7092_v8 = vld [vmem:[#allocation8 + $0xf10] ss:$48 sps:$4 sm:$0xff]  }
 0x24b   :  { %4983 = vmatprep.subr.bf16.mxu1 %v6992_v60  ;;  %5074 = vmatpush1.bf16.msra.mxu0 %v7017_v53  ;;  %v7100_v60 = vld [vmem:[#allocation8 + $0xf74] ss:$48 sps:$4 sm:$0xff]   ;;  %v7071_v53 = vld [vmem:[#allocation8 + $0x198] ss:$48 sps:$4 sm:$0xff]  }
 0x24c   :  { %5075 = vmatprep.subr.bf16.mxu0 %v7025_v25  ;;  %v7079_v25 = vld [vmem:[#allocation8 + $0x1fc] ss:$48 sps:$4 sm:$0xff]  }
 0x24e   :  { %4984 = vmatpush1.bf16.msra.mxu1 %v6990_v46  ;;  %v7098_v46 = vld [vmem:[#allocation8 + $0xf70] ss:$48 sps:$4 sm:$0xff]  }
 0x24f   :  { %4985 = vmatprep.subr.bf16.mxu1 %v6998_v47  ;;  %5076 = vmatpush1.bf16.msra.mxu0 %v7023_v55  ;;  %v7106_v47 = vld [vmem:[#allocation8 + $0xfd4] ss:$48 sps:$4 sm:$0xff]   ;;  %v7077_v55 = vld [vmem:[#allocation8 + $0x1f8] ss:$48 sps:$4 sm:$0xff]  }
 0x250   :  { %5077 = vmatprep.subr.bf16.mxu0 %v7031_v56  ;;  %v7085_v56 = vld [vmem:[#allocation8 + $0x25c] ss:$48 sps:$4 sm:$0xff]  }
 0x252   :  { %4986 = vmatpush1.bf16.msra.mxu1 %v6996_v36 }
 0x253   :  { %4987 = vmatprep.subr.bf16.mxu1 %v7004_v63  ;;  %5078 = vmatpush1.bf16.msra.mxu0 %v7029_v51  ;;  %v7104_v63 = vld [vmem:[#allocation8 + $0xfd0] ss:$48 sps:$4 sm:$0xff]  }
 0x254   :  { %5079 = vmatprep.subr.bf16.mxu0 %v7037_v13 }
 0x256   :  { %4988 = vmatpush1.bf16.msra.mxu1 %v7002_v17  ;;  %v7112_v17 = vld [vmem:[#allocation8 + $0x1034] ss:$48 sps:$4 sm:$0xff]  }
 0x257   :  { %4989 = vmatprep.subr.bf16.mxu1 %v7010_v39  ;;  %5080 = vmatpush1.bf16.msra.mxu0 %v7035_v54  ;;  %v7083_v54 = vld [vmem:[#allocation8 + $0x258] ss:$48 sps:$4 sm:$0xff]  }
 0x258   :  { %5081 = vmatprep.subr.bf16.mxu0 %v7043_v30 }
 0x25a   :  { %4990 = vmatpush1.bf16.msra.mxu1 %v7008_v16  ;;  %v7091_v16 = vld [vmem:[#allocation8 + $0x2bc] ss:$48 sps:$4 sm:$0xff]  }
 0x25b   :  { %4991 = vmatprep.subr.bf16.mxu1 %v7016_v28  ;;  %5082 = vmatpush1.bf16.msra.mxu0 %v7041_v41  ;;  %v7110_v41 = vld [vmem:[#allocation8 + $0x1030] ss:$48 sps:$4 sm:$0xff]  }
 0x25c   :  { %5092 = vmatprep.subr.bf16.mxu0 %v7046_v4  ;;  %v7118_v4 = vld [vmem:[#allocation8 + $0x1094] ss:$48 sps:$4 sm:$0xff]  }
 0x25e   :  { %4992 = vmatpush1.bf16.msra.mxu1 %v7014_v3  ;;  %5084 = vmatmul.mubr.bf16.vlgmr.msra.gmra.mrb[12].mxu0 %v8588_v23  ;;  %v7089_v3 = vld [vmem:[#allocation8 + $0x2b8] ss:$48 sps:$4 sm:$0xff]  }
 0x25f   :  { %4993 = vmatprep.subr.bf16.mxu1 %v7022_v11  ;;  %5093 = vmatpush1.bf16.msra.mxu0 %v7044_v0  ;;  %v7097_v11 = vld [vmem:[#allocation8 + $0x31c] ss:$48 sps:$4 sm:$0xff]   ;;  %v7116_v0 = vld [vmem:[#allocation8 + $0x1090] ss:$48 sps:$4 sm:$0xff]  }
 0x260   :  { %5124 = vmatprep.mubr.bf16.mxu0 %v8627_v43  ;;  %5094 = vmatprep.subr.bf16.mxu0 %v7052_v14  ;;  %v7124_v14 = vld [vmem:[#allocation8 + $0x10f4] ss:$48 sps:$4 sm:$0xff]  }
 0x262   :  { %4994 = vmatpush1.bf16.msra.mxu1 %v7020_v42  ;;  %v7095_v42 = vld [vmem:[#allocation8 + $0x318] ss:$48 sps:$4 sm:$0xff]  }
 0x263   :  { %4995 = vmatprep.subr.bf16.mxu1 %v7028_v1  ;;  %5095 = vmatpush1.bf16.msra.mxu0 %v7050_v18  ;;  %v7103_v1 = vld [vmem:[#allocation8 + $0x37c] ss:$48 sps:$4 sm:$0xff]   ;;  %v7122_v18 = vld [vmem:[#allocation8 + $0x10f0] ss:$48 sps:$4 sm:$0xff]  }
 0x264   :  { %5096 = vmatprep.subr.bf16.mxu0 %v7058_v12  ;;  %v7130_v12 = vld [vmem:[#allocation8 + $0x1154] ss:$48 sps:$4 sm:$0xff]  }
 0x266   :  { %4996 = vmatpush1.bf16.msra.mxu1 %v7026_v33  ;;  %v7101_v33 = vld [vmem:[#allocation8 + $0x378] ss:$48 sps:$4 sm:$0xff]  }
 0x267   :  { %4997 = vmatprep.subr.bf16.mxu1 %v7034_v22  ;;  %5097 = vmatpush1.bf16.msra.mxu0 %v7056_v58  ;;  %v7109_v22 = vld [vmem:[#allocation8 + $0x3dc] ss:$48 sps:$4 sm:$0xff]   ;;  %v7128_v58 = vld [vmem:[#allocation8 + $0x1150] ss:$48 sps:$4 sm:$0xff]  }
 0x268   :  { %5098 = vmatprep.subr.bf16.mxu0 %v7064_v27  ;;  %v7136_v27 = vld [vmem:[#allocation8 + $0x11b4] ss:$48 sps:$4 sm:$0xff]  }
 0x26a   :  { %4998 = vmatpush1.bf16.msra.mxu1 %v7032_v20  ;;  %v7107_v20 = vld [vmem:[#allocation8 + $0x3d8] ss:$48 sps:$4 sm:$0xff]  }
 0x26b   :  { %4999 = vmatprep.subr.bf16.mxu1 %v7040_v31  ;;  %5099 = vmatpush1.bf16.msra.mxu0 %v7062_v52  ;;  %v7115_v31 = vld [vmem:[#allocation8 + $0x43c] ss:$48 sps:$4 sm:$0xff]   ;;  %v7134_v52 = vld [vmem:[#allocation8 + $0x11b0] ss:$48 sps:$4 sm:$0xff]  }
 0x26c   :  { %5100 = vmatprep.subr.bf16.mxu0 %v7070_v24  ;;  %v7145_v24 = vld [vmem:[#allocation8 + $0x24] ss:$48 sps:$4 sm:$0xff]  }
 0x26e   :  { %5000 = vmatpush1.bf16.msra.mxu1 %v7038_v10  ;;  %v7113_v10 = vld [vmem:[#allocation8 + $0x438] ss:$48 sps:$4 sm:$0xff]  }
 0x26f   :  { %5133 = vmatprep.subr.bf16.mxu1 %v7049_v38  ;;  %5101 = vmatpush1.bf16.msra.mxu0 %v7068_v45  ;;  %v7121_v38 = vld [vmem:[#allocation8 + $0x49c] ss:$48 sps:$4 sm:$0xff]   ;;  %v7143_v45 = vld [vmem:[#allocation8 + $0x20] ss:$48 sps:$4 sm:$0xff]  }
 0x270   :  { %v4798_v61 = vpop.f32.mrb[0].mxu0  ;;  %5102 = vmatprep.subr.bf16.mxu0 %v7076_v57  ;;  %v7151_v57 = vld [vmem:[#allocation8 + $0x84] ss:$48 sps:$4 sm:$0xff]  }
 0x271   :  { %5002 = vmatmul.mubr.bf16.vlgmr.msra.gmra.mrb[4].mxu1 %v8659_v32  ;;  %v4800_v15 = vpop.f32.mrb[1].mxu0 }
 0x272   :  { %5134 = vmatpush1.bf16.msra.mxu1 %v7047_v59  ;;  %5165 = vmatprep.mubr.bf16.mxu1 %v8475_v49  ;;  %v4801_v62 = vpop.f32.mrb[2].mxu0  ;;  %v7119_v59 = vld [vmem:[#allocation8 + $0x498] ss:$48 sps:$4 sm:$0xff]  }
 0x273   :  { %5135 = vmatprep.subr.bf16.mxu1 %v7055_v26  ;;  %v4802_v2 = vpop.f32.mrb[3].mxu0  ;;  %5103 = vmatpush1.bf16.msra.mxu0 %v7074_v21  ;;  %v7127_v26 = vld [vmem:[#allocation8 + $0x4fc] ss:$48 sps:$4 sm:$0xff]   ;;  %v7157_v21 = vld [vmem:[#allocation8 + $0xe4] ss:$48 sps:$4 sm:$0xff]  }
 0x274   :  { %5104 = vmatprep.subr.bf16.mxu0 %v7082_v50  ;;  %v7125_v15 = vld [vmem:[#allocation8 + $0x4f8] ss:$48 sps:$4 sm:$0xff]   ;;  %v7133_v50 = vld [vmem:[#allocation8 + $0x55c] ss:$48 sps:$4 sm:$0xff]   ;;  %v7163_v62 = vld [vmem:[#allocation8 + $0x144] ss:$48 sps:$4 sm:$0xff]  }
 0x276   :  { %5136 = vmatpush1.bf16.msra.mxu1 %v7053_v37  ;;  %v7155_v37 = vld [vmem:[#allocation8 + $0xe0] ss:$48 sps:$4 sm:$0xff]  }
 0x277   :  { %5137 = vmatprep.subr.bf16.mxu1 %v7061_v7  ;;  %5105 = vmatpush1.bf16.msra.mxu0 %v7080_v29  ;;  %v7131_v7 = vld [vmem:[#allocation8 + $0x558] ss:$48 sps:$4 sm:$0xff]   ;;  %v7161_v29 = vld [vmem:[#allocation8 + $0x140] ss:$48 sps:$4 sm:$0xff]  }
 0x278   :  { %5106 = vmatprep.subr.bf16.mxu0 %v7088_v44  ;;  %v7169_v44 = vld [vmem:[#allocation8 + $0x1a4] ss:$48 sps:$4 sm:$0xff]  }
 0x27a   :  { %5138 = vmatpush1.bf16.msra.mxu1 %v7059_v9  ;;  %v7137_v9 = vld [vmem:[#allocation8 + $0x5b8] ss:$48 sps:$4 sm:$0xff]  }
 0x27b   :  { %5139 = vmatprep.subr.bf16.mxu1 %v7067_v34  ;;  %5107 = vmatpush1.bf16.msra.mxu0 %v7086_v19  ;;  %v7142_v34 = vld [vmem:[#allocation8 + $0x61c] ss:$48 sps:$4 sm:$0xff]   ;;  %v7167_v19 = vld [vmem:[#allocation8 + $0x1a0] ss:$48 sps:$4 sm:$0xff]  }
 0x27c   :  { %5108 = vmatprep.subr.bf16.mxu0 %v7094_v5  ;;  %v7175_v5 = vld [vmem:[#allocation8 + $0x204] ss:$48 sps:$4 sm:$0xff]  }
 0x27e   :  { %5140 = vmatpush1.bf16.msra.mxu1 %v7065_v35  ;;  %v7140_v35 = vld [vmem:[#allocation8 + $0x618] ss:$48 sps:$4 sm:$0xff]  }
 0x27f   :  { %5141 = vmatprep.subr.bf16.mxu1 %v7073_v40  ;;  %5109 = vmatpush1.bf16.msra.mxu0 %v7092_v8  ;;  %v7148_v40 = vld [vmem:[#allocation8 + $0x67c] ss:$48 sps:$4 sm:$0xff]   ;;  %v7173_v8 = vld [vmem:[#allocation8 + $0x200] ss:$48 sps:$4 sm:$0xff]  }
 0x280   :  { %5110 = vmatprep.subr.bf16.mxu0 %v7100_v60  ;;  %v7181_v60 = vld [vmem:[#allocation8 + $0x264] ss:$48 sps:$4 sm:$0xff]  }
 0x282   :  { %5142 = vmatpush1.bf16.msra.mxu1 %v7071_v53  ;;  %v7146_v53 = vld [vmem:[#allocation8 + $0x678] ss:$48 sps:$4 sm:$0xff]  }
 0x283   :  { %5143 = vmatprep.subr.bf16.mxu1 %v7079_v25  ;;  %5111 = vmatpush1.bf16.msra.mxu0 %v7098_v46  ;;  %v6571_v46 = vld [vmem:[#allocation11] ss:$0 sm:$0xff] }
 0x284   :  { %v4839_v36 = vpop.f32.mrb[0].mxu1  ;;  %5112 = vmatprep.subr.bf16.mxu0 %v7106_v47  ;;  %v7154_v47 = vld [vmem:[#allocation8 + $0x6dc] ss:$48 sps:$4 sm:$0xff]  }
 0x285   :  { %v8673_v51 = vadd.f32 %v4839_v36, %v4798_v61  ;;  %v4841_v13 = vpop.f32.mrb[1].mxu1  ;;  %v7149_v61 = vld [vmem:[#allocation8 + $0x80] ss:$48 sps:$4 sm:$0xff]  }
 0x286   :  { %5144 = vmatpush1.bf16.msra.mxu1 %v7077_v55  ;;  %v4842_v39 = vpop.f32.mrb[2].mxu1 }
 0x287   :  { %v4843_v30 = vpop.f32.mrb[3].mxu1  ;;  %5145 = vmatprep.subr.bf16.mxu1 %v7085_v56  ;;  %5113 = vmatpush1.bf16.msra.mxu0 %v7104_v63  ;;  %v7179_v63 = vld [vmem:[#allocation8 + $0x260] ss:$48 sps:$4 sm:$0xff]  }
 0x288   :  { %v8675_v28 = vadd.f32 %v4843_v30, %v4802_v2  ;;  %5114 = vmatprep.subr.bf16.mxu0 %v7112_v17  ;;  %v7139_v2 = vld [vmem:[#allocation8 + $0x5bc] ss:$48 sps:$4 sm:$0xff]   ;;  %v6572_v39 = vld [vmem:[#allocation11 + $0x1] ss:$0 sm:$0xff]  ;;  %v7152_v30 = vld [vmem:[#allocation8 + $0x6d8] ss:$48 sps:$4 sm:$0xff]  }
 0x28a   :  { %5146 = vmatpush1.bf16.msra.mxu1 %v7083_v54  ;;  %v7187_v54 = vld [vmem:[#allocation8 + $0x2c4] ss:$48 sps:$4 sm:$0xff]  }
 0x28b   :  { %5147 = vmatprep.subr.bf16.mxu1 %v7091_v16  ;;  %5115 = vmatpush1.bf16.msra.mxu0 %v7110_v41  ;;  %v7160_v41 = vld [vmem:[#allocation8 + $0x73c] ss:$48 sps:$4 sm:$0xff]  }
 0x28c   :  { %5116 = vmatprep.subr.bf16.mxu0 %v7118_v4 }
 0x28e   :  { %5148 = vmatpush1.bf16.msra.mxu1 %v7089_v3  ;;  %v7193_v3 = vld [vmem:[#allocation8 + $0x324] ss:$48 sps:$4 sm:$0xff]  }
 0x28f   :  { %5149 = vmatprep.subr.bf16.mxu1 %v7097_v11  ;;  %5117 = vmatpush1.bf16.msra.mxu0 %v7116_v0  ;;  %v7158_v11 = vld [vmem:[#allocation8 + $0x738] ss:$48 sps:$4 sm:$0xff]  }
 0x290   :  { %5118 = vmatprep.subr.bf16.mxu0 %v7124_v14  ;;  %v7191_v14 = vld [vmem:[#allocation8 + $0x320] ss:$48 sps:$4 sm:$0xff]  }
 0x292   :  { %5150 = vmatpush1.bf16.msra.mxu1 %v7095_v42  ;;  %v7199_v42 = vld [vmem:[#allocation8 + $0x384] ss:$48 sps:$4 sm:$0xff]  }
 0x293   :  { %5151 = vmatprep.subr.bf16.mxu1 %v7103_v1  ;;  %5119 = vmatpush1.bf16.msra.mxu0 %v7122_v18  ;;  %v7164_v1 = vld [vmem:[#allocation8 + $0x798] ss:$48 sps:$4 sm:$0xff]  }
 0x294   :  { %5120 = vmatprep.subr.bf16.mxu0 %v7130_v12  ;;  %v7172_v12 = vld [vmem:[#allocation8 + $0x7fc] ss:$48 sps:$4 sm:$0xff]  }
 0x296   :  { %5152 = vmatpush1.bf16.msra.mxu1 %v7101_v33  ;;  %v7197_v33 = vld [vmem:[#allocation8 + $0x380] ss:$48 sps:$4 sm:$0xff]  }
 0x297   :  { %5153 = vmatprep.subr.bf16.mxu1 %v7109_v22  ;;  %5121 = vmatpush1.bf16.msra.mxu0 %v7128_v58  ;;  %v7205_v22 = vld [vmem:[#allocation8 + $0x3e4] ss:$48 sps:$4 sm:$0xff]   ;;  %v7170_v58 = vld [vmem:[#allocation8 + $0x7f8] ss:$48 sps:$4 sm:$0xff]  }
 0x298   :  { %5122 = vmatprep.subr.bf16.mxu0 %v7136_v27  ;;  %v7178_v27 = vld [vmem:[#allocation8 + $0x85c] ss:$48 sps:$4 sm:$0xff]  }
 0x29a   :  { %5154 = vmatpush1.bf16.msra.mxu1 %v7107_v20  ;;  %v7203_v20 = vld [vmem:[#allocation8 + $0x3e0] ss:$48 sps:$4 sm:$0xff]  }
 0x29b   :  { %5155 = vmatprep.subr.bf16.mxu1 %v7115_v31  ;;  %5123 = vmatpush1.bf16.msra.mxu0 %v7134_v52  ;;  %v7211_v31 = vld [vmem:[#allocation8 + $0x444] ss:$48 sps:$4 sm:$0xff]   ;;  %v7176_v52 = vld [vmem:[#allocation8 + $0x858] ss:$48 sps:$4 sm:$0xff]  }
 0x29c   :  { %5256 = vmatprep.subr.bf16.mxu0 %v7145_v24  ;;  %v7184_v24 = vld [vmem:[#allocation8 + $0x8bc] ss:$48 sps:$4 sm:$0xff]  }
 0x29e   :  { %5156 = vmatpush1.bf16.msra.mxu1 %v7113_v10  ;;  %5125 = vmatmul.mubr.bf16.vlgmr.msra.gmra.mrb[16].mxu0 %v8659_v32  ;;  %v7209_v10 = vld [vmem:[#allocation8 + $0x440] ss:$48 sps:$4 sm:$0xff]  }
 0x29f   :  { %5157 = vmatprep.subr.bf16.mxu1 %v7121_v38  ;;  %5257 = vmatpush1.bf16.msra.mxu0 %v7143_v45  ;;  %v7217_v38 = vld [vmem:[#allocation8 + $0x4a4] ss:$48 sps:$4 sm:$0xff]   ;;  %v7182_v45 = vld [vmem:[#allocation8 + $0x8b8] ss:$48 sps:$4 sm:$0xff]  }
 0x2a0   :  { %5288 = vmatprep.mubr.bf16.mxu0 %v8475_v49  ;;  %5258 = vmatprep.subr.bf16.mxu0 %v7151_v57  ;;  %v7190_v57 = vld [vmem:[#allocation8 + $0x91c] ss:$48 sps:$4 sm:$0xff]  }
 0x2a2   :  { %5158 = vmatpush1.bf16.msra.mxu1 %v7119_v59  ;;  %v7215_v59 = vld [vmem:[#allocation8 + $0x4a0] ss:$48 sps:$4 sm:$0xff]  }
 0x2a3   :  { %5159 = vmatprep.subr.bf16.mxu1 %v7127_v26  ;;  %5259 = vmatpush1.bf16.msra.mxu0 %v7149_v61  ;;  %v7223_v26 = vld [vmem:[#allocation8 + $0x504] ss:$48 sps:$4 sm:$0xff]   ;;  %v7188_v61 = vld [vmem:[#allocation8 + $0x918] ss:$48 sps:$4 sm:$0xff]  }
 0x2a4   :  { %5260 = vmatprep.subr.bf16.mxu0 %v7157_v21  ;;  %v7196_v21 = vld [vmem:[#allocation8 + $0x97c] ss:$48 sps:$4 sm:$0xff]  }
 0x2a6   :  { %5160 = vmatpush1.bf16.msra.mxu1 %v7125_v15  ;;  %v7221_v15 = vld [vmem:[#allocation8 + $0x500] ss:$48 sps:$4 sm:$0xff]  }
 0x2a7   :  { %5161 = vmatprep.subr.bf16.mxu1 %v7133_v50  ;;  %5261 = vmatpush1.bf16.msra.mxu0 %v7155_v37  ;;  %v7229_v50 = vld [vmem:[#allocation8 + $0x564] ss:$48 sps:$4 sm:$0xff]   ;;  %v7194_v37 = vld [vmem:[#allocation8 + $0x978] ss:$48 sps:$4 sm:$0xff]  }
 0x2a8   :  { %5262 = vmatprep.subr.bf16.mxu0 %v7163_v62  ;;  %v7202_v62 = vld [vmem:[#allocation8 + $0x9dc] ss:$48 sps:$4 sm:$0xff]  }
 0x2aa   :  { %5162 = vmatpush1.bf16.msra.mxu1 %v7131_v7  ;;  %v7227_v7 = vld [vmem:[#allocation8 + $0x560] ss:$48 sps:$4 sm:$0xff]  }
 0x2ab   :  { %5163 = vmatprep.subr.bf16.mxu1 %v7139_v2  ;;  %5263 = vmatpush1.bf16.msra.mxu0 %v7161_v29  ;;  %v7235_v2 = vld [vmem:[#allocation8 + $0x5c4] ss:$48 sps:$4 sm:$0xff]   ;;  %v7200_v29 = vld [vmem:[#allocation8 + $0x9d8] ss:$48 sps:$4 sm:$0xff]  }
 0x2ac   :  { %5264 = vmatprep.subr.bf16.mxu0 %v7169_v44  ;;  %v7208_v44 = vld [vmem:[#allocation8 + $0xa3c] ss:$48 sps:$4 sm:$0xff]  }
 0x2ae   :  { %5164 = vmatpush1.bf16.msra.mxu1 %v7137_v9  ;;  %v7233_v9 = vld [vmem:[#allocation8 + $0x5c0] ss:$48 sps:$4 sm:$0xff]  }
 0x2af   :  { %5174 = vmatprep.subr.bf16.mxu1 %v7142_v34  ;;  %5265 = vmatpush1.bf16.msra.mxu0 %v7167_v19  ;;  %v7241_v34 = vld [vmem:[#allocation8 + $0x624] ss:$48 sps:$4 sm:$0xff]   ;;  %v7206_v19 = vld [vmem:[#allocation8 + $0xa38] ss:$48 sps:$4 sm:$0xff]  }
 0x2b0   :  { %5266 = vmatprep.subr.bf16.mxu0 %v7175_v5  ;;  %v7214_v5 = vld [vmem:[#allocation8 + $0xa9c] ss:$48 sps:$4 sm:$0xff]  }
 0x2b1   :  { %5166 = vmatmul.mubr.bf16.vlgmr.msra.gmra.mrb[8].mxu1 %v8534_v48  ;;  %v4880_v25 = vpop.f32.mrb[4].mxu0 }
 0x2b2   :  { %5175 = vmatpush1.bf16.msra.mxu1 %v7140_v35  ;;  %5206 = vmatprep.mubr.bf16.mxu1 %v8496_v6  ;;  %v4881_v55 = vadd.f32 %v4880_v25, %v8673_v51  ;;  %v4882_v56 = vpop.f32.mrb[5].mxu0  ;;  %v7185_v51 = vld [vmem:[#allocation8 + $0x2c0] ss:$48 sps:$4 sm:$0xff]   ;;  %v7253_v25 = vld [vmem:[#allocation8 + $0x6e4] ss:$48 sps:$4 sm:$0xff]  }
 0x2b3   :  { %5176 = vmatprep.subr.bf16.mxu1 %v7148_v40  ;;  %v4883_v36 = vpop.f32.mrb[6].mxu0  ;;  %5267 = vmatpush1.bf16.msra.mxu0 %v7173_v8  ;;  %v7239_v35 = vld [vmem:[#allocation8 + $0x620] ss:$48 sps:$4 sm:$0xff]   ;;  %v7247_v40 = vld [vmem:[#allocation8 + $0x684] ss:$48 sps:$4 sm:$0xff]  }
 0x2b4   :  { %v8682_v13 = vadd.f32 %v6571_v46, %v4881_v55  ;;  %v4884_v17 = vpop.f32.mrb[7].mxu0  ;;  %5268 = vmatprep.subr.bf16.mxu0 %v7181_v60  ;;  %v7212_v8 = vld [vmem:[#allocation8 + $0xa98] ss:$48 sps:$4 sm:$0xff]   ;;  %v7220_v60 = vld [vmem:[#allocation8 + $0xafc] ss:$48 sps:$4 sm:$0xff]  }
 0x2b5   :  { %v4885_v16 = vadd.f32 %v4884_v17, %v8675_v28  ;;  %v7166_v28 = vld [vmem:[#allocation8 + $0x79c] ss:$48 sps:$4 sm:$0xff]   ;;  %v7218_v46 = vld [vmem:[#allocation8 + $0xaf8] ss:$48 sps:$4 sm:$0xff]   ;;  %v7251_v55 = vld [vmem:[#allocation8 + $0x6e0] ss:$48 sps:$4 sm:$0xff]  }
 0x2b6   :  { %5177 = vmatpush1.bf16.msra.mxu1 %v7146_v53  ;;  %5974 = vst [vmem:[#allocation14 + $0x30] sm:$0xff] %v8682_v13  ;;  %v5522_v18 = vsel %vm5521_vm7, %v8682_v13, -inf  ;;  %v7245_v53 = vld [vmem:[#allocation8 + $0x680] ss:$48 sps:$4 sm:$0xff]   ;;  %v7259_v56 = vld [vmem:[#allocation8 + $0x744] ss:$48 sps:$4 sm:$0xff]  }
 0x2b7   :  { %5178 = vmatprep.subr.bf16.mxu1 %v7154_v47  ;;  %v8686_v4 = vadd.f32 %v6572_v39, %v4885_v16  ;;  %5269 = vmatpush1.bf16.msra.mxu0 %v7179_v63  ;;  %v7226_v47 = vld [vmem:[#allocation8 + $0xb5c] ss:$48 sps:$4 sm:$0xff]   ;;  %v7224_v36 = vld [vmem:[#allocation8 + $0xb58] ss:$48 sps:$4 sm:$0xff]   ;;  %v7257_v17 = vld [vmem:[#allocation8 + $0x740] ss:$48 sps:$4 sm:$0xff]  }
 0x2b8   :  { %5270 = vmatprep.subr.bf16.mxu0 %v7187_v54  ;;  %v7232_v63 = vld [vmem:[#allocation8 + $0xbbc] ss:$48 sps:$4 sm:$0xff]   ;;  %v7265_v39 = vld [vmem:[#allocation8 + $0x7a4] ss:$48 sps:$4 sm:$0xff]   ;;  %v7230_v54 = vld [vmem:[#allocation8 + $0xbb8] ss:$48 sps:$4 sm:$0xff]  }
 0x2b9   :  { %5975 = vst [vmem:[#allocation14 + $0x38] sm:$0xff] %v8686_v4  ;;  %v5533_v0 = vsel %vm5521_vm7, %v8686_v4, -inf  ;;  %v7263_v16 = vld [vmem:[#allocation8 + $0x7a0] ss:$48 sps:$4 sm:$0xff]  }
 0x2ba   :  { %5179 = vmatpush1.bf16.msra.mxu1 %v7152_v30  ;;  %5534 = vmax.xlane.f32.xlu0 %v5533_v0  ;;  %v7238_v30 = vld [vmem:[#allocation8 + $0xc1c] ss:$48 sps:$4 sm:$0xff]   ;;  %v7277_v0 = vld [vmem:[#allocation8 + $0x864] ss:$48 sps:$4 sm:$0xff]  }
 0x2bb   :  { %5180 = vmatprep.subr.bf16.mxu1 %v7160_v41  ;;  %5271 = vmatpush1.bf16.msra.mxu0 %v7185_v51  ;;  %v7271_v41 = vld [vmem:[#allocation8 + $0x804] ss:$48 sps:$4 sm:$0xff]   ;;  %v7236_v51 = vld [vmem:[#allocation8 + $0xc18] ss:$48 sps:$4 sm:$0xff]  }
 0x2bc   :  { %5272 = vmatprep.subr.bf16.mxu0 %v7193_v3  ;;  %v7244_v3 = vld [vmem:[#allocation8 + $0xc7c] ss:$48 sps:$4 sm:$0xff]  }
 0x2be   :  { %5181 = vmatpush1.bf16.msra.mxu1 %v7158_v11  ;;  %5523 = vmax.xlane.f32.xlu0 %v5522_v18  ;;  %v7269_v11 = vld [vmem:[#allocation8 + $0x800] ss:$48 sps:$4 sm:$0xff]  }
 0x2bf   :  { %5182 = vmatprep.subr.bf16.mxu1 %v7166_v28  ;;  %5273 = vmatpush1.bf16.msra.mxu0 %v7191_v14  ;;  %v7242_v28 = vld [vmem:[#allocation8 + $0xc78] ss:$48 sps:$4 sm:$0xff]  }
 0x2c0   :  { %5274 = vmatprep.subr.bf16.mxu0 %v7199_v42  ;;  %v7250_v42 = vld [vmem:[#allocation8 + $0xcdc] ss:$48 sps:$4 sm:$0xff]  }
 0x2c2   :  { %5183 = vmatpush1.bf16.msra.mxu1 %v7164_v1 }
 0x2c3   :  { %5184 = vmatprep.subr.bf16.mxu1 %v7172_v12  ;;  %5275 = vmatpush1.bf16.msra.mxu0 %v7197_v33  ;;  %v7275_v12 = vld [vmem:[#allocation8 + $0x860] ss:$48 sps:$4 sm:$0xff]  }
 0x2c4   :  { %5276 = vmatprep.subr.bf16.mxu0 %v7205_v22  ;;  %v7283_v22 = vld [vmem:[#allocation8 + $0x8c4] ss:$48 sps:$4 sm:$0xff]  }
 0x2c6   :  { %5185 = vmatpush1.bf16.msra.mxu1 %v7170_v58  ;;  %v7248_v58 = vld [vmem:[#allocation8 + $0xcd8] ss:$48 sps:$4 sm:$0xff]  }
 0x2c7   :  { %5186 = vmatprep.subr.bf16.mxu1 %v7178_v27  ;;  %5277 = vmatpush1.bf16.msra.mxu0 %v7203_v20  ;;  %v7256_v27 = vld [vmem:[#allocation8 + $0xd3c] ss:$48 sps:$4 sm:$0xff]   ;;  %v7281_v20 = vld [vmem:[#allocation8 + $0x8c0] ss:$48 sps:$4 sm:$0xff]  }
 0x2c8   :  { %5278 = vmatprep.subr.bf16.mxu0 %v7211_v31  ;;  %v7289_v31 = vld [vmem:[#allocation8 + $0x924] ss:$48 sps:$4 sm:$0xff]  }
 0x2ca   :  { %5187 = vmatpush1.bf16.msra.mxu1 %v7176_v52  ;;  %v7254_v52 = vld [vmem:[#allocation8 + $0xd38] ss:$48 sps:$4 sm:$0xff]  }
 0x2cb   :  { %5188 = vmatprep.subr.bf16.mxu1 %v7184_v24  ;;  %5279 = vmatpush1.bf16.msra.mxu0 %v7209_v10  ;;  %v7262_v24 = vld [vmem:[#allocation8 + $0xd9c] ss:$48 sps:$4 sm:$0xff]   ;;  %v7287_v10 = vld [vmem:[#allocation8 + $0x920] ss:$48 sps:$4 sm:$0xff]  }
 0x2cc   :  { %5280 = vmatprep.subr.bf16.mxu0 %v7217_v38  ;;  %v7295_v38 = vld [vmem:[#allocation8 + $0x984] ss:$48 sps:$4 sm:$0xff]  }
 0x2ce   :  { %5189 = vmatpush1.bf16.msra.mxu1 %v7182_v45  ;;  %v7260_v45 = vld [vmem:[#allocation8 + $0xd98] ss:$48 sps:$4 sm:$0xff]  }
 0x2cf   :  { %5190 = vmatprep.subr.bf16.mxu1 %v7190_v57  ;;  %5281 = vmatpush1.bf16.msra.mxu0 %v7215_v59  ;;  %v7268_v57 = vld [vmem:[#allocation8 + $0xdfc] ss:$48 sps:$4 sm:$0xff]   ;;  %v7293_v59 = vld [vmem:[#allocation8 + $0x980] ss:$48 sps:$4 sm:$0xff]  }
 0x2d0   :  { %5282 = vmatprep.subr.bf16.mxu0 %v7223_v26  ;;  %v7301_v26 = vld [vmem:[#allocation8 + $0x9e4] ss:$48 sps:$4 sm:$0xff]  }
 0x2d2   :  { %5191 = vmatpush1.bf16.msra.mxu1 %v7188_v61  ;;  %v7266_v61 = vld [vmem:[#allocation8 + $0xdf8] ss:$48 sps:$4 sm:$0xff]  }
 0x2d3   :  { %5192 = vmatprep.subr.bf16.mxu1 %v7196_v21  ;;  %5283 = vmatpush1.bf16.msra.mxu0 %v7221_v15  ;;  %v7274_v21 = vld [vmem:[#allocation8 + $0xe5c] ss:$48 sps:$4 sm:$0xff]   ;;  %v7299_v15 = vld [vmem:[#allocation8 + $0x9e0] ss:$48 sps:$4 sm:$0xff]  }
 0x2d4   :  { %5284 = vmatprep.subr.bf16.mxu0 %v7229_v50  ;;  %v7307_v50 = vld [vmem:[#allocation8 + $0xa44] ss:$48 sps:$4 sm:$0xff]  }
 0x2d6   :  { %5193 = vmatpush1.bf16.msra.mxu1 %v7194_v37  ;;  %v7272_v37 = vld [vmem:[#allocation8 + $0xe58] ss:$48 sps:$4 sm:$0xff]  }
 0x2d7   :  { %5194 = vmatprep.subr.bf16.mxu1 %v7202_v62  ;;  %5285 = vmatpush1.bf16.msra.mxu0 %v7227_v7  ;;  %v7280_v62 = vld [vmem:[#allocation8 + $0xebc] ss:$48 sps:$4 sm:$0xff]   ;;  %v7305_v7 = vld [vmem:[#allocation8 + $0xa40] ss:$48 sps:$4 sm:$0xff]  }
 0x2d8   :  { %5286 = vmatprep.subr.bf16.mxu0 %v7235_v2  ;;  %v7313_v2 = vld [vmem:[#allocation8 + $0xaa4] ss:$48 sps:$4 sm:$0xff]  }
 0x2da   :  { %5195 = vmatpush1.bf16.msra.mxu1 %v7200_v29  ;;  %v7278_v29 = vld [vmem:[#allocation8 + $0xeb8] ss:$48 sps:$4 sm:$0xff]  }
 0x2db   :  { %5196 = vmatprep.subr.bf16.mxu1 %v7208_v44  ;;  %5287 = vmatpush1.bf16.msra.mxu0 %v7233_v9  ;;  %v7286_v44 = vld [vmem:[#allocation8 + $0xf1c] ss:$48 sps:$4 sm:$0xff]   ;;  %v7311_v9 = vld [vmem:[#allocation8 + $0xaa0] ss:$48 sps:$4 sm:$0xff]  }
 0x2dc   :  { %5297 = vmatprep.subr.bf16.mxu0 %v7241_v34  ;;  %v7319_v34 = vld [vmem:[#allocation8 + $0xb04] ss:$48 sps:$4 sm:$0xff]  }
 0x2de   :  { %5197 = vmatpush1.bf16.msra.mxu1 %v7206_v19  ;;  %5289 = vmatmul.mubr.bf16.vlgmr.msra.gmra.mrb[20].mxu0 %v8534_v48  ;;  %v7284_v19 = vld [vmem:[#allocation8 + $0xf18] ss:$48 sps:$4 sm:$0xff]  }
 0x2df   :  { %5198 = vmatprep.subr.bf16.mxu1 %v7214_v5  ;;  %5298 = vmatpush1.bf16.msra.mxu0 %v7239_v35  ;;  %v7292_v5 = vld [vmem:[#allocation8 + $0xf7c] ss:$48 sps:$4 sm:$0xff]   ;;  %v7317_v35 = vld [vmem:[#allocation8 + $0xb00] ss:$48 sps:$4 sm:$0xff]  }
 0x2e0   :  { %5329 = vmatprep.mubr.bf16.mxu0 %v8496_v6  ;;  %5299 = vmatprep.subr.bf16.mxu0 %v7247_v40  ;;  %v7325_v40 = vld [vmem:[#allocation8 + $0xb64] ss:$48 sps:$4 sm:$0xff]  }
 0x2e2   :  { %5199 = vmatpush1.bf16.msra.mxu1 %v7212_v8  ;;  %v7290_v8 = vld [vmem:[#allocation8 + $0xf78] ss:$48 sps:$4 sm:$0xff]  }
 0x2e3   :  { %5200 = vmatprep.subr.bf16.mxu1 %v7220_v60  ;;  %5300 = vmatpush1.bf16.msra.mxu0 %v7245_v53  ;;  %v7298_v60 = vld [vmem:[#allocation8 + $0xfdc] ss:$48 sps:$4 sm:$0xff]   ;;  %v7323_v53 = vld [vmem:[#allocation8 + $0xb60] ss:$48 sps:$4 sm:$0xff]  }
 0x2e4   :  { %5301 = vmatprep.subr.bf16.mxu0 %v7253_v25  ;;  %v7331_v25 = vld [vmem:[#allocation8 + $0xbc4] ss:$48 sps:$4 sm:$0xff]  }
 0x2e6   :  { %5201 = vmatpush1.bf16.msra.mxu1 %v7218_v46  ;;  %v7296_v46 = vld [vmem:[#allocation8 + $0xfd8] ss:$48 sps:$4 sm:$0xff]  }
 0x2e7   :  { %5202 = vmatprep.subr.bf16.mxu1 %v7226_v47  ;;  %5302 = vmatpush1.bf16.msra.mxu0 %v7251_v55  ;;  %v7304_v47 = vld [vmem:[#allocation8 + $0x103c] ss:$48 sps:$4 sm:$0xff]   ;;  %v7329_v55 = vld [vmem:[#allocation8 + $0xbc0] ss:$48 sps:$4 sm:$0xff]  }
 0x2e8   :  { %5303 = vmatprep.subr.bf16.mxu0 %v7259_v56  ;;  %v7334_v56 = vld [vmem:[#allocation8 + $0xc24] ss:$48 sps:$4 sm:$0xff]  }
 0x2ea   :  { %5203 = vmatpush1.bf16.msra.mxu1 %v7224_v36  ;;  %v7302_v36 = vld [vmem:[#allocation8 + $0x1038] ss:$48 sps:$4 sm:$0xff]  }
 0x2eb   :  { %5204 = vmatprep.subr.bf16.mxu1 %v7232_v63  ;;  %5304 = vmatpush1.bf16.msra.mxu0 %v7257_v17  ;;  %v7310_v63 = vld [vmem:[#allocation8 + $0x109c] ss:$48 sps:$4 sm:$0xff]   ;;  %v7332_v17 = vld [vmem:[#allocation8 + $0xc20] ss:$48 sps:$4 sm:$0xff]  }
 0x2ec   :  { %5305 = vmatprep.subr.bf16.mxu0 %v7265_v39  ;;  %v7340_v39 = vld [vmem:[#allocation8 + $0xc84] ss:$48 sps:$4 sm:$0xff]  }
 0x2ee   :  { %5205 = vmatpush1.bf16.msra.mxu1 %v7230_v54  ;;  %v7308_v54 = vld [vmem:[#allocation8 + $0x1098] ss:$48 sps:$4 sm:$0xff]  }
 0x2ef   :  { %5215 = vmatprep.subr.bf16.mxu1 %v7238_v30  ;;  %5306 = vmatpush1.bf16.msra.mxu0 %v7263_v16  ;;  %v7316_v30 = vld [vmem:[#allocation8 + $0x10fc] ss:$48 sps:$4 sm:$0xff]   ;;  %v7338_v16 = vld [vmem:[#allocation8 + $0xc80] ss:$48 sps:$4 sm:$0xff]  }
 0x2f0   :  { %5307 = vmatprep.subr.bf16.mxu0 %v7271_v41  ;;  %v7346_v41 = vld [vmem:[#allocation8 + $0xce4] ss:$48 sps:$4 sm:$0xff]  }
 0x2f1   :  { %5207 = vmatmul.mubr.bf16.vlgmr.msra.gmra.mrb[8].mxu1 %v8588_v23  ;;  %v8697_v14 = vpop.f32.mrb[8].mxu0 }
 0x2f2   :  { %5216 = vmatpush1.bf16.msra.mxu1 %v7236_v51  ;;  %5247 = vmatprep.mubr.bf16.mxu1 %v8627_v43  ;;  %v8699_v1 = vpop.f32.mrb[9].mxu0  ;;  %v7314_v51 = vld [vmem:[#allocation8 + $0x10f8] ss:$48 sps:$4 sm:$0xff]  }
 0x2f3   :  { %5217 = vmatprep.subr.bf16.mxu1 %v7244_v3  ;;  %v5048_v18 = vpop.f32.mrb[10].mxu0  ;;  %5308 = vmatpush1.bf16.msra.mxu0 %v7269_v11  ;;  %v7322_v3 = vld [vmem:[#allocation8 + $0x115c] ss:$48 sps:$4 sm:$0xff]   ;;  %v7344_v11 = vld [vmem:[#allocation8 + $0xce0] ss:$48 sps:$4 sm:$0xff]  }
 0x2f4   :  { %v5049_v33 = vpop.f32.mrb[11].mxu0  ;;  %5309 = vmatprep.subr.bf16.mxu0 %v7277_v0  ;;  %v7352_v0 = vld [vmem:[#allocation8 + $0xd44] ss:$48 sps:$4 sm:$0xff]   ;;  %v7350_v18 = vld [vmem:[#allocation8 + $0xd40] ss:$48 sps:$4 sm:$0xff]  }
 0x2f5   :  { %v7326_v33 = vld [vmem:[#allocation8 + $0x11b8] ss:$48 sps:$4 sm:$0xff]  }
 0x2f6   :  { %5218 = vmatpush1.bf16.msra.mxu1 %v7242_v28  ;;  %v7320_v28 = vld [vmem:[#allocation8 + $0x1158] ss:$48 sps:$4 sm:$0xff]  }
 0x2f7   :  { %5219 = vmatprep.subr.bf16.mxu1 %v7250_v42  ;;  %5310 = vmatpush1.bf16.msra.mxu0 %v7275_v12  ;;  %v7328_v42 = vld [vmem:[#allocation8 + $0x11bc] ss:$48 sps:$4 sm:$0xff]   ;;  %v7358_v12 = vld [vmem:[#allocation8 + $0xda4] ss:$48 sps:$4 sm:$0xff]  }
 0x2f8   :  { %5311 = vmatprep.subr.bf16.mxu0 %v7283_v22  ;;  %v7337_v22 = vld [vmem:[#allocation8 + $0x2c] ss:$48 sps:$4 sm:$0xff]  }
 0x2fa   :  { %5220 = vmatpush1.bf16.msra.mxu1 %v7248_v58  ;;  %v7356_v58 = vld [vmem:[#allocation8 + $0xda0] ss:$48 sps:$4 sm:$0xff]  }
 0x2fb   :  { %5221 = vmatprep.subr.bf16.mxu1 %v7256_v27  ;;  %5312 = vmatpush1.bf16.msra.mxu0 %v7281_v20  ;;  %v7364_v27 = vld [vmem:[#allocation8 + $0xe04] ss:$48 sps:$4 sm:$0xff]   ;;  %v7335_v20 = vld [vmem:[#allocation8 + $0x28] ss:$48 sps:$4 sm:$0xff]  }
 0x2fc   :  { %5313 = vmatprep.subr.bf16.mxu0 %v7289_v31  ;;  %v7343_v31 = vld [vmem:[#allocation8 + $0x8c] ss:$48 sps:$4 sm:$0xff]  }
 0x2fe   :  { %5222 = vmatpush1.bf16.msra.mxu1 %v7254_v52  ;;  %v7362_v52 = vld [vmem:[#allocation8 + $0xe00] ss:$48 sps:$4 sm:$0xff]  }
 0x2ff   :  { %5223 = vmatprep.subr.bf16.mxu1 %v7262_v24  ;;  %5314 = vmatpush1.bf16.msra.mxu0 %v7287_v10  ;;  %v7370_v24 = vld [vmem:[#allocation8 + $0xe64] ss:$48 sps:$4 sm:$0xff]   ;;  %v7341_v10 = vld [vmem:[#allocation8 + $0x88] ss:$48 sps:$4 sm:$0xff]  }
 0x300   :  { %5315 = vmatprep.subr.bf16.mxu0 %v7295_v38 }
 0x302   :  { %5224 = vmatpush1.bf16.msra.mxu1 %v7260_v45  ;;  %v7349_v45 = vld [vmem:[#allocation8 + $0xec] ss:$48 sps:$4 sm:$0xff]  }
 0x303   :  { %5225 = vmatprep.subr.bf16.mxu1 %v7268_v57  ;;  %5316 = vmatpush1.bf16.msra.mxu0 %v7293_v59 }
 0x304   :  { %5317 = vmatprep.subr.bf16.mxu0 %v7301_v26 }
 0x306   :  { %5226 = vmatpush1.bf16.msra.mxu1 %v7266_v61 }
 0x307   :  { %5227 = vmatprep.subr.bf16.mxu1 %v7274_v21  ;;  %5318 = vmatpush1.bf16.msra.mxu0 %v7299_v15  ;;  %v7368_v21 = vld [vmem:[#allocation8 + $0xe60] ss:$48 sps:$4 sm:$0xff]  }
 0x308   :  { %5319 = vmatprep.subr.bf16.mxu0 %v7307_v50  ;;  %v7379_v50 = vld [vmem:[#allocation8 + $0xec4] ss:$48 sps:$4 sm:$0xff]  }
 0x30a   :  { %5228 = vmatpush1.bf16.msra.mxu1 %v7272_v37  ;;  %v7347_v37 = vld [vmem:[#allocation8 + $0xe8] ss:$48 sps:$4 sm:$0xff]  }
 0x30b   :  { %5229 = vmatprep.subr.bf16.mxu1 %v7280_v62  ;;  %5320 = vmatpush1.bf16.msra.mxu0 %v7305_v7  ;;  %v7377_v62 = vld [vmem:[#allocation8 + $0xec0] ss:$48 sps:$4 sm:$0xff]   ;;  %v7382_v7 = vld [vmem:[#allocation8 + $0xf24] ss:$48 sps:$4 sm:$0xff]  }
 0x30c   :  { %5321 = vmatprep.subr.bf16.mxu0 %v7313_v2  ;;  %v7361_v2 = vld [vmem:[#allocation8 + $0x1ac] ss:$48 sps:$4 sm:$0xff]  }
 0x30e   :  { %5230 = vmatpush1.bf16.msra.mxu1 %v7278_v29  ;;  %v7388_v29 = vld [vmem:[#allocation8 + $0xf84] ss:$48 sps:$4 sm:$0xff]  }
 0x30f   :  { %5231 = vmatprep.subr.bf16.mxu1 %v7286_v44  ;;  %5322 = vmatpush1.bf16.msra.mxu0 %v7311_v9  ;;  %v7359_v44 = vld [vmem:[#allocation8 + $0x1a8] ss:$48 sps:$4 sm:$0xff]   ;;  %v7367_v9 = vld [vmem:[#allocation8 + $0x20c] ss:$48 sps:$4 sm:$0xff]  }
 0x310   :  { %5323 = vmatprep.subr.bf16.mxu0 %v7319_v34  ;;  %v7386_v34 = vld [vmem:[#allocation8 + $0xf80] ss:$48 sps:$4 sm:$0xff]  }
 0x312   :  { %5232 = vmatpush1.bf16.msra.mxu1 %v7284_v19  ;;  %v7394_v19 = vld [vmem:[#allocation8 + $0xfe4] ss:$48 sps:$4 sm:$0xff]  }
 0x313   :  { %5233 = vmatprep.subr.bf16.mxu1 %v7292_v5  ;;  %5324 = vmatpush1.bf16.msra.mxu0 %v7317_v35  ;;  %v7365_v5 = vld [vmem:[#allocation8 + $0x208] ss:$48 sps:$4 sm:$0xff]   ;;  %v7373_v35 = vld [vmem:[#allocation8 + $0x26c] ss:$48 sps:$4 sm:$0xff]  }
 0x314   :  { %5325 = vmatprep.subr.bf16.mxu0 %v7325_v40 }
 0x316   :  { %5234 = vmatpush1.bf16.msra.mxu1 %v7290_v8  ;;  %v7392_v8 = vld [vmem:[#allocation8 + $0xfe0] ss:$48 sps:$4 sm:$0xff]  }
 0x317   :  { %5235 = vmatprep.subr.bf16.mxu1 %v7298_v60  ;;  %5326 = vmatpush1.bf16.msra.mxu0 %v7323_v53  ;;  %v7400_v53 = vld [vmem:[#allocation8 + $0x1044] ss:$48 sps:$4 sm:$0xff]  }
 0x318   :  { %5327 = vmatprep.subr.bf16.mxu0 %v7331_v25 }
 0x31a   :  { %5236 = vmatpush1.bf16.msra.mxu1 %v7296_v46  ;;  %v7371_v46 = vld [vmem:[#allocation8 + $0x268] ss:$48 sps:$4 sm:$0xff]  }
 0x31b   :  { %5237 = vmatprep.subr.bf16.mxu1 %v7304_v47  ;;  %5328 = vmatpush1.bf16.msra.mxu0 %v7329_v55  ;;  %v6573_v55 = vld [vmem:[#allocation11 + $0x2] ss:$0 sm:$0xff] }
 0x31c   :  { %5338 = vmatprep.subr.bf16.mxu0 %v7334_v56  ;;  %v7376_v56 = vld [vmem:[#allocation8 + $0x2cc] ss:$48 sps:$4 sm:$0xff]  }
 0x31e   :  { %5238 = vmatpush1.bf16.msra.mxu1 %v7302_v36  ;;  %5330 = vmatmul.mubr.bf16.vlgmr.msra.gmra.mrb[20].mxu0 %v8588_v23 }
 0x31f   :  { %5239 = vmatprep.subr.bf16.mxu1 %v7310_v63  ;;  %5339 = vmatpush1.bf16.msra.mxu0 %v7332_v17  ;;  %v7398_v17 = vld [vmem:[#allocation8 + $0x1040] ss:$48 sps:$4 sm:$0xff]  }
 0x320   :  { %5370 = vmatprep.mubr.bf16.mxu0 %v8627_v43  ;;  %5340 = vmatprep.subr.bf16.mxu0 %v7340_v39 }
 0x322   :  { %5240 = vmatpush1.bf16.msra.mxu1 %v7308_v54  ;;  %v7406_v54 = vld [vmem:[#allocation8 + $0x10a4] ss:$48 sps:$4 sm:$0xff]  }
 0x323   :  { %5241 = vmatprep.subr.bf16.mxu1 %v7316_v30  ;;  %5341 = vmatpush1.bf16.msra.mxu0 %v7338_v16  ;;  %v7374_v16 = vld [vmem:[#allocation8 + $0x2c8] ss:$48 sps:$4 sm:$0xff]  }
 0x324   :  { %5342 = vmatprep.subr.bf16.mxu0 %v7346_v41  ;;  %v7385_v41 = vld [vmem:[#allocation8 + $0x32c] ss:$48 sps:$4 sm:$0xff]  }
 0x326   :  { %5242 = vmatpush1.bf16.msra.mxu1 %v7314_v51 }
 0x327   :  { %5243 = vmatprep.subr.bf16.mxu1 %v7322_v3  ;;  %5343 = vmatpush1.bf16.msra.mxu0 %v7344_v11 }
 0x328   :  { %5344 = vmatprep.subr.bf16.mxu0 %v7352_v0  ;;  %v7404_v0 = vld [vmem:[#allocation8 + $0x10a0] ss:$48 sps:$4 sm:$0xff]  }
 0x32a   :  { %5244 = vmatpush1.bf16.msra.mxu1 %v7320_v28  ;;  %v7412_v28 = vld [vmem:[#allocation8 + $0x1104] ss:$48 sps:$4 sm:$0xff]  }
 0x32b   :  { %5245 = vmatprep.subr.bf16.mxu1 %v7328_v42  ;;  %5345 = vmatpush1.bf16.msra.mxu0 %v7350_v18  ;;  %v7383_v42 = vld [vmem:[#allocation8 + $0x328] ss:$48 sps:$4 sm:$0xff]   ;;  %v7391_v18 = vld [vmem:[#allocation8 + $0x38c] ss:$48 sps:$4 sm:$0xff]  }
 0x32c   :  { %5346 = vmatprep.subr.bf16.mxu0 %v7358_v12 }
 0x32e   :  { %5246 = vmatpush1.bf16.msra.mxu1 %v7326_v33  ;;  %v7410_v33 = vld [vmem:[#allocation8 + $0x1100] ss:$48 sps:$4 sm:$0xff]  }
 0x32f   :  { %5379 = vmatprep.subr.bf16.mxu1 %v7337_v22  ;;  %5347 = vmatpush1.bf16.msra.mxu0 %v7356_v58  ;;  %v7418_v22 = vld [vmem:[#allocation8 + $0x1164] ss:$48 sps:$4 sm:$0xff]   ;;  %v7389_v58 = vld [vmem:[#allocation8 + $0x388] ss:$48 sps:$4 sm:$0xff]  }
 0x330   :  { %5348 = vmatprep.subr.bf16.mxu0 %v7364_v27  ;;  %v7397_v27 = vld [vmem:[#allocation8 + $0x3ec] ss:$48 sps:$4 sm:$0xff]  }
 0x331   :  { %5248 = vmatmul.mubr.bf16.vlgmr.msra.gmra.mrb[8].mxu1 %v8659_v32  ;;  %v5085_v38 = vpop.f32.mrb[12].mxu0 }
 0x332   :  { %5380 = vmatpush1.bf16.msra.mxu1 %v7335_v20  ;;  %5411 = vmatprep.mubr.bf16.mxu1 %v8475_v49  ;;  %v8706_v57 = vadd.f32 %v5085_v38, %v8697_v14  ;;  %v5087_v59 = vpop.f32.mrb[13].mxu0  ;;  %v7355_v49 = vld [vmem:[#allocation8 + $0x14c] ss:$48 sps:$4 sm:$0xff]   ;;  %v7353_v14 = vld [vmem:[#allocation8 + $0x148] ss:$48 sps:$4 sm:$0xff]  }
 0x333   :  { %5381 = vmatprep.subr.bf16.mxu1 %v7343_v31  ;;  %v8709_v26 = vadd.f32 %v5087_v59, %v8699_v1  ;;  %v5089_v61 = vpop.f32.mrb[14].mxu0  ;;  %5349 = vmatpush1.bf16.msra.mxu0 %v7362_v52  ;;  %v7380_v1 = vld [vmem:[#allocation8 + $0xf20] ss:$48 sps:$4 sm:$0xff]   ;;  %v7395_v31 = vld [vmem:[#allocation8 + $0x3e8] ss:$48 sps:$4 sm:$0xff]  }
 0x334   :  { %v5090_v15 = vpop.f32.mrb[15].mxu0  ;;  %5350 = vmatprep.subr.bf16.mxu0 %v7370_v24  ;;  %v7416_v20 = vld [vmem:[#allocation8 + $0x1160] ss:$48 sps:$4 sm:$0xff]   ;;  %v7403_v24 = vld [vmem:[#allocation8 + $0x44c] ss:$48 sps:$4 sm:$0xff]  }
 0x335   :  { %v7422_v38 = vld [vmem:[#allocation8 + $0x11c0] ss:$48 sps:$4 sm:$0xff]   ;;  %v7409_v61 = vld [vmem:[#allocation8 + $0x4ac] ss:$48 sps:$4 sm:$0xff]   ;;  %v7407_v15 = vld [vmem:[#allocation8 + $0x4a8] ss:$48 sps:$4 sm:$0xff]  }
 0x336   :  { %5382 = vmatpush1.bf16.msra.mxu1 %v7341_v10 }
 0x337   :  { %5383 = vmatprep.subr.bf16.mxu1 %v7349_v45  ;;  %5351 = vmatpush1.bf16.msra.mxu0 %v7368_v21  ;;  %v7401_v45 = vld [vmem:[#allocation8 + $0x448] ss:$48 sps:$4 sm:$0xff]  }
 0x338   :  { %5352 = vmatprep.subr.bf16.mxu0 %v7379_v50  ;;  %v7415_v50 = vld [vmem:[#allocation8 + $0x50c] ss:$48 sps:$4 sm:$0xff]  }
 0x33a   :  { %5384 = vmatpush1.bf16.msra.mxu1 %v7347_v37  ;;  %v7413_v37 = vld [vmem:[#allocation8 + $0x508] ss:$48 sps:$4 sm:$0xff]  }
 0x33b   :  { %5385 = vmatprep.subr.bf16.mxu1 %v7355_v49  ;;  %5353 = vmatpush1.bf16.msra.mxu0 %v7377_v62  ;;  %v7421_v49 = vld [vmem:[#allocation8 + $0x56c] ss:$48 sps:$4 sm:$0xff]   ;;  %v7419_v62 = vld [vmem:[#allocation8 + $0x568] ss:$48 sps:$4 sm:$0xff]  }
 0x33c   :  { %5354 = vmatprep.subr.bf16.mxu0 %v7382_v7  ;;  %v7427_v7 = vld [vmem:[#allocation8 + $0x5cc] ss:$48 sps:$4 sm:$0xff]  }
 0x33e   :  { %5386 = vmatpush1.bf16.msra.mxu1 %v7353_v14  ;;  %v7425_v14 = vld [vmem:[#allocation8 + $0x5c8] ss:$48 sps:$4 sm:$0xff]  }
 0x33f   :  { %5387 = vmatprep.subr.bf16.mxu1 %v7361_v2  ;;  %5355 = vmatpush1.bf16.msra.mxu0 %v7380_v1  ;;  %v7430_v2 = vld [vmem:[#allocation8 + $0x62c] ss:$48 sps:$4 sm:$0xff]   ;;  %v7428_v1 = vld [vmem:[#allocation8 + $0x628] ss:$48 sps:$4 sm:$0xff]  }
 0x340   :  { %5356 = vmatprep.subr.bf16.mxu0 %v7388_v29  ;;  %v7433_v29 = vld [vmem:[#allocation8 + $0x68c] ss:$48 sps:$4 sm:$0xff]  }
 0x342   :  { %5388 = vmatpush1.bf16.msra.mxu1 %v7359_v44  ;;  %v7431_v44 = vld [vmem:[#allocation8 + $0x688] ss:$48 sps:$4 sm:$0xff]  }
 0x343   :  { %5389 = vmatprep.subr.bf16.mxu1 %v7367_v9  ;;  %5357 = vmatpush1.bf16.msra.mxu0 %v7386_v34  ;;  %v7436_v34 = vld [vmem:[#allocation8 + $0x6ec] ss:$48 sps:$4 sm:$0xff]  }
 0x344   :  { %v5003_v40 = vpop.f32.mrb[4].mxu1  ;;  %5358 = vmatprep.subr.bf16.mxu0 %v7394_v19 }
 0x345   :  { %v5005_v60 = vpop.f32.mrb[5].mxu1 }
 0x346   :  { %v5006_v25 = vpop.f32.mrb[6].mxu1  ;;  %5390 = vmatpush1.bf16.msra.mxu1 %v7365_v5  ;;  %v7434_v60 = vld [vmem:[#allocation8 + $0x6e8] ss:$48 sps:$4 sm:$0xff]  }
 0x347   :  { %v5007_v47 = vpop.f32.mrb[7].mxu1  ;;  %5391 = vmatprep.subr.bf16.mxu1 %v7373_v35  ;;  %5359 = vmatpush1.bf16.msra.mxu0 %v7392_v8  ;;  %v5535_v63 = vpop.xlane.xlu0 %5534  ;;  %v7440_v25 = vld [vmem:[#allocation8 + $0x7a8] ss:$48 sps:$4 sm:$0xff]  }
 0x348   :  { %v5514_v36 = vadd.f32 %v5007_v47, %v5003_v40  ;;  %v5536_v39 = vsub.f32 %v8686_v4, %v5535_v63  ;;  %5360 = vmatprep.subr.bf16.mxu0 %v7400_v53  ;;  %v7437_v53 = vld [vmem:[#allocation8 + $0x748] ss:$48 sps:$4 sm:$0xff]   ;;  %v7448_v47 = vld [vmem:[#allocation8 + $0x86c] ss:$48 sps:$4 sm:$0xff]  }
 0x349   :  { %v7452_v63 = vld [vmem:[#allocation8 + $0x928] ss:$48 sps:$4 sm:$0xff]  }
 0x34a   :  { %v8712_v30 = vadd.f32 %v6573_v55, %v5514_v36  ;;  %5392 = vmatpush1.bf16.msra.mxu1 %v7371_v46  ;;  %v5537_v51 = vmul.f32 1.442695, %v5536_v39  ;;  %v7445_v46 = vld [vmem:[#allocation8 + $0x80c] ss:$48 sps:$4 sm:$0xff]   ;;  %v7455_v39 = vld [vmem:[#allocation8 + $0x988] ss:$48 sps:$4 sm:$0xff]  }
 0x34b   :  { %5393 = vmatprep.subr.bf16.mxu1 %v7376_v56  ;;  %5361 = vmatpush1.bf16.msra.mxu0 %v7398_v17  ;;  %v5524_v11 = vpop.xlane.xlu0 %5523  ;;  %v7451_v55 = vld [vmem:[#allocation8 + $0x8cc] ss:$48 sps:$4 sm:$0xff]   ;;  %v7449_v56 = vld [vmem:[#allocation8 + $0x8c8] ss:$48 sps:$4 sm:$0xff]  }
 0x34c   :  { %5976 = vst [vmem:[#allocation14 + $0x40] sm:$0xff] %v8712_v30  ;;  %v5544_v3 = vsel %vm5521_vm7, %v8712_v30, -inf  ;;  %7594 = vpow2.f32 %v5537_v51  ;;  %v5525_v4 = vsub.f32 %v8682_v13, %v5524_v11  ;;  %5362 = vmatprep.subr.bf16.mxu0 %v7406_v54  ;;  %v7424_v13 = vld [vmem:[#allocation8 + $0x11c4] ss:$48 sps:$4 sm:$0xff]   ;;  %v7454_v36 = vld [vmem:[#allocation8 + $0x92c] ss:$48 sps:$4 sm:$0xff]  }
 0x34d   :  { %5545 = vmax.xlane.f32.xlu1 %v5544_v3  ;;  %v7457_v17 = vld [vmem:[#allocation8 + $0x98c] ss:$48 sps:$4 sm:$0xff]   ;;  %v7461_v51 = vld [vmem:[#allocation8 + $0xa48] ss:$48 sps:$4 sm:$0xff]  }
 0x34e   :  { %5394 = vmatpush1.bf16.msra.mxu1 %v7374_v16  ;;  %v5526_v12 = vmul.f32 1.442695, %v5525_v4  ;;  %v7460_v54 = vld [vmem:[#allocation8 + $0x9ec] ss:$48 sps:$4 sm:$0xff]   ;;  %v7458_v16 = vld [vmem:[#allocation8 + $0x9e8] ss:$48 sps:$4 sm:$0xff]  }
 0x34f   :  { %5395 = vmatprep.subr.bf16.mxu1 %v7385_v41  ;;  %5363 = vmatpush1.bf16.msra.mxu0 %v7404_v0  ;;  %v7463_v41 = vld [vmem:[#allocation8 + $0xa4c] ss:$48 sps:$4 sm:$0xff]   ;;  %v7464_v11 = vld [vmem:[#allocation8 + $0xaa8] ss:$48 sps:$4 sm:$0xff]  }
 0x350   :  { %7596 = vpow2.f32 %v5526_v12  ;;  %5364 = vmatprep.subr.bf16.mxu0 %v7412_v28  ;;  %v7466_v3 = vld [vmem:[#allocation8 + $0xaac] ss:$48 sps:$4 sm:$0xff]   ;;  %v7467_v4 = vld [vmem:[#allocation8 + $0xb08] ss:$48 sps:$4 sm:$0xff]  }
 0x351   :  { %v7469_v0 = vld [vmem:[#allocation8 + $0xb0c] ss:$48 sps:$4 sm:$0xff]   ;;  %v7473_v12 = vld [vmem:[#allocation8 + $0xbc8] ss:$48 sps:$4 sm:$0xff]  }
 0x352   :  { %5396 = vmatpush1.bf16.msra.mxu1 %v7383_v42  ;;  %v7472_v28 = vld [vmem:[#allocation8 + $0xb6c] ss:$48 sps:$4 sm:$0xff]   ;;  %v7470_v42 = vld [vmem:[#allocation8 + $0xb68] ss:$48 sps:$4 sm:$0xff]  }
 0x353   :  { %5397 = vmatprep.subr.bf16.mxu1 %v7391_v18  ;;  %5365 = vmatpush1.bf16.msra.mxu0 %v7410_v33  ;;  %v7475_v18 = vld [vmem:[#allocation8 + $0xbcc] ss:$48 sps:$4 sm:$0xff]  }
 0x354   :  { %5366 = vmatprep.subr.bf16.mxu0 %v7418_v22  ;;  %v7478_v33 = vld [vmem:[#allocation8 + $0xc2c] ss:$48 sps:$4 sm:$0xff]   ;;  %v7476_v22 = vld [vmem:[#allocation8 + $0xc28] ss:$48 sps:$4 sm:$0xff]  }
 0x356   :  { %5398 = vmatpush1.bf16.msra.mxu1 %v7389_v58  ;;  %v8718_v52 = vpop.eup %7594  ;;  %v7481_v58 = vld [vmem:[#allocation8 + $0xc8c] ss:$48 sps:$4 sm:$0xff]  }
 0x357   :  { %5399 = vmatprep.subr.bf16.mxu1 %v7397_v27  ;;  %5367 = vmatpush1.bf16.msra.mxu0 %v7416_v20  ;;  %v5539_v10 = vsel %vm5521_vm7, %v8718_v52, 0.0  ;;  %v7479_v27 = vld [vmem:[#allocation8 + $0xc88] ss:$48 sps:$4 sm:$0xff]   ;;  %v7484_v20 = vld [vmem:[#allocation8 + $0xcec] ss:$48 sps:$4 sm:$0xff]  }
 0x358   :  { %5540 = vadd.xlane.f32.xlu0 %v5539_v10  ;;  %5368 = vmatprep.subr.bf16.mxu0 %v7424_v13  ;;  %v7482_v13 = vld [vmem:[#allocation8 + $0xce8] ss:$48 sps:$4 sm:$0xff]   ;;  %v7490_v10 = vld [vmem:[#allocation8 + $0xdac] ss:$48 sps:$4 sm:$0xff]  }
 0x35a   :  { %5400 = vmatpush1.bf16.msra.mxu1 %v7395_v31  ;;  %v8722_v59 = vpop.eup %7596  ;;  %v7487_v31 = vld [vmem:[#allocation8 + $0xd4c] ss:$48 sps:$4 sm:$0xff]  }
 0x35b   :  { %5401 = vmatprep.subr.bf16.mxu1 %v7403_v24  ;;  %5369 = vmatpush1.bf16.msra.mxu0 %v7422_v38  ;;  %v5528_v21 = vsel %vm5521_vm7, %v8722_v59, 0.0  ;;  %v7485_v24 = vld [vmem:[#allocation8 + $0xd48] ss:$48 sps:$4 sm:$0xff]  }
 0x35c   :  { %5529 = vadd.xlane.f32.xlu0 %v5528_v21  ;;  %v7488_v38 = vld [vmem:[#allocation8 + $0xda8] ss:$48 sps:$4 sm:$0xff]   ;;  %v7499_v21 = vld [vmem:[#allocation8 + $0xecc] ss:$48 sps:$4 sm:$0xff]  }
 0x35e   :  { %5402 = vmatpush1.bf16.msra.mxu1 %v7401_v45  ;;  %5371 = vmatmul.mubr.bf16.vlgmr.msra.gmra.mrb[20].mxu0 %v8659_v32  ;;  %v7493_v45 = vld [vmem:[#allocation8 + $0xe0c] ss:$48 sps:$4 sm:$0xff]  }
 0x35f   :  { %5403 = vmatprep.subr.bf16.mxu1 %v7409_v61  ;;  %v7496_v61 = vld [vmem:[#allocation8 + $0xe6c] ss:$48 sps:$4 sm:$0xff]  }
 0x362   :  { %5404 = vmatpush1.bf16.msra.mxu1 %v7407_v15  ;;  %v7497_v15 = vld [vmem:[#allocation8 + $0xec8] ss:$48 sps:$4 sm:$0xff]  }
 0x363   :  { %5405 = vmatprep.subr.bf16.mxu1 %v7415_v50  ;;  %v7502_v50 = vld [vmem:[#allocation8 + $0xf2c] ss:$48 sps:$4 sm:$0xff]  }
 0x366   :  { %5406 = vmatpush1.bf16.msra.mxu1 %v7413_v37  ;;  %v7500_v37 = vld [vmem:[#allocation8 + $0xf28] ss:$48 sps:$4 sm:$0xff]  }
 0x367   :  { %5407 = vmatprep.subr.bf16.mxu1 %v7421_v49  ;;  %v7505_v49 = vld [vmem:[#allocation8 + $0xf8c] ss:$48 sps:$4 sm:$0xff]  }
 0x36a   :  { %5408 = vmatpush1.bf16.msra.mxu1 %v7419_v62  ;;  %v7503_v62 = vld [vmem:[#allocation8 + $0xf88] ss:$48 sps:$4 sm:$0xff]  }
 0x36b   :  { %5409 = vmatprep.subr.bf16.mxu1 %v7427_v7  ;;  %v7508_v7 = vld [vmem:[#allocation8 + $0xfec] ss:$48 sps:$4 sm:$0xff]  }
 0x36e   :  { %5410 = vmatpush1.bf16.msra.mxu1 %v7425_v14  ;;  %v7506_v14 = vld [vmem:[#allocation8 + $0xfe8] ss:$48 sps:$4 sm:$0xff]  }
 0x36f   :  { %5420 = vmatprep.subr.bf16.mxu1 %v7430_v2  ;;  %v7511_v2 = vld [vmem:[#allocation8 + $0x104c] ss:$48 sps:$4 sm:$0xff]  }
 0x371   :  { %5412 = vmatmul.mubr.bf16.vlgmr.msra.gmra.mrb[12].mxu1 %v8534_v48  ;;  %v5126_v9 = vpop.f32.mrb[16].mxu0  ;;  %v7439_v48 = vld [vmem:[#allocation8 + $0x74c] ss:$48 sps:$4 sm:$0xff]  }
 0x372   :  { %5421 = vmatpush1.bf16.msra.mxu1 %v7428_v1  ;;  %5452 = vmatprep.mubr.bf16.mxu1 %v8496_v6  ;;  %v8730_v19 = vadd.f32 %v5126_v9, %v8706_v57  ;;  %v5128_v5 = vpop.f32.mrb[17].mxu0  ;;  %v7442_v6 = vld [vmem:[#allocation8 + $0x7ac] ss:$48 sps:$4 sm:$0xff]   ;;  %v7443_v57 = vld [vmem:[#allocation8 + $0x808] ss:$48 sps:$4 sm:$0xff]  }
 0x373   :  { %5422 = vmatprep.subr.bf16.mxu1 %v7433_v29  ;;  %v8733_v35 = vadd.f32 %v5128_v5, %v8709_v26  ;;  %v5130_v40 = vpop.f32.mrb[18].mxu0  ;;  %v7446_v26 = vld [vmem:[#allocation8 + $0x868] ss:$48 sps:$4 sm:$0xff]   ;;  %v7514_v9 = vld [vmem:[#allocation8 + $0x10ac] ss:$48 sps:$4 sm:$0xff]  }
 0x374   :  { %v5131_v8 = vpop.f32.mrb[19].mxu0  ;;  %v7509_v29 = vld [vmem:[#allocation8 + $0x1048] ss:$48 sps:$4 sm:$0xff]   ;;  %v7517_v40 = vld [vmem:[#allocation8 + $0x110c] ss:$48 sps:$4 sm:$0xff]  }
 0x375   :  { %v7512_v5 = vld [vmem:[#allocation8 + $0x10a8] ss:$48 sps:$4 sm:$0xff]  }
 0x376   :  { %5423 = vmatpush1.bf16.msra.mxu1 %v7431_v44  ;;  %v7515_v8 = vld [vmem:[#allocation8 + $0x1108] ss:$48 sps:$4 sm:$0xff]  }
 0x377   :  { %5424 = vmatprep.subr.bf16.mxu1 %v7436_v34 }
 0x37a   :  { %5425 = vmatpush1.bf16.msra.mxu1 %v7434_v60  ;;  %v7520_v60 = vld [vmem:[#allocation8 + $0x116c] ss:$48 sps:$4 sm:$0xff]  }
 0x37b   :  { %5426 = vmatprep.subr.bf16.mxu1 %v7439_v48  ;;  %v7518_v48 = vld [vmem:[#allocation8 + $0x1168] ss:$48 sps:$4 sm:$0xff]  }
 0x37e   :  { %5427 = vmatpush1.bf16.msra.mxu1 %v7437_v53  ;;  %v7523_v53 = vld [vmem:[#allocation8 + $0x11cc] ss:$48 sps:$4 sm:$0xff]  }
 0x37f   :  { %5428 = vmatprep.subr.bf16.mxu1 %v7442_v6 }
 0x382   :  { %5429 = vmatpush1.bf16.msra.mxu1 %v7440_v25 }
 0x383   :  { %5430 = vmatprep.subr.bf16.mxu1 %v7445_v46  ;;  %v7521_v46 = vld [vmem:[#allocation8 + $0x11c8] ss:$48 sps:$4 sm:$0xff]  }
 0x386   :  { %5431 = vmatpush1.bf16.msra.mxu1 %v7443_v57 }
 0x387   :  { %5432 = vmatprep.subr.bf16.mxu1 %v7448_v47 }
 0x38a   :  { %5433 = vmatpush1.bf16.msra.mxu1 %v7446_v26 }
 0x38b   :  { %5434 = vmatprep.subr.bf16.mxu1 %v7451_v55 }
 0x38e   :  { %5435 = vmatpush1.bf16.msra.mxu1 %v7449_v56 }
 0x38f   :  { %5436 = vmatprep.subr.bf16.mxu1 %v7454_v36 }
 0x392   :  { %5437 = vmatpush1.bf16.msra.mxu1 %v7452_v63 }
 0x393   :  { %5438 = vmatprep.subr.bf16.mxu1 %v7457_v17 }
 0x396   :  { %5439 = vmatpush1.bf16.msra.mxu1 %v7455_v39 }
 0x397   :  { %5440 = vmatprep.subr.bf16.mxu1 %v7460_v54 }
 0x39a   :  { %5441 = vmatpush1.bf16.msra.mxu1 %v7458_v16  ;;  %v7524_v16 = vld [vmem:[#allocation10] ss:$24 sps:$4 sm:$0xff]  }
 0x39b   :  { %5442 = vmatprep.subr.bf16.mxu1 %v7463_v41  ;;  %v7526_v41 = vld [vmem:[#allocation10 + $0x4] ss:$24 sps:$4 sm:$0xff]  }
 0x39c   :  { %5793 = vmatprep.subr.bf16.mxu0 %v7526_v41  ;;  %v8942_v41 = vld [vmem:[#allocation21_spill] sm:$0xff] }
 0x39d   :  { %5794 = vmatpush1.bf16.msra.mxu0 %v7524_v16 }
 0x39e   :  { %5443 = vmatpush1.bf16.msra.mxu1 %v7461_v51  ;;  %v7529_v51 = vld [vmem:[#allocation10 + $0x34] ss:$24 sps:$4 sm:$0xff]  }
 0x39f   :  { %5444 = vmatprep.subr.bf16.mxu1 %v7466_v3  ;;  %5795 = vmatprep.subr.bf16.mxu0 %v7529_v51  ;;  %v7530_v3 = vld [vmem:[#allocation10 + $0x60] ss:$24 sps:$4 sm:$0xff]  }
 0x3a2   :  { %5445 = vmatpush1.bf16.msra.mxu1 %v7464_v11  ;;  %v7535_v11 = vld [vmem:[#allocation10 + $0x94] ss:$24 sps:$4 sm:$0xff]  }
 0x3a3   :  { %5446 = vmatprep.subr.bf16.mxu1 %v7469_v0  ;;  %v7533_v0 = vld [vmem:[#allocation10 + $0x90] ss:$24 sps:$4 sm:$0xff]  }
 0x3a6   :  { %5447 = vmatpush1.bf16.msra.mxu1 %v7467_v4  ;;  %v7538_v4 = vld [vmem:[#allocation10 + $0xc4] ss:$24 sps:$4 sm:$0xff]  }
 0x3a7   :  { %5448 = vmatprep.subr.bf16.mxu1 %v7472_v28  ;;  %v7536_v28 = vld [vmem:[#allocation10 + $0xc0] ss:$24 sps:$4 sm:$0xff]  }
 0x3aa   :  { %5449 = vmatpush1.bf16.msra.mxu1 %v7470_v42  ;;  %v7541_v42 = vld [vmem:[#allocation10 + $0xf4] ss:$24 sps:$4 sm:$0xff]  }
 0x3ab   :  { %5450 = vmatprep.subr.bf16.mxu1 %v7475_v18  ;;  %v7539_v18 = vld [vmem:[#allocation10 + $0xf0] ss:$24 sps:$4 sm:$0xff]  }
 0x3ae   :  { %5451 = vmatpush1.bf16.msra.mxu1 %v7473_v12 }
 0x3af   :  { %5461 = vmatprep.subr.bf16.mxu1 %v7478_v33  ;;  %v7544_v33 = vld [vmem:[#allocation10 + $0xc] ss:$24 sps:$4 sm:$0xff]  }
 0x3b1   :  { %5453 = vmatmul.mubr.bf16.vlgmr.msra.gmra.mrb[12].mxu1 %v8588_v23  ;;  %v7491_v23 = vld [vmem:[#allocation8 + $0xe08] ss:$48 sps:$4 sm:$0xff]  }
 0x3b2   :  { %5462 = vmatpush1.bf16.msra.mxu1 %v7476_v22  ;;  %5493 = vmatprep.mubr.bf16.mxu1 %v8627_v43  ;;  %v7494_v43 = vld [vmem:[#allocation8 + $0xe68] ss:$48 sps:$4 sm:$0xff]   ;;  %v7818_v22 = vmov 0  }
 0x3b3   :  { %5463 = vmatprep.subr.bf16.mxu1 %v7481_v58  ;;  %5825 = vmatprep.mubr.bf16.mxu0 %v7818_v22 }
 0x3b6   :  { %5464 = vmatpush1.bf16.msra.mxu1 %v7479_v27 }
 0x3b7   :  { %5465 = vmatprep.subr.bf16.mxu1 %v7484_v20 }
 0x3ba   :  { %5466 = vmatpush1.bf16.msra.mxu1 %v7482_v13 }
 0x3bb   :  { %5467 = vmatprep.subr.bf16.mxu1 %v7487_v31 }
 0x3be   :  { %5468 = vmatpush1.bf16.msra.mxu1 %v7485_v24 }
 0x3bf   :  { %5469 = vmatprep.subr.bf16.mxu1 %v7490_v10 }
 0x3c2   :  { %5470 = vmatpush1.bf16.msra.mxu1 %v7488_v38 }
 0x3c3   :  { %5471 = vmatprep.subr.bf16.mxu1 %v7493_v45 }
 0x3c6   :  { %5472 = vmatpush1.bf16.msra.mxu1 %v7491_v23 }
 0x3c7   :  { %5473 = vmatprep.subr.bf16.mxu1 %v7496_v61 }
 0x3ca   :  { %5474 = vmatpush1.bf16.msra.mxu1 %v7494_v43 }
 0x3cb   :  { %5475 = vmatprep.subr.bf16.mxu1 %v7499_v21 }
 0x3ce   :  { %5476 = vmatpush1.bf16.msra.mxu1 %v7497_v15 }
 0x3cf   :  { %5477 = vmatprep.subr.bf16.mxu1 %v7502_v50 }
 0x3d2   :  { %5478 = vmatpush1.bf16.msra.mxu1 %v7500_v37 }
 0x3d3   :  { %5479 = vmatprep.subr.bf16.mxu1 %v7505_v49 }
 0x3d6   :  { %5480 = vmatpush1.bf16.msra.mxu1 %v7503_v62 }
 0x3d7   :  { %5481 = vmatprep.subr.bf16.mxu1 %v7508_v7  ;;  %v7542_v7 = vld [vmem:[#allocation10 + $0x8] ss:$24 sps:$4 sm:$0xff]  }
 0x3da   :  { %5482 = vmatpush1.bf16.msra.mxu1 %v7506_v14  ;;  %v5546_v1 = vpop.xlane.xlu1 %5545 }
 0x3db   :  { %v5547_v44 = vsub.f32 %v8712_v30, %v5546_v1  ;;  %5483 = vmatprep.subr.bf16.mxu1 %v7511_v2  ;;  %v7547_v2 = vld [vmem:[#allocation10 + $0x3c] ss:$24 sps:$4 sm:$0xff]   ;;  %v7550_v1 = vld [vmem:[#allocation10 + $0x6c] ss:$24 sps:$4 sm:$0xff]  }
 0x3dd   :  { %v5548_v34 = vmul.f32 1.442695, %v5547_v44  ;;  %v7553_v44 = vld [vmem:[#allocation10 + $0x9c] ss:$24 sps:$4 sm:$0xff]  }
 0x3de   :  { %5484 = vmatpush1.bf16.msra.mxu1 %v7509_v29  ;;  %v7548_v29 = vld [vmem:[#allocation10 + $0x68] ss:$24 sps:$4 sm:$0xff]  }
 0x3df   :  { %7598 = vpow2.f32 %v5548_v34  ;;  %5485 = vmatprep.subr.bf16.mxu1 %v7514_v9  ;;  %v7551_v9 = vld [vmem:[#allocation10 + $0x98] ss:$24 sps:$4 sm:$0xff]   ;;  %v7556_v34 = vld [vmem:[#allocation10 + $0xcc] ss:$24 sps:$4 sm:$0xff]  }
 0x3e2   :  { %5486 = vmatpush1.bf16.msra.mxu1 %v7512_v5  ;;  %v7554_v5 = vld [vmem:[#allocation10 + $0xc8] ss:$24 sps:$4 sm:$0xff]  }
 0x3e3   :  { %5487 = vmatprep.subr.bf16.mxu1 %v7517_v40  ;;  %v7559_v40 = vld [vmem:[#allocation10 + $0xfc] ss:$24 sps:$4 sm:$0xff]  }
 0x3e5   :  { %v5541_v6 = vpop.xlane.xlu0 %5540 }
 0x3e6   :  { %5488 = vmatpush1.bf16.msra.mxu1 %v7515_v8  ;;  %7600 = vrcp.f32 %v5541_v6  ;;  %v7557_v8 = vld [vmem:[#allocation10 + $0xf8] ss:$24 sps:$4 sm:$0xff]  }
 0x3e7   :  { %5489 = vmatprep.subr.bf16.mxu1 %v7520_v60  ;;  %v7562_v60 = vld [vmem:[#allocation10 + $0x14] ss:$24 sps:$4 sm:$0xff]   ;;  %v7563_v6 = vld [vmem:[#allocation10 + $0x40] ss:$24 sps:$4 sm:$0xff]  }
 0x3e9   :  { %v7599_v25 = vpop.eup %7598  ;;  %v5530_v45 = vpop.xlane.xlu0 %5529 }
 0x3ea   :  { %5490 = vmatpush1.bf16.msra.mxu1 %v7518_v48  ;;  %v5550_v30 = vsel %vm5521_vm7, %v7599_v25, 0.0  ;;  %v7560_v48 = vld [vmem:[#allocation10 + $0x10] ss:$24 sps:$4 sm:$0xff]  }
 0x3eb   :  { %5551 = vadd.xlane.f32.xlu1 %v5550_v30  ;;  %5491 = vmatprep.subr.bf16.mxu1 %v7523_v53  ;;  %v7565_v53 = vld [vmem:[#allocation10 + $0x44] ss:$24 sps:$4 sm:$0xff]   ;;  %v7566_v30 = vld [vmem:[#allocation10 + $0x70] ss:$24 sps:$4 sm:$0xff]  }
 0x3ee   :  { %5492 = vmatpush1.bf16.msra.mxu1 %v7521_v46  ;;  %v7571_v46 = vld [vmem:[#allocation10 + $0xa4] ss:$24 sps:$4 sm:$0xff]  }
 0x3f0   :  { %v7601_v57 = vpop.eup %7600 }
 0x3f1   :  { %5494 = vmatmul.mubr.bf16.vlgmr.msra.gmra.mrb[12].mxu1 %v8659_v32  ;;  %v5543_v47 = vmul.f32 %v7601_v57, %v8718_v52  ;;  %v7527_v32 = vld [vmem:[#allocation10 + $0x30] ss:$24 sps:$4 sm:$0xff]   ;;  %v7532_v52 = vld [vmem:[#allocation10 + $0x64] ss:$24 sps:$4 sm:$0xff]   ;;  %v7569_v57 = vld [vmem:[#allocation10 + $0xa0] ss:$24 sps:$4 sm:$0xff]  }
 0x3f2   :  { %5796 = vmatpush1.bf16.msra.mxu0 %v7527_v32 }
 0x3f3   :  { %5797 = vmatprep.subr.bf16.mxu0 %v7532_v52 }
 0x3f6   :  { %5798 = vmatpush1.bf16.msra.mxu0 %v7530_v3 }
 0x3f7   :  { %5799 = vmatprep.subr.bf16.mxu0 %v7535_v11 }
 0x3fa   :  { %5800 = vmatpush1.bf16.msra.mxu0 %v7533_v0 }
 0x3fb   :  { %5801 = vmatprep.subr.bf16.mxu0 %v7538_v4 }
 0x3fc   :  { %5556 = vrot.lane.b32.xlu1 %v5543_v47, %s7817_s6  ;;  %v7574_v47 = vld [vmem:[#allocation10 + $0xd4] ss:$24 sps:$4 sm:$0xff]  }
 0x3fe   :  { %5802 = vmatpush1.bf16.msra.mxu0 %v7536_v28 }
 0x3ff   :  { %5803 = vmatprep.subr.bf16.mxu0 %v7541_v42  ;;  %v5935_v42 = vld [vmem:[#allocation13 + $0x1] ss:$4 sm:$0x3] }
 0x402   :  { %5804 = vmatpush1.bf16.msra.mxu0 %v7539_v18 }
 0x403   :  { %5834 = vmatprep.subr.bf16.mxu0 %v7544_v33  ;;  %v5944_v33 = vrot.slane %v5935_v42, %v8942_v41 }
 0x404   :  { %v5249_v26 = vpop.f32.mrb[8].mxu1 }
 0x405   :  { %v5250_v55 = vpop.f32.mrb[9].mxu1  ;;  %v7572_v26 = vld [vmem:[#allocation10 + $0xd0] ss:$24 sps:$4 sm:$0xff]  }
 0x406   :  { %v8741_v56 = vpop.f32.mrb[10].mxu1  ;;  %v7577_v55 = vld [vmem:[#allocation10 + $0x104] ss:$24 sps:$4 sm:$0xff]  }
 0x407   :  { %v8743_v36 = vpop.f32.mrb[11].mxu1 }
 0x431   :  { %v5372_v63 = vpop.f32.mrb[20].mxu0 }
 0x432   :  { %v5374_v17 = vpop.f32.mrb[21].mxu0 }
 0x433   :  { %v5376_v39 = vpop.f32.mrb[22].mxu0 }
 0x434   :  { %v5377_v54 = vpop.f32.mrb[23].mxu0  ;;  %v8941_v39 = vld [vmem:[#allocation20_spill] sm:$0xff] }
 0x435   :  { %v5940_v18 = vrot.slane %v5935_v42, %v8941_v39 }
 0x478   :  { %v5552_v12 = vpop.xlane.xlu1 %5551 }
 0x479   :  { %7602 = vrcp.f32 %v5552_v12 }
 0x47a   :  { %7604 = vrcp.f32 %v5530_v45 }
 0x47c   :  { %v5557_v43 = vpop.permute.xlu1 %5556 }
 0x483   :  { %v7603_v58 = vpop.eup %7602 }
 0x484   :  { %v5554_v27 = vmul.f32 %v7603_v58, %v7599_v25  ;;  %v7605_v23 = vpop.eup %7604  ;;  %v7568_v25 = vld [vmem:[#allocation10 + $0x74] ss:$24 sps:$4 sm:$0xff]  }
 0x485   :  { %v5532_v61 = vmul.f32 %v7605_v23, %v8722_v59  ;;  %v7545_v59 = vld [vmem:[#allocation10 + $0x38] ss:$24 sps:$4 sm:$0xff]  }
 0x486   :  { %5560 = vrot.lane.b32.xlu0 %v5554_v27, %s7819_s23 }
 0x487   :  { %v5563_v21 = vsel %vm5521_vm7, %v5532_v61, 0.0 }
 0x488   :  { %v5565_v15 = vsel %vm5564_vm8, %v5563_v21, %v5557_v43 }
 0x489   :  { %v5567_v50 = vsel %vm5566_vm9, %v5565_v15, 0.0 }
 0x4c4   :  { %v5495_v20 = vpop.f32.mrb[12].mxu1 }
 0x4c5   :  { %v5496_v13 = vpop.f32.mrb[13].mxu1 }
 0x4c6   :  { %v5497_v31 = vpop.f32.mrb[14].mxu1 }
 0x4c7   :  { %v8745_v24 = vadd.f32 %v5497_v31, %v5372_v63  ;;  %v5499_v10 = vpop.f32.mrb[15].mxu1  ;;  %v7575_v63 = vld [vmem:[#allocation10 + $0x100] ss:$24 sps:$4 sm:$0xff]   ;;  %v5954_v31 = vld [vmem:[#allocation13 + $0x2] ss:$4 sm:$0x3] }
 0x4c8   :  { %v8747_v38 = vadd.f32 %v5499_v10, %v5374_v17  ;;  %v5918_v17 = vld [vmem:[#allocation13] ss:$4 sm:$0x3]  ;;  %v5959_v10 = vrot.slane %v5954_v31, %v8941_v39  ;;  %v5963_v23 = vrot.slane %v5954_v31, %v8942_v41 }
 0x4c9   :  { %v5923_v54 = vrot.slane %v5918_v17, %v8941_v39  ;;  %v5927_v51 = vrot.slane %v5918_v17, %v8942_v41 }
 0x4f8   :  { %v5561_v37 = vpop.permute.xlu0 %5560 }
 0x4f9   :  { %v5569_v49 = vsel %vm5568_vm10, %v5567_v50, %v5561_v37 }
 0x4fa   :  { %v5571_v62 = vsel %vm5570_vm11, %v5569_v49, 0.0 }
 0x4fb   :  { %v5572_v14 = vpack.c.bf16 %v5571_v62, %v5571_v62 }
 0x4fd   :  { %6610 = vmatmul.mubr.msk.bf16.vlgmr.msra.gmra.mrb[24].mxu0 %vm5789_vm12, %v5572_v14 }
 0x4fe   :  { %5835 = vmatpush1.bf16.msra.mxu0 %v7542_v7  ;;  %5866 = vmatprep.mubr.bf16.mxu0 %v7818_v22 }
 0x4ff   :  { %5836 = vmatprep.subr.bf16.mxu0 %v7547_v2 }
 0x502   :  { %5837 = vmatpush1.bf16.msra.mxu0 %v7545_v59 }
 0x503   :  { %5838 = vmatprep.subr.bf16.mxu0 %v7550_v1 }
 0x506   :  { %5839 = vmatpush1.bf16.msra.mxu0 %v7548_v29 }
 0x507   :  { %5840 = vmatprep.subr.bf16.mxu0 %v7553_v44 }
 0x50a   :  { %5841 = vmatpush1.bf16.msra.mxu0 %v7551_v9 }
 0x50b   :  { %5842 = vmatprep.subr.bf16.mxu0 %v7556_v34 }
 0x50e   :  { %5843 = vmatpush1.bf16.msra.mxu0 %v7554_v5 }
 0x50f   :  { %5844 = vmatprep.subr.bf16.mxu0 %v7559_v40 }
 0x512   :  { %5845 = vmatpush1.bf16.msra.mxu0 %v7557_v8 }
 0x513   :  { %5875 = vmatprep.subr.bf16.mxu0 %v7562_v60 }
 0x515   :  { %6611 = vmatmul.mubr.msk.bf16.vlgmr.msra.gmra.mrb[28].mxu0 %vm5789_vm12, %v5572_v14 }
 0x516   :  { %5876 = vmatpush1.bf16.msra.mxu0 %v7560_v48  ;;  %5907 = vmatprep.mubr.bf16.mxu0 %v7818_v22 }
 0x517   :  { %5877 = vmatprep.subr.bf16.mxu0 %v7565_v53 }
 0x51a   :  { %5878 = vmatpush1.bf16.msra.mxu0 %v7563_v6 }
 0x51b   :  { %5879 = vmatprep.subr.bf16.mxu0 %v7568_v25 }
 0x51e   :  { %5880 = vmatpush1.bf16.msra.mxu0 %v7566_v30 }
 0x51f   :  { %5881 = vmatprep.subr.bf16.mxu0 %v7571_v46 }
 0x522   :  { %5882 = vmatpush1.bf16.msra.mxu0 %v7569_v57 }
 0x523   :  { %5883 = vmatprep.subr.bf16.mxu0 %v7574_v47 }
 0x526   :  { %5884 = vmatpush1.bf16.msra.mxu0 %v7572_v26 }
 0x527   :  { %5885 = vmatprep.subr.bf16.mxu0 %v7577_v55 }
 0x52a   :  { %5886 = vmatpush1.bf16.msra.mxu0 %v7575_v63 }
 0x52d   :  { %6612 = vmatmul.mubr.msk.bf16.vlgmr.msra.gmra.mrb[32].mxu0 %vm5789_vm12, %v5572_v14 }
 0x5d0   :  { %v5827_v16 = vpop.f32.mrb[24].mxu0 }
 0x5d1   :  { %v5916_v32 = vadd.f32 %v5827_v16, %v8730_v19  ;;  %v5829_v52 = vpop.f32.mrb[25].mxu0 }
 0x5d2   :  { %v5917_v3 = vadd.f32 %v5829_v52, %v8733_v35  ;;  %v5831_v11 = vpop.f32.mrb[26].mxu0 }
 0x5d3   :  { %v5930_v0 = vadd.f32 %v5923_v54, %v5916_v32  ;;  %v5832_v4 = vpop.f32.mrb[27].mxu0 }
 0x5d4   :  { %v5931_v28 = vadd.f32 %v5927_v51, %v5917_v3 }
 0x5d5   :  { %5970 = vst [vmem:[#allocation14 + $0x10] sm:$0xff] %v5930_v0 }
 0x5d6   :  { %5971 = vst [vmem:[#allocation14 + $0x18] sm:$0xff] %v5931_v28 }
 0x5e8   :  { %v5868_v12 = vpop.f32.mrb[28].mxu0 }
 0x5e9   :  { %v5932_v22 = vadd.f32 %v5868_v12, %v8741_v56  ;;  %v5870_v58 = vpop.f32.mrb[29].mxu0 }
 0x5ea   :  { %v5933_v19 = vadd.f32 %v5870_v58, %v8743_v36  ;;  %v5872_v27 = vpop.f32.mrb[30].mxu0 }
 0x5eb   :  { %v5947_v20 = vadd.f32 %v5940_v18, %v5932_v22  ;;  %v5873_v35 = vpop.f32.mrb[31].mxu0 }
 0x5ec   :  { %v5948_v13 = vadd.f32 %v5944_v33, %v5933_v19 }
 0x5ed   :  { %5972 = vst [vmem:[#allocation14 + $0x20] sm:$0xff] %v5947_v20 }
 0x5ee   :  { %5973 = vst [vmem:[#allocation14 + $0x28] sm:$0xff] %v5948_v13 }
 0x600   :  { %v5909_v45 = vpop.f32.mrb[32].mxu0 }
 0x601   :  { %v5951_v61 = vadd.f32 %v8745_v24, %v5909_v45  ;;  %v5911_v43 = vpop.f32.mrb[33].mxu0 }
 0x602   :  { %v5952_v56 = vadd.f32 %v8747_v38, %v5911_v43  ;;  %v5913_v36 = vpop.f32.mrb[34].mxu0 }
 0x603   :  { %v5966_v21 = vadd.f32 %v5959_v10, %v5951_v61  ;;  %v5914_v15 = vpop.f32.mrb[35].mxu0 }
 0x604   :  { %v5967_v50 = vadd.f32 %v5963_v23, %v5952_v56 }
 0x605   :  { %5968 = vst [vmem:[#allocation14] sm:$0xff] %v5966_v21 }
 0x606   :  { %5969 = vst [vmem:[#allocation14 + $0x8] sm:$0xff] %v5967_v50 }
 0x607   :  { %7785 = shalt.err (!%p7782_p4)
}
 0x608   :  { %s7786_s27 = scalar_lea.hbm %s8785_s7, 1152 }
 0x609   :  { %p7787_p5 = scmp.ne.s32.totalorder %s8785_s7, %s7786_s27  ;;  %p7790_p6 = scmp.lt.u32.totalorder %s7786_s27, %s8785_s7 }
 0x60b   :  { %p7792_p7 = pnand %p7790_p6, %p7787_p5 }
 0x60d   :  { %7795 = shalt.err (!%p7792_p7)
}
 0x60e   :  { %5986 = dma.vmem_to_hbm [thread:$0]  %s5984_s14, 1152, %s8785_s7, [#allocation4]  }
 0x60f   :  { %7804 = dma.done.wait [#allocation4], 1152  }
 0x610   :  { %7805 = vsyncadd [#allocation4], 4294966144 }
 0x611   :  { %5990 = vsyncpa [#allocation3], 1 }
 0x612   :  { %5991 = vsyncpa [#allocation6], 1 }
 0x613   :  { %5992 = vsyncpa [#allocation9], 1 }
 0x614   :  { %5993 = vsyncpa [#allocation12], 1 }
 0x615   :  { %5994 = vsyncpa [#allocation4], 1 }

</bundles_post_ra>
